<compile_context>
chip_gen: v6e
topology: v6e:2x2x1
jax: 0.10.0
libtpu: 0.0.40
codegen_flags: <defaults>
</compile_context>

<pallas_src>
import math

import jax
import jax.numpy as jnp
from jax.experimental import pallas as pl
from jax.experimental.pallas import tpu as pltpu


# ----------------------------------------------------------------------------
# Kernel 1: fused BatchNorm1d + position embedding + input projection + GRU
#           recurrence for ONE direction (grid axis 0 = direction).
# ----------------------------------------------------------------------------
def _bigru_kernel(docs_ref, poses_ref, emb_ref,
                  wdoc_ref, wpos_ref, whh_ref, bih_ref, bhh_ref,
                  out_ref, gi_scr):
    # docs_ref : (S, B, F)     time-major raw documents
    # poses_ref: (S, B, 1)     int32 position ids, time-major
    # emb_ref  : (Vp, P)       zero-padded embedding table (row 0 == 0)
    # wdoc_ref : (1, 3, F, H)  input->gate weights (document part), this dir
    # wpos_ref : (1, 3, P, H)  input->gate weights (position part), this dir
    # whh_ref  : (1, 3, H, H)  hidden->gate weights, this dir
    # bih_ref  : (1, 3, 1, H)  input biases
    # bhh_ref  : (1, 3, 1, H)  hidden biases
    # out_ref  : (1, S, B, H)  this direction's hidden states
    # gi_scr   : (3, S, B, H)  VMEM scratch: hoisted input projections (r,z,n)
    S, B, F = docs_ref.shape
    H = out_ref.shape[3]
    Vp, P = emb_ref.shape

    # --- BatchNorm1d(batch_size): channel == batch index, stats over (S, F),
    #     training-mode statistics, gamma=1, beta=0, eps=1e-5. ---------------
    x = docs_ref[...]                                              # (S, B, F)
    mean = jnp.mean(jnp.mean(x, axis=2, keepdims=True), axis=0, keepdims=True)
    xc = x - mean
    var = jnp.mean(jnp.mean(xc * xc, axis=2, keepdims=True),
                   axis=0, keepdims=True)
    xn = xc * jax.lax.rsqrt(var + 1e-5)                            # (S, B, F)

    # --- hoisted input projection, batched over ALL timesteps ---------------
    # one wide matmul per gate instead of S tiny ones.
    xf = xn.reshape(S * B, F)                                      # (S*B, F)
    pos_ids = poses_ref[...].reshape(S * B, 1)                     # (S*B, 1)
    lane_iota = jax.lax.broadcasted_iota(jnp.int32, (S * B, Vp), 1)
    onehot = (lane_iota == pos_ids).astype(jnp.float32)            # (S*B, Vp)
    pos = jnp.dot(onehot, emb_ref[...],
                  preferred_element_type=jnp.float32)              # (S*B, P)

    for g in range(3):                       # static, trace-time unrolled
        gi = (jnp.dot(xf, wdoc_ref[0, g], preferred_element_type=jnp.float32)
              + jnp.dot(pos, wpos_ref[0, g], preferred_element_type=jnp.float32)
              + bih_ref[0, g])                                     # (S*B, H)
        gi_scr[g] = gi.reshape(S, B, H)

    # --- recurrence (PyTorch gate order r, z, n), fully unrolled -------------
    whh_r, whh_z, whh_n = whh_ref[0, 0], whh_ref[0, 1], whh_ref[0, 2]
    bhh_r, bhh_z, bhh_n = bhh_ref[0, 0], bhh_ref[0, 1], bhh_ref[0, 2]
    rev = pl.program_id(0) == 1              # direction 1 walks seq backwards

    h = jnp.zeros((B, H), jnp.float32)
    for t in range(S):
        time = jnp.where(rev, S - 1 - t, t)
        gh_r = jnp.dot(h, whh_r, preferred_element_type=jnp.float32) + bhh_r
        gh_z = jnp.dot(h, whh_z, preferred_element_type=jnp.float32) + bhh_z
        gh_n = jnp.dot(h, whh_n, preferred_element_type=jnp.float32) + bhh_n
        r = jax.nn.sigmoid(gi_scr[0, time] + gh_r)
        z = jax.nn.sigmoid(gi_scr[1, time] + gh_z)
        n = jnp.tanh(gi_scr[2, time] + r * gh_n)
        h = (1.0 - z) * n + z * h
        out_ref[0, time] = h


def bigru_pallas(docs_tm, poses_tm, emb_padded, w_doc, w_pos, w_hh, b_ih, b_hh):
    # docs_tm: (S, B, F); poses_tm: (S, B, 1) int32; emb_padded: (Vp, P)
    # weights stacked per direction / gate.
    S, B, F = docs_tm.shape
    Vp, P = emb_padded.shape
    H = w_hh.shape[-1]
    return pl.pallas_call(
        _bigru_kernel,
        out_shape=jax.ShapeDtypeStruct((2, S, B, H), jnp.float32),
        grid=(2,),
        in_specs=[
            pl.BlockSpec((S, B, F), lambda d: (0, 0, 0)),
            pl.BlockSpec((S, B, 1), lambda d: (0, 0, 0)),
            pl.BlockSpec((Vp, P), lambda d: (0, 0)),
            pl.BlockSpec((1, 3, F, H), lambda d: (d, 0, 0, 0)),
            pl.BlockSpec((1, 3, P, H), lambda d: (d, 0, 0, 0)),
            pl.BlockSpec((1, 3, H, H), lambda d: (d, 0, 0, 0)),
            pl.BlockSpec((1, 3, 1, H), lambda d: (d, 0, 0, 0)),
            pl.BlockSpec((1, 3, 1, H), lambda d: (d, 0, 0, 0)),
        ],
        out_specs=pl.BlockSpec((1, S, B, H), lambda d: (d, 0, 0, 0)),
        scratch_shapes=[pltpu.VMEM((3, S, B, H), jnp.float32)],
        compiler_params=pltpu.CompilerParams(
            dimension_semantics=("parallel",)),
    )(docs_tm, poses_tm, emb_padded, w_doc, w_pos, w_hh, b_ih, b_hh)


# ----------------------------------------------------------------------------
# Kernel 2: single-head scaled dot-product self-attention over the whole batch
#           (BertSingleAttention; dropout = identity in eval).
# ----------------------------------------------------------------------------
def _attention_kernel(x_ref, val_ref, attn_ref):
    # TODO(synk): BertSingleAttention source not provided; assuming plain
    # softmax(QK^T/sqrt(d)) V with no learned Q/K/V/output projections.
    x = x_ref[...]                                                 # (B, S, D)
    scale = 1.0 / math.sqrt(x.shape[-1])
    scores = jnp.einsum('bqd,bkd->bqk', x, x,
                        preferred_element_type=jnp.float32) * scale
    scores = scores - jnp.max(scores, axis=-1, keepdims=True)
    e = jnp.exp(scores)
    p = e / jnp.sum(e, axis=-1, keepdims=True)
    attn_ref[...] = p
    val_ref[...] = jnp.einsum('bqk,bkd->bqd', p, x,
                              preferred_element_type=jnp.float32)


def attention_pallas(x):
    B, S, D = x.shape
    return pl.pallas_call(
        _attention_kernel,
        out_shape=(jax.ShapeDtypeStruct((B, S, D), jnp.float32),
                   jax.ShapeDtypeStruct((B, S, S), jnp.float32)),
    )(x)


# ----------------------------------------------------------------------------
# Full forward
# ----------------------------------------------------------------------------
@jax.jit
def sentence_attention_forward(documents, poses, params):
    # documents: (B, S, 2*word_rnn_size) f32;  poses: (B, S) int32
    B, S, F = documents.shape
    H = params["w_hh"].shape[-1]

    # tiny layout prep (XLA glue is only these cheap reorders; all compute,
    # including BN and the embedding lookup, is inside the Pallas kernels)
    docs_tm = jnp.transpose(documents, (1, 0, 2))                  # (S, B, F)
    poses_tm = jnp.transpose(poses, (1, 0))[:, :, None].astype(jnp.int32)

    emb = params["pos_embedding"]
    V, P = emb.shape
    Vp = ((V + 127) // 128) * 128        # lane-aligned one-hot contraction dim
    emb_padded = jnp.zeros((Vp, P), emb.dtype).at[:V, :].set(emb)

    gru_out = bigru_pallas(docs_tm, poses_tm, emb_padded,
                           params["w_doc"], params["w_pos"], params["w_hh"],
                           params["b_ih"], params["b_hh"])          # (2,S,B,H)

    # bidirectional output, batch-first, features = [forward | backward]
    outputs = jnp.transpose(gru_out, (2, 1, 0, 3)).reshape(B, S, 2 * H)

    values, sentence_attn = attention_pallas(outputs)
    return values, sentence_attn


# ----------------------------------------------------------------------------
# Deterministic parameter init (PyTorch-style uniform(-1/sqrt(H), 1/sqrt(H)))
# ----------------------------------------------------------------------------
def init_params(key, *, word_rnn_size, rnn_size, rnn_layers, pos_size, pos_dim):
    # TODO(synk): stacked GRU (rnn_layers > 1) not implemented in the fused
    # kernel; the demo (and common config) uses a single bidirectional layer.
    assert rnn_layers == 1
    F = 2 * word_rnn_size
    H = rnn_size

    k_emb, key = jax.random.split(key)
    emb = jax.random.normal(k_emb, (pos_size, pos_dim), jnp.float32)
    emb = emb.at[0].set(0.0)                       # padding_idx = 0

    bound = 1.0 / math.sqrt(H)
    key, k1, k2, k3, k4, k5 = jax.random.split(key, 6)
    u = lambda k, shape: jax.random.uniform(k, shape, jnp.float32, -bound, bound)
    return {
        "pos_embedding": emb,                      # (pos_size, pos_dim)
        "w_doc": u(k1, (2, 3, F, H)),              # dir, gate(r,z,n), F, H
        "w_pos": u(k2, (2, 3, pos_dim, H)),
        "w_hh":  u(k3, (2, 3, H, H)),
        "b_ih":  u(k4, (2, 3, 1, H)),
        "b_hh":  u(k5, (2, 3, 1, H)),
    }


if __name__ == "__main__":
    B = 4               # batch_size (also BatchNorm1d channel count)
    S = 16              # number of sentences (sequence length)
    WORD_RNN = 16       # word_rnn_size  -> document feature = 32
    RNN = 32            # rnn_size (GRU hidden per direction)
    LAYERS = 1          # rnn_layers
    POS_SIZE = 103
    POS_DIM = 48        # pos_embedding_dim (small for the demo)

    key = jax.random.PRNGKey(0)
    k_doc, k_pos, k_par = jax.random.split(key, 3)

    documents = jax.random.normal(k_doc, (B, S, 2 * WORD_RNN), jnp.float32)
    poses = jax.random.randint(k_pos, (B, S), 0, POS_SIZE, jnp.int32)

    params = init_params(k_par, word_rnn_size=WORD_RNN, rnn_size=RNN,
                         rnn_layers=LAYERS, pos_size=POS_SIZE, pos_dim=POS_DIM)

    values, attn = sentence_attention_forward(documents, poses, params)
    jax.block_until_ready((values, attn))

    assert values.shape == (B, S, 2 * RNN)
    assert attn.shape == (B, S, S)
    assert bool(jnp.all(jnp.isfinite(values))) and bool(jnp.all(jnp.isfinite(attn)))
    print("KERNEL_OK")
</pallas_src>

<mosaic_0001>
module attributes {stable_mosaic.version = 11 : i64} {
  func.func @_attention_kernel(%arg0: memref<4x16x64xf32, #tpu.memory_space<vmem>>, %arg1: memref<4x16x64xf32, #tpu.memory_space<vmem>>, %arg2: memref<4x16x16xf32, #tpu.memory_space<vmem>>) attributes {dimension_semantics = [], scalar_prefetch = 0 : i64, scratch_operands = 0 : i64, tpu.core_type = #tpu.core_type<tc>} {
    %c0 = arith.constant 0 : index
    %c0_0 = arith.constant 0 : index
    %c0_1 = arith.constant 0 : index
    %0 = vector.load %arg0[%c0, %c0_0, %c0_1] : memref<4x16x64xf32, #tpu.memory_space<vmem>>, vector<4x16x64xf32>
    "tpu.trace_start"() <{level = 10 : i32, message = "bqd,bkd->bqk"}> : () -> ()
    %cst = arith.constant dense<0.000000e+00> : vector<4x16x16xf32>
    %1 = tpu.matmul %0, %0, %cst {dimension_numbers = #tpu.dot_dimension_numbers<[2], [2], [1], [1], [0, 0, 0, 1, 1, 1], [0], [0]>} : vector<4x16x64xf32>, vector<4x16x64xf32>, vector<4x16x16xf32> -> vector<4x16x16xf32>
    "tpu.trace_stop"() : () -> ()
    %cst_2 = arith.constant 1.250000e-01 : f32
    %2 = vector.broadcast %cst_2 : f32 to vector<4x16x16xf32>
    %3 = arith.mulf %1, %2 : vector<4x16x16xf32>
    %cst_3 = arith.constant dense<0xFF800000> : vector<4x16xf32>
    %4 = vector.multi_reduction <maximumf>, %3, %cst_3 [2] : vector<4x16x16xf32> to vector<4x16xf32>
    %5 = vector.shape_cast %4 : vector<4x16xf32> to vector<4x16x1xf32>
    %6 = vector.broadcast %5 : vector<4x16x1xf32> to vector<4x16x16xf32>
    %7 = arith.subf %3, %6 : vector<4x16x16xf32>
    %8 = math.exp %7 : vector<4x16x16xf32>
    %cst_4 = arith.constant dense<0.000000e+00> : vector<4x16xf32>
    %9 = vector.multi_reduction <add>, %8, %cst_4 [2] : vector<4x16x16xf32> to vector<4x16xf32>
    %10 = vector.shape_cast %9 : vector<4x16xf32> to vector<4x16x1xf32>
    %11 = vector.broadcast %10 : vector<4x16x1xf32> to vector<4x16x16xf32>
    %12 = arith.divf %8, %11 : vector<4x16x16xf32>
    %c0_5 = arith.constant 0 : index
    %c0_6 = arith.constant 0 : index
    %c0_7 = arith.constant 0 : index
    %13 = vector.load %arg2[%c0_5, %c0_6, %c0_7] : memref<4x16x16xf32, #tpu.memory_space<vmem>>, vector<4x16x16xf32>
    tpu.vector_store %arg2[%c0_5, %c0_6, %c0_7], %12 {strides = array<i32>} : memref<4x16x16xf32, #tpu.memory_space<vmem>>, vector<4x16x16xf32>,
    "tpu.trace_start"() <{level = 10 : i32, message = "bqk,bkd->bqd"}> : () -> ()
    %cst_8 = arith.constant dense<0.000000e+00> : vector<4x16x64xf32>
    %14 = tpu.matmul %12, %0, %cst_8 {dimension_numbers = #tpu.dot_dimension_numbers<[2], [1], [1], [2], [0, 0, 0, 1, 1, 2], [0], [0]>} : vector<4x16x16xf32>, vector<4x16x64xf32>, vector<4x16x64xf32> -> vector<4x16x64xf32>
    "tpu.trace_stop"() : () -> ()
    %c0_9 = arith.constant 0 : index
    %c0_10 = arith.constant 0 : index
    %c0_11 = arith.constant 0 : index
    %15 = vector.load %arg1[%c0_9, %c0_10, %c0_11] : memref<4x16x64xf32, #tpu.memory_space<vmem>>, vector<4x16x64xf32>
    tpu.vector_store %arg1[%c0_9, %c0_10, %c0_11], %14 {strides = array<i32>} : memref<4x16x64xf32, #tpu.memory_space<vmem>>, vector<4x16x64xf32>,
    return
  }
}

module attributes {stable_mosaic.version = 11 : i64} {
  func.func @_bigru_kernel(%arg0: i32, %arg1: memref<16x4x32xf32, #tpu.memory_space<vmem>>, %arg2: memref<16x4x1xi32, #tpu.memory_space<vmem>>, %arg3: memref<128x48xf32, #tpu.memory_space<vmem>>, %arg4: memref<1x3x32x32xf32, #tpu.memory_space<vmem>>, %arg5: memref<1x3x48x32xf32, #tpu.memory_space<vmem>>, %arg6: memref<1x3x32x32xf32, #tpu.memory_space<vmem>>, %arg7: memref<1x3x1x32xf32, #tpu.memory_space<vmem>>, %arg8: memref<1x3x1x32xf32, #tpu.memory_space<vmem>>, %arg9: memref<1x16x4x32xf32, #tpu.memory_space<vmem>>, %arg10: memref<3x16x4x32xf32, #tpu.memory_space<vmem>>) attributes {dimension_semantics = [#tpu.dimension_semantics<parallel>], iteration_bounds = array<i64: 2>, scalar_prefetch = 0 : i64, scratch_operands = 1 : i64, tpu.core_type = #tpu.core_type<tc>, window_params = [{pipeline_mode = #tpu.pipeline_mode<synchronous>, transform_indices = @transform_0, window_bounds = array<i64: 16, 4, 32>}, {pipeline_mode = #tpu.pipeline_mode<synchronous>, transform_indices = @transform_1, window_bounds = array<i64: 16, 4, 1>}, {pipeline_mode = #tpu.pipeline_mode<synchronous>, transform_indices = @transform_2, window_bounds = array<i64: 128, 48>}, {transform_indices = @transform_3, window_bounds = array<i64: 1, 3, 32, 32>}, {transform_indices = @transform_4, window_bounds = array<i64: 1, 3, 48, 32>}, {transform_indices = @transform_5, window_bounds = array<i64: 1, 3, 32, 32>}, {transform_indices = @transform_6, window_bounds = array<i64: 1, 3, 1, 32>}, {transform_indices = @transform_7, window_bounds = array<i64: 1, 3, 1, 32>}, {transform_indices = @transform_8, window_bounds = array<i64: 1, 16, 4, 32>}]} {
    %c0 = arith.constant 0 : index
    %c0_0 = arith.constant 0 : index
    %c0_1 = arith.constant 0 : index
    %0 = vector.load %arg1[%c0, %c0_0, %c0_1] : memref<16x4x32xf32, #tpu.memory_space<vmem>>, vector<16x4x32xf32>
    %cst = arith.constant dense<0.000000e+00> : vector<16x4xf32>
    %1 = vector.multi_reduction <add>, %0, %cst [2] : vector<16x4x32xf32> to vector<16x4xf32>
    %2 = vector.shape_cast %1 : vector<16x4xf32> to vector<16x4x1xf32>
    %cst_2 = arith.constant 3.200000e+01 : f32
    %3 = vector.broadcast %cst_2 : f32 to vector<16x4x1xf32>
    %4 = arith.divf %2, %3 : vector<16x4x1xf32>
    %cst_3 = arith.constant dense<0.000000e+00> : vector<4x1xf32>
    %5 = vector.multi_reduction <add>, %4, %cst_3 [0] : vector<16x4x1xf32> to vector<4x1xf32>
    %6 = vector.shape_cast %5 : vector<4x1xf32> to vector<1x4x1xf32>
    %cst_4 = arith.constant 1.600000e+01 : f32
    %7 = vector.broadcast %cst_4 : f32 to vector<1x4x1xf32>
    %8 = arith.divf %6, %7 : vector<1x4x1xf32>
    %9 = vector.broadcast %8 : vector<1x4x1xf32> to vector<16x4x32xf32>
    %10 = arith.subf %0, %9 : vector<16x4x32xf32>
    %11 = arith.mulf %10, %10 : vector<16x4x32xf32>
    %cst_5 = arith.constant dense<0.000000e+00> : vector<16x4xf32>
    %12 = vector.multi_reduction <add>, %11, %cst_5 [2] : vector<16x4x32xf32> to vector<16x4xf32>
    %13 = vector.shape_cast %12 : vector<16x4xf32> to vector<16x4x1xf32>
    %cst_6 = arith.constant 3.200000e+01 : f32
    %14 = vector.broadcast %cst_6 : f32 to vector<16x4x1xf32>
    %15 = arith.divf %13, %14 : vector<16x4x1xf32>
    %cst_7 = arith.constant dense<0.000000e+00> : vector<4x1xf32>
    %16 = vector.multi_reduction <add>, %15, %cst_7 [0] : vector<16x4x1xf32> to vector<4x1xf32>
    %17 = vector.shape_cast %16 : vector<4x1xf32> to vector<1x4x1xf32>
    %cst_8 = arith.constant 1.600000e+01 : f32
    %18 = vector.broadcast %cst_8 : f32 to vector<1x4x1xf32>
    %19 = arith.divf %17, %18 : vector<1x4x1xf32>
    %cst_9 = arith.constant 9.99999974E-6 : f32
    %20 = vector.broadcast %cst_9 : f32 to vector<1x4x1xf32>
    %21 = arith.addf %19, %20 : vector<1x4x1xf32>
    %22 = math.rsqrt %21 : vector<1x4x1xf32>
    %23 = vector.broadcast %22 : vector<1x4x1xf32> to vector<16x4x32xf32>
    %24 = arith.mulf %10, %23 : vector<16x4x32xf32>
    %25 = vector.shape_cast %24 : vector<16x4x32xf32> to vector<64x32xf32>
    %c0_10 = arith.constant 0 : index
    %c0_11 = arith.constant 0 : index
    %c0_12 = arith.constant 0 : index
    %26 = vector.load %arg2[%c0_10, %c0_11, %c0_12] : memref<16x4x1xi32, #tpu.memory_space<vmem>>, vector<16x4x1xi32>
    %27 = vector.shape_cast %26 : vector<16x4x1xi32> to vector<64x1xi32>
    %28 = tpu.iota {dimensions = array<i32: 1>} : vector<64x128xi32>
    %29 = vector.broadcast %27 : vector<64x1xi32> to vector<64x128xi32>
    %30 = arith.cmpi eq, %28, %29 : vector<64x128xi32>
    %31 = arith.extui %30 : vector<64x128xi1> to vector<64x128xi32>
    %32 = arith.sitofp %31 : vector<64x128xi32> to vector<64x128xf32>
    %c0_13 = arith.constant 0 : index
    %c0_14 = arith.constant 0 : index
    %33 = vector.load %arg3[%c0_13, %c0_14] : memref<128x48xf32, #tpu.memory_space<vmem>>, vector<128x48xf32>
    %cst_15 = arith.constant dense<0.000000e+00> : vector<64x48xf32>
    %34 = tpu.matmul %32, %33, %cst_15 {dimension_numbers = #tpu.dot_dimension_numbers<[1], [0], [0], [1], [0, 0, 1, 1], [], []>} : vector<64x128xf32>, vector<128x48xf32>, vector<64x48xf32> -> vector<64x48xf32>
    %c0_16 = arith.constant 0 : index
    %c0_17 = arith.constant 0 : index
    %c0_18 = arith.constant 0 : index
    %c0_19 = arith.constant 0 : index
    %35 = vector.load %arg4[%c0_16, %c0_17, %c0_18, %c0_19] : memref<1x3x32x32xf32, #tpu.memory_space<vmem>>, vector<1x1x32x32xf32>
    %36 = vector.shape_cast %35 : vector<1x1x32x32xf32> to vector<32x32xf32>
    %cst_20 = arith.constant dense<0.000000e+00> : vector<64x32xf32>
    %37 = tpu.matmul %25, %36, %cst_20 {dimension_numbers = #tpu.dot_dimension_numbers<[1], [0], [0], [1], [0, 0, 1, 1], [], []>} : vector<64x32xf32>, vector<32x32xf32>, vector<64x32xf32> -> vector<64x32xf32>
    %c0_21 = arith.constant 0 : index
    %c0_22 = arith.constant 0 : index
    %c0_23 = arith.constant 0 : index
    %c0_24 = arith.constant 0 : index
    %38 = vector.load %arg5[%c0_21, %c0_22, %c0_23, %c0_24] : memref<1x3x48x32xf32, #tpu.memory_space<vmem>>, vector<1x1x48x32xf32>
    %39 = vector.shape_cast %38 : vector<1x1x48x32xf32> to vector<48x32xf32>
    %cst_25 = arith.constant dense<0.000000e+00> : vector<64x32xf32>
    %40 = tpu.matmul %34, %39, %cst_25 {dimension_numbers = #tpu.dot_dimension_numbers<[1], [0], [0], [1], [0, 0, 1, 1], [], []>} : vector<64x48xf32>, vector<48x32xf32>, vector<64x32xf32> -> vector<64x32xf32>
    %41 = arith.addf %37, %40 : vector<64x32xf32>
    %c0_26 = arith.constant 0 : index
    %c0_27 = arith.constant 0 : index
    %c0_28 = arith.constant 0 : index
    %c0_29 = arith.constant 0 : index
    %42 = vector.load %arg7[%c0_26, %c0_27, %c0_28, %c0_29] : memref<1x3x1x32xf32, #tpu.memory_space<vmem>>, vector<1x1x1x32xf32>
    %43 = vector.shape_cast %42 : vector<1x1x1x32xf32> to vector<1x32xf32>
    %44 = vector.broadcast %43 : vector<1x32xf32> to vector<64x32xf32>
    %45 = arith.addf %41, %44 : vector<64x32xf32>
    %46 = vector.shape_cast %45 : vector<64x32xf32> to vector<16x4x32xf32>
    %c0_30 = arith.constant 0 : index
    %c0_31 = arith.constant 0 : index
    %c0_32 = arith.constant 0 : index
    %c0_33 = arith.constant 0 : index
    %47 = vector.load %arg10[%c0_30, %c0_31, %c0_32, %c0_33] : memref<3x16x4x32xf32, #tpu.memory_space<vmem>>, vector<1x16x4x32xf32>
    %48 = vector.shape_cast %47 : vector<1x16x4x32xf32> to vector<16x4x32xf32>
    %49 = vector.shape_cast %46 : vector<16x4x32xf32> to vector<1x16x4x32xf32>
    tpu.vector_store %arg10[%c0_30, %c0_31, %c0_32, %c0_33], %49 {strides = array<i32>} : memref<3x16x4x32xf32, #tpu.memory_space<vmem>>, vector<1x16x4x32xf32>,
    %c0_34 = arith.constant 0 : index
    %c1 = arith.constant 1 : index
    %c0_35 = arith.constant 0 : index
    %c0_36 = arith.constant 0 : index
    %50 = vector.load %arg4[%c0_34, %c1, %c0_35, %c0_36] : memref<1x3x32x32xf32, #tpu.memory_space<vmem>>, vector<1x1x32x32xf32>
    %51 = vector.shape_cast %50 : vector<1x1x32x32xf32> to vector<32x32xf32>
    %cst_37 = arith.constant dense<0.000000e+00> : vector<64x32xf32>
    %52 = tpu.matmul %25, %51, %cst_37 {dimension_numbers = #tpu.dot_dimension_numbers<[1], [0], [0], [1], [0, 0, 1, 1], [], []>} : vector<64x32xf32>, vector<32x32xf32>, vector<64x32xf32> -> vector<64x32xf32>
    %c0_38 = arith.constant 0 : index
    %c1_39 = arith.constant 1 : index
    %c0_40 = arith.constant 0 : index
    %c0_41 = arith.constant 0 : index
    %53 = vector.load %arg5[%c0_38, %c1_39, %c0_40, %c0_41] : memref<1x3x48x32xf32, #tpu.memory_space<vmem>>, vector<1x1x48x32xf32>
    %54 = vector.shape_cast %53 : vector<1x1x48x32xf32> to vector<48x32xf32>
    %cst_42 = arith.constant dense<0.000000e+00> : vector<64x32xf32>
    %55 = tpu.matmul %34, %54, %cst_42 {dimension_numbers = #tpu.dot_dimension_numbers<[1], [0], [0], [1], [0, 0, 1, 1], [], []>} : vector<64x48xf32>, vector<48x32xf32>, vector<64x32xf32> -> vector<64x32xf32>
    %56 = arith.addf %52, %55 : vector<64x32xf32>
    %c0_43 = arith.constant 0 : index
    %c1_44 = arith.constant 1 : index
    %c0_45 = arith.constant 0 : index
    %c0_46 = arith.constant 0 : index
    %57 = vector.load %arg7[%c0_43, %c1_44, %c0_45, %c0_46] : memref<1x3x1x32xf32, #tpu.memory_space<vmem>>, vector<1x1x1x32xf32>
    %58 = vector.shape_cast %57 : vector<1x1x1x32xf32> to vector<1x32xf32>
    %59 = vector.broadcast %58 : vector<1x32xf32> to vector<64x32xf32>
    %60 = arith.addf %56, %59 : vector<64x32xf32>
    %61 = vector.shape_cast %60 : vector<64x32xf32> to vector<16x4x32xf32>
    %c1_47 = arith.constant 1 : index
    %c0_48 = arith.constant 0 : index
    %c0_49 = arith.constant 0 : index
    %c0_50 = arith.constant 0 : index
    %62 = vector.load %arg10[%c1_47, %c0_48, %c0_49, %c0_50] : memref<3x16x4x32xf32, #tpu.memory_space<vmem>>, vector<1x16x4x32xf32>
    %63 = vector.shape_cast %62 : vector<1x16x4x32xf32> to vector<16x4x32xf32>
    %64 = vector.shape_cast %61 : vector<16x4x32xf32> to vector<1x16x4x32xf32>
    tpu.vector_store %arg10[%c1_47, %c0_48, %c0_49, %c0_50], %64 {strides = array<i32>} : memref<3x16x4x32xf32, #tpu.memory_space<vmem>>, vector<1x16x4x32xf32>,
    %c0_51 = arith.constant 0 : index
    %c2 = arith.constant 2 : index
    %c0_52 = arith.constant 0 : index
    %c0_53 = arith.constant 0 : index
    %65 = vector.load %arg4[%c0_51, %c2, %c0_52, %c0_53] : memref<1x3x32x32xf32, #tpu.memory_space<vmem>>, vector<1x1x32x32xf32>
    %66 = vector.shape_cast %65 : vector<1x1x32x32xf32> to vector<32x32xf32>
    %cst_54 = arith.constant dense<0.000000e+00> : vector<64x32xf32>
    %67 = tpu.matmul %25, %66, %cst_54 {dimension_numbers = #tpu.dot_dimension_numbers<[1], [0], [0], [1], [0, 0, 1, 1], [], []>} : vector<64x32xf32>, vector<32x32xf32>, vector<64x32xf32> -> vector<64x32xf32>
    %c0_55 = arith.constant 0 : index
    %c2_56 = arith.constant 2 : index
    %c0_57 = arith.constant 0 : index
    %c0_58 = arith.constant 0 : index
    %68 = vector.load %arg5[%c0_55, %c2_56, %c0_57, %c0_58] : memref<1x3x48x32xf32, #tpu.memory_space<vmem>>, vector<1x1x48x32xf32>
    %69 = vector.shape_cast %68 : vector<1x1x48x32xf32> to vector<48x32xf32>
    %cst_59 = arith.constant dense<0.000000e+00> : vector<64x32xf32>
    %70 = tpu.matmul %34, %69, %cst_59 {dimension_numbers = #tpu.dot_dimension_numbers<[1], [0], [0], [1], [0, 0, 1, 1], [], []>} : vector<64x48xf32>, vector<48x32xf32>, vector<64x32xf32> -> vector<64x32xf32>
    %71 = arith.addf %67, %70 : vector<64x32xf32>
    %c0_60 = arith.constant 0 : index
    %c2_61 = arith.constant 2 : index
    %c0_62 = arith.constant 0 : index
    %c0_63 = arith.constant 0 : index
    %72 = vector.load %arg7[%c0_60, %c2_61, %c0_62, %c0_63] : memref<1x3x1x32xf32, #tpu.memory_space<vmem>>, vector<1x1x1x32xf32>
    %73 = vector.shape_cast %72 : vector<1x1x1x32xf32> to vector<1x32xf32>
    %74 = vector.broadcast %73 : vector<1x32xf32> to vector<64x32xf32>
    %75 = arith.addf %71, %74 : vector<64x32xf32>
    %76 = vector.shape_cast %75 : vector<64x32xf32> to vector<16x4x32xf32>
    %c2_64 = arith.constant 2 : index
    %c0_65 = arith.constant 0 : index
    %c0_66 = arith.constant 0 : index
    %c0_67 = arith.constant 0 : index
    %77 = vector.load %arg10[%c2_64, %c0_65, %c0_66, %c0_67] : memref<3x16x4x32xf32, #tpu.memory_space<vmem>>, vector<1x16x4x32xf32>
    %78 = vector.shape_cast %77 : vector<1x16x4x32xf32> to vector<16x4x32xf32>
    %79 = vector.shape_cast %76 : vector<16x4x32xf32> to vector<1x16x4x32xf32>
    tpu.vector_store %arg10[%c2_64, %c0_65, %c0_66, %c0_67], %79 {strides = array<i32>} : memref<3x16x4x32xf32, #tpu.memory_space<vmem>>, vector<1x16x4x32xf32>,
    %c0_68 = arith.constant 0 : index
    %c0_69 = arith.constant 0 : index
    %c0_70 = arith.constant 0 : index
    %c0_71 = arith.constant 0 : index
    %80 = vector.load %arg6[%c0_68, %c0_69, %c0_70, %c0_71] : memref<1x3x32x32xf32, #tpu.memory_space<vmem>>, vector<1x1x32x32xf32>
    %81 = vector.shape_cast %80 : vector<1x1x32x32xf32> to vector<32x32xf32>
    %c0_72 = arith.constant 0 : index
    %c1_73 = arith.constant 1 : index
    %c0_74 = arith.constant 0 : index
    %c0_75 = arith.constant 0 : index
    %82 = vector.load %arg6[%c0_72, %c1_73, %c0_74, %c0_75] : memref<1x3x32x32xf32, #tpu.memory_space<vmem>>, vector<1x1x32x32xf32>
    %83 = vector.shape_cast %82 : vector<1x1x32x32xf32> to vector<32x32xf32>
    %c0_76 = arith.constant 0 : index
    %c2_77 = arith.constant 2 : index
    %c0_78 = arith.constant 0 : index
    %c0_79 = arith.constant 0 : index
    %84 = vector.load %arg6[%c0_76, %c2_77, %c0_78, %c0_79] : memref<1x3x32x32xf32, #tpu.memory_space<vmem>>, vector<1x1x32x32xf32>
    %85 = vector.shape_cast %84 : vector<1x1x32x32xf32> to vector<32x32xf32>
    %c0_80 = arith.constant 0 : index
    %c0_81 = arith.constant 0 : index
    %c0_82 = arith.constant 0 : index
    %c0_83 = arith.constant 0 : index
    %86 = vector.load %arg8[%c0_80, %c0_81, %c0_82, %c0_83] : memref<1x3x1x32xf32, #tpu.memory_space<vmem>>, vector<1x1x1x32xf32>
    %87 = vector.shape_cast %86 : vector<1x1x1x32xf32> to vector<1x32xf32>
    %c0_84 = arith.constant 0 : index
    %c1_85 = arith.constant 1 : index
    %c0_86 = arith.constant 0 : index
    %c0_87 = arith.constant 0 : index
    %88 = vector.load %arg8[%c0_84, %c1_85, %c0_86, %c0_87] : memref<1x3x1x32xf32, #tpu.memory_space<vmem>>, vector<1x1x1x32xf32>
    %89 = vector.shape_cast %88 : vector<1x1x1x32xf32> to vector<1x32xf32>
    %c0_88 = arith.constant 0 : index
    %c2_89 = arith.constant 2 : index
    %c0_90 = arith.constant 0 : index
    %c0_91 = arith.constant 0 : index
    %90 = vector.load %arg8[%c0_88, %c2_89, %c0_90, %c0_91] : memref<1x3x1x32xf32, #tpu.memory_space<vmem>>, vector<1x1x1x32xf32>
    %91 = vector.shape_cast %90 : vector<1x1x1x32xf32> to vector<1x32xf32>
    %c1_i32 = arith.constant 1 : i32
    %92 = arith.cmpi eq, %arg0, %c1_i32 : i32
    %cst_92 = arith.constant 0.000000e+00 : f32
    %93 = vector.broadcast %cst_92 : f32 to vector<4x32xf32>
    %c15_i32 = arith.constant 15 : i32
    %c0_i32 = arith.constant 0 : i32
    %94 = arith.select %92, %c15_i32, %c0_i32 : i32
    %cst_93 = arith.constant dense<0.000000e+00> : vector<4x32xf32>
    %95 = tpu.matmul %93, %81, %cst_93 {dimension_numbers = #tpu.dot_dimension_numbers<[1], [0], [0], [1], [0, 0, 1, 1], [], []>} : vector<4x32xf32>, vector<32x32xf32>, vector<4x32xf32> -> vector<4x32xf32>
    %96 = vector.broadcast %87 : vector<1x32xf32> to vector<4x32xf32>
    %97 = arith.addf %95, %96 : vector<4x32xf32>
    %cst_94 = arith.constant dense<0.000000e+00> : vector<4x32xf32>
    %98 = tpu.matmul %93, %83, %cst_94 {dimension_numbers = #tpu.dot_dimension_numbers<[1], [0], [0], [1], [0, 0, 1, 1], [], []>} : vector<4x32xf32>, vector<32x32xf32>, vector<4x32xf32> -> vector<4x32xf32>
    %99 = vector.broadcast %89 : vector<1x32xf32> to vector<4x32xf32>
    %100 = arith.addf %98, %99 : vector<4x32xf32>
    %cst_95 = arith.constant dense<0.000000e+00> : vector<4x32xf32>
    %101 = tpu.matmul %93, %85, %cst_95 {dimension_numbers = #tpu.dot_dimension_numbers<[1], [0], [0], [1], [0, 0, 1, 1], [], []>} : vector<4x32xf32>, vector<32x32xf32>, vector<4x32xf32> -> vector<4x32xf32>
    %102 = vector.broadcast %91 : vector<1x32xf32> to vector<4x32xf32>
    %103 = arith.addf %101, %102 : vector<4x32xf32>
    %c0_96 = arith.constant 0 : index
    %104 = arith.index_cast %94 : i32 to index
    %c0_97 = arith.constant 0 : index
    %c0_98 = arith.constant 0 : index
    %105 = vector.load %arg10[%c0_96, %104, %c0_97, %c0_98] : memref<3x16x4x32xf32, #tpu.memory_space<vmem>>, vector<1x1x4x32xf32>
    %106 = vector.shape_cast %105 : vector<1x1x4x32xf32> to vector<4x32xf32>
    %107 = arith.addf %106, %97 : vector<4x32xf32>
    %108 = arith.negf %107 : vector<4x32xf32>
    %109 = math.exp %108 : vector<4x32xf32>
    %cst_99 = arith.constant 1.000000e+00 : f32
    %110 = vector.broadcast %cst_99 : f32 to vector<4x32xf32>
    %111 = arith.addf %110, %109 : vector<4x32xf32>
    %112 = arith.divf %110, %111 : vector<4x32xf32>
    %c1_100 = arith.constant 1 : index
    %113 = arith.index_cast %94 : i32 to index
    %c0_101 = arith.constant 0 : index
    %c0_102 = arith.constant 0 : index
    %114 = vector.load %arg10[%c1_100, %113, %c0_101, %c0_102] : memref<3x16x4x32xf32, #tpu.memory_space<vmem>>, vector<1x1x4x32xf32>
    %115 = vector.shape_cast %114 : vector<1x1x4x32xf32> to vector<4x32xf32>
    %116 = arith.addf %115, %100 : vector<4x32xf32>
    %117 = arith.negf %116 : vector<4x32xf32>
    %118 = math.exp %117 : vector<4x32xf32>
    %cst_103 = arith.constant 1.000000e+00 : f32
    %119 = vector.broadcast %cst_103 : f32 to vector<4x32xf32>
    %120 = arith.addf %119, %118 : vector<4x32xf32>
    %121 = arith.divf %119, %120 : vector<4x32xf32>
    %c2_104 = arith.constant 2 : index
    %122 = arith.index_cast %94 : i32 to index
    %c0_105 = arith.constant 0 : index
    %c0_106 = arith.constant 0 : index
    %123 = vector.load %arg10[%c2_104, %122, %c0_105, %c0_106] : memref<3x16x4x32xf32, #tpu.memory_space<vmem>>, vector<1x1x4x32xf32>
    %124 = vector.shape_cast %123 : vector<1x1x4x32xf32> to vector<4x32xf32>
    %125 = arith.mulf %112, %103 : vector<4x32xf32>
    %126 = arith.addf %124, %125 : vector<4x32xf32>
    %127 = math.tanh %126 : vector<4x32xf32>
    %cst_107 = arith.constant 1.000000e+00 : f32
    %128 = vector.broadcast %cst_107 : f32 to vector<4x32xf32>
    %129 = arith.subf %128, %121 : vector<4x32xf32>
    %130 = arith.mulf %129, %127 : vector<4x32xf32>
    %131 = arith.mulf %121, %93 : vector<4x32xf32>
    %132 = arith.addf %130, %131 : vector<4x32xf32>
    %c0_108 = arith.constant 0 : index
    %133 = arith.index_cast %94 : i32 to index
    %c0_109 = arith.constant 0 : index
    %c0_110 = arith.constant 0 : index
    %134 = vector.load %arg9[%c0_108, %133, %c0_109, %c0_110] : memref<1x16x4x32xf32, #tpu.memory_space<vmem>>, vector<1x1x4x32xf32>
    %135 = vector.shape_cast %134 : vector<1x1x4x32xf32> to vector<4x32xf32>
    %136 = vector.shape_cast %132 : vector<4x32xf32> to vector<1x1x4x32xf32>
    tpu.vector_store %arg9[%c0_108, %133, %c0_109, %c0_110], %136 {strides = array<i32>} : memref<1x16x4x32xf32, #tpu.memory_space<vmem>>, vector<1x1x4x32xf32>,
    %c14_i32 = arith.constant 14 : i32
    %c1_i32_111 = arith.constant 1 : i32
    %137 = arith.select %92, %c14_i32, %c1_i32_111 : i32
    %cst_112 = arith.constant dense<0.000000e+00> : vector<4x32xf32>
    %138 = tpu.matmul %132, %81, %cst_112 {dimension_numbers = #tpu.dot_dimension_numbers<[1], [0], [0], [1], [0, 0, 1, 1], [], []>} : vector<4x32xf32>, vector<32x32xf32>, vector<4x32xf32> -> vector<4x32xf32>
    %139 = vector.broadcast %87 : vector<1x32xf32> to vector<4x32xf32>
    %140 = arith.addf %138, %139 : vector<4x32xf32>
    %cst_113 = arith.constant dense<0.000000e+00> : vector<4x32xf32>
    %141 = tpu.matmul %132, %83, %cst_113 {dimension_numbers = #tpu.dot_dimension_numbers<[1], [0], [0], [1], [0, 0, 1, 1], [], []>} : vector<4x32xf32>, vector<32x32xf32>, vector<4x32xf32> -> vector<4x32xf32>
    %142 = vector.broadcast %89 : vector<1x32xf32> to vector<4x32xf32>
    %143 = arith.addf %141, %142 : vector<4x32xf32>
    %cst_114 = arith.constant dense<0.000000e+00> : vector<4x32xf32>
    %144 = tpu.matmul %132, %85, %cst_114 {dimension_numbers = #tpu.dot_dimension_numbers<[1], [0], [0], [1], [0, 0, 1, 1], [], []>} : vector<4x32xf32>, vector<32x32xf32>, vector<4x32xf32> -> vector<4x32xf32>
    %145 = vector.broadcast %91 : vector<1x32xf32> to vector<4x32xf32>
    %146 = arith.addf %144, %145 : vector<4x32xf32>
    %c0_115 = arith.constant 0 : index
    %147 = arith.index_cast %137 : i32 to index
    %c0_116 = arith.constant 0 : index
    %c0_117 = arith.constant 0 : index
    %148 = vector.load %arg10[%c0_115, %147, %c0_116, %c0_117] : memref<3x16x4x32xf32, #tpu.memory_space<vmem>>, vector<1x1x4x32xf32>
    %149 = vector.shape_cast %148 : vector<1x1x4x32xf32> to vector<4x32xf32>
    %150 = arith.addf %149, %140 : vector<4x32xf32>
    %151 = arith.negf %150 : vector<4x32xf32>
    %152 = math.exp %151 : vector<4x32xf32>
    %cst_118 = arith.constant 1.000000e+00 : f32
    %153 = vector.broadcast %cst_118 : f32 to vector<4x32xf32>
    %154 = arith.addf %153, %152 : vector<4x32xf32>
    %155 = arith.divf %153, %154 : vector<4x32xf32>
    %c1_119 = arith.constant 1 : index
    %156 = arith.index_cast %137 : i32 to index
    %c0_120 = arith.constant 0 : index
    %c0_121 = arith.constant 0 : index
    %157 = vector.load %arg10[%c1_119, %156, %c0_120, %c0_121] : memref<3x16x4x32xf32, #tpu.memory_space<vmem>>, vector<1x1x4x32xf32>
    %158 = vector.shape_cast %157 : vector<1x1x4x32xf32> to vector<4x32xf32>
    %159 = arith.addf %158, %143 : vector<4x32xf32>
    %160 = arith.negf %159 : vector<4x32xf32>
    %161 = math.exp %160 : vector<4x32xf32>
    %cst_122 = arith.constant 1.000000e+00 : f32
    %162 = vector.broadcast %cst_122 : f32 to vector<4x32xf32>
    %163 = arith.addf %162, %161 : vector<4x32xf32>
    %164 = arith.divf %162, %163 : vector<4x32xf32>
    %c2_123 = arith.constant 2 : index
    %165 = arith.index_cast %137 : i32 to index
    %c0_124 = arith.constant 0 : index
    %c0_125 = arith.constant 0 : index
    %166 = vector.load %arg10[%c2_123, %165, %c0_124, %c0_125] : memref<3x16x4x32xf32, #tpu.memory_space<vmem>>, vector<1x1x4x32xf32>
    %167 = vector.shape_cast %166 : vector<1x1x4x32xf32> to vector<4x32xf32>
    %168 = arith.mulf %155, %146 : vector<4x32xf32>
    %169 = arith.addf %167, %168 : vector<4x32xf32>
    %170 = math.tanh %169 : vector<4x32xf32>
    %cst_126 = arith.constant 1.000000e+00 : f32
    %171 = vector.broadcast %cst_126 : f32 to vector<4x32xf32>
    %172 = arith.subf %171, %164 : vector<4x32xf32>
    %173 = arith.mulf %172, %170 : vector<4x32xf32>
    %174 = arith.mulf %164, %132 : vector<4x32xf32>
    %175 = arith.addf %173, %174 : vector<4x32xf32>
    %c0_127 = arith.constant 0 : index
    %176 = arith.index_cast %137 : i32 to index
    %c0_128 = arith.constant 0 : index
    %c0_129 = arith.constant 0 : index
    %177 = vector.load %arg9[%c0_127, %176, %c0_128, %c0_129] : memref<1x16x4x32xf32, #tpu.memory_space<vmem>>, vector<1x1x4x32xf32>
    %178 = vector.shape_cast %177 : vector<1x1x4x32xf32> to vector<4x32xf32>
    %179 = vector.shape_cast %175 : vector<4x32xf32> to vector<1x1x4x32xf32>
    tpu.vector_store %arg9[%c0_127, %176, %c0_128, %c0_129], %179 {strides = array<i32>} : memref<1x16x4x32xf32, #tpu.memory_space<vmem>>, vector<1x1x4x32xf32>,
    %c13_i32 = arith.constant 13 : i32
    %c2_i32 = arith.constant 2 : i32
    %180 = arith.select %92, %c13_i32, %c2_i32 : i32
    %cst_130 = arith.constant dense<0.000000e+00> : vector<4x32xf32>
    %181 = tpu.matmul %175, %81, %cst_130 {dimension_numbers = #tpu.dot_dimension_numbers<[1], [0], [0], [1], [0, 0, 1, 1], [], []>} : vector<4x32xf32>, vector<32x32xf32>, vector<4x32xf32> -> vector<4x32xf32>
    %182 = vector.broadcast %87 : vector<1x32xf32> to vector<4x32xf32>
    %183 = arith.addf %181, %182 : vector<4x32xf32>
    %cst_131 = arith.constant dense<0.000000e+00> : vector<4x32xf32>
    %184 = tpu.matmul %175, %83, %cst_131 {dimension_numbers = #tpu.dot_dimension_numbers<[1], [0], [0], [1], [0, 0, 1, 1], [], []>} : vector<4x32xf32>, vector<32x32xf32>, vector<4x32xf32> -> vector<4x32xf32>
    %185 = vector.broadcast %89 : vector<1x32xf32> to vector<4x32xf32>
    %186 = arith.addf %184, %185 : vector<4x32xf32>
    %cst_132 = arith.constant dense<0.000000e+00> : vector<4x32xf32>
    %187 = tpu.matmul %175, %85, %cst_132 {dimension_numbers = #tpu.dot_dimension_numbers<[1], [0], [0], [1], [0, 0, 1, 1], [], []>} : vector<4x32xf32>, vector<32x32xf32>, vector<4x32xf32> -> vector<4x32xf32>
    %188 = vector.broadcast %91 : vector<1x32xf32> to vector<4x32xf32>
    %189 = arith.addf %187, %188 : vector<4x32xf32>
    %c0_133 = arith.constant 0 : index
    %190 = arith.index_cast %180 : i32 to index
    %c0_134 = arith.constant 0 : index
    %c0_135 = arith.constant 0 : index
    %191 = vector.load %arg10[%c0_133, %190, %c0_134, %c0_135] : memref<3x16x4x32xf32, #tpu.memory_space<vmem>>, vector<1x1x4x32xf32>
    %192 = vector.shape_cast %191 : vector<1x1x4x32xf32> to vector<4x32xf32>
    %193 = arith.addf %192, %183 : vector<4x32xf32>
    %194 = arith.negf %193 : vector<4x32xf32>
    %195 = math.exp %194 : vector<4x32xf32>
    %cst_136 = arith.constant 1.000000e+00 : f32
    %196 = vector.broadcast %cst_136 : f32 to vector<4x32xf32>
    %197 = arith.addf %196, %195 : vector<4x32xf32>
    %198 = arith.divf %196, %197 : vector<4x32xf32>
    %c1_137 = arith.constant 1 : index
    %199 = arith.index_cast %180 : i32 to index
    %c0_138 = arith.constant 0 : index
    %c0_139 = arith.constant 0 : index
    %200 = vector.load %arg10[%c1_137, %199, %c0_138, %c0_139] : memref<3x16x4x32xf32, #tpu.memory_space<vmem>>, vector<1x1x4x32xf32>
    %201 = vector.shape_cast %200 : vector<1x1x4x32xf32> to vector<4x32xf32>
    %202 = arith.addf %201, %186 : vector<4x32xf32>
    %203 = arith.negf %202 : vector<4x32xf32>
    %204 = math.exp %203 : vector<4x32xf32>
    %cst_140 = arith.constant 1.000000e+00 : f32
    %205 = vector.broadcast %cst_140 : f32 to vector<4x32xf32>
    %206 = arith.addf %205, %204 : vector<4x32xf32>
    %207 = arith.divf %205, %206 : vector<4x32xf32>
    %c2_141 = arith.constant 2 : index
    %208 = arith.index_cast %180 : i32 to index
    %c0_142 = arith.constant 0 : index
    %c0_143 = arith.constant 0 : index
    %209 = vector.load %arg10[%c2_141, %208, %c0_142, %c0_143] : memref<3x16x4x32xf32, #tpu.memory_space<vmem>>, vector<1x1x4x32xf32>
    %210 = vector.shape_cast %209 : vector<1x1x4x32xf32> to vector<4x32xf32>
    %211 = arith.mulf %198, %189 : vector<4x32xf32>
    %212 = arith.addf %210, %211 : vector<4x32xf32>
    %213 = math.tanh %212 : vector<4x32xf32>
    %cst_144 = arith.constant 1.000000e+00 : f32
    %214 = vector.broadcast %cst_144 : f32 to vector<4x32xf32>
    %215 = arith.subf %214, %207 : vector<4x32xf32>
    %216 = arith.mulf %215, %213 : vector<4x32xf32>
    %217 = arith.mulf %207, %175 : vector<4x32xf32>
    %218 = arith.addf %216, %217 : vector<4x32xf32>
    %c0_145 = arith.constant 0 : index
    %219 = arith.index_cast %180 : i32 to index
    %c0_146 = arith.constant 0 : index
    %c0_147 = arith.constant 0 : index
    %220 = vector.load %arg9[%c0_145, %219, %c0_146, %c0_147] : memref<1x16x4x32xf32, #tpu.memory_space<vmem>>, vector<1x1x4x32xf32>
    %221 = vector.shape_cast %220 : vector<1x1x4x32xf32> to vector<4x32xf32>
    %222 = vector.shape_cast %218 : vector<4x32xf32> to vector<1x1x4x32xf32>
    tpu.vector_store %arg9[%c0_145, %219, %c0_146, %c0_147], %222 {strides = array<i32>} : memref<1x16x4x32xf32, #tpu.memory_space<vmem>>, vector<1x1x4x32xf32>,
    %c12_i32 = arith.constant 12 : i32
    %c3_i32 = arith.constant 3 : i32
    %223 = arith.select %92, %c12_i32, %c3_i32 : i32
    %cst_148 = arith.constant dense<0.000000e+00> : vector<4x32xf32>
    %224 = tpu.matmul %218, %81, %cst_148 {dimension_numbers = #tpu.dot_dimension_numbers<[1], [0], [0], [1], [0, 0, 1, 1], [], []>} : vector<4x32xf32>, vector<32x32xf32>, vector<4x32xf32> -> vector<4x32xf32>
    %225 = vector.broadcast %87 : vector<1x32xf32> to vector<4x32xf32>
    %226 = arith.addf %224, %225 : vector<4x32xf32>
    %cst_149 = arith.constant dense<0.000000e+00> : vector<4x32xf32>
    %227 = tpu.matmul %218, %83, %cst_149 {dimension_numbers = #tpu.dot_dimension_numbers<[1], [0], [0], [1], [0, 0, 1, 1], [], []>} : vector<4x32xf32>, vector<32x32xf32>, vector<4x32xf32> -> vector<4x32xf32>
    %228 = vector.broadcast %89 : vector<1x32xf32> to vector<4x32xf32>
    %229 = arith.addf %227, %228 : vector<4x32xf32>
    %cst_150 = arith.constant dense<0.000000e+00> : vector<4x32xf32>
    %230 = tpu.matmul %218, %85, %cst_150 {dimension_numbers = #tpu.dot_dimension_numbers<[1], [0], [0], [1], [0, 0, 1, 1], [], []>} : vector<4x32xf32>, vector<32x32xf32>, vector<4x32xf32> -> vector<4x32xf32>
    %231 = vector.broadcast %91 : vector<1x32xf32> to vector<4x32xf32>
    %232 = arith.addf %230, %231 : vector<4x32xf32>
    %c0_151 = arith.constant 0 : index
    %233 = arith.index_cast %223 : i32 to index
    %c0_152 = arith.constant 0 : index
    %c0_153 = arith.constant 0 : index
    %234 = vector.load %arg10[%c0_151, %233, %c0_152, %c0_153] : memref<3x16x4x32xf32, #tpu.memory_space<vmem>>, vector<1x1x4x32xf32>
    %235 = vector.shape_cast %234 : vector<1x1x4x32xf32> to vector<4x32xf32>
    %236 = arith.addf %235, %226 : vector<4x32xf32>
    %237 = arith.negf %236 : vector<4x32xf32>
    %238 = math.exp %237 : vector<4x32xf32>
    %cst_154 = arith.constant 1.000000e+00 : f32
    %239 = vector.broadcast %cst_154 : f32 to vector<4x32xf32>
    %240 = arith.addf %239, %238 : vector<4x32xf32>
    %241 = arith.divf %239, %240 : vector<4x32xf32>
    %c1_155 = arith.constant 1 : index
    %242 = arith.index_cast %223 : i32 to index
    %c0_156 = arith.constant 0 : index
    %c0_157 = arith.constant 0 : index
    %243 = vector.load %arg10[%c1_155, %242, %c0_156, %c0_157] : memref<3x16x4x32xf32, #tpu.memory_space<vmem>>, vector<1x1x4x32xf32>
    %244 = vector.shape_cast %243 : vector<1x1x4x32xf32> to vector<4x32xf32>
    %245 = arith.addf %244, %229 : vector<4x32xf32>
    %246 = arith.negf %245 : vector<4x32xf32>
    %247 = math.exp %246 : vector<4x32xf32>
    %cst_158 = arith.constant 1.000000e+00 : f32
    %248 = vector.broadcast %cst_158 : f32 to vector<4x32xf32>
    %249 = arith.addf %248, %247 : vector<4x32xf32>
    %250 = arith.divf %248, %249 : vector<4x32xf32>
    %c2_159 = arith.constant 2 : index
    %251 = arith.index_cast %223 : i32 to index
    %c0_160 = arith.constant 0 : index
    %c0_161 = arith.constant 0 : index
    %252 = vector.load %arg10[%c2_159, %251, %c0_160, %c0_161] : memref<3x16x4x32xf32, #tpu.memory_space<vmem>>, vector<1x1x4x32xf32>
    %253 = vector.shape_cast %252 : vector<1x1x4x32xf32> to vector<4x32xf32>
    %254 = arith.mulf %241, %232 : vector<4x32xf32>
    %255 = arith.addf %253, %254 : vector<4x32xf32>
    %256 = math.tanh %255 : vector<4x32xf32>
    %cst_162 = arith.constant 1.000000e+00 : f32
    %257 = vector.broadcast %cst_162 : f32 to vector<4x32xf32>
    %258 = arith.subf %257, %250 : vector<4x32xf32>
    %259 = arith.mulf %258, %256 : vector<4x32xf32>
    %260 = arith.mulf %250, %218 : vector<4x32xf32>
    %261 = arith.addf %259, %260 : vector<4x32xf32>
    %c0_163 = arith.constant 0 : index
    %262 = arith.index_cast %223 : i32 to index
    %c0_164 = arith.constant 0 : index
    %c0_165 = arith.constant 0 : index
    %263 = vector.load %arg9[%c0_163, %262, %c0_164, %c0_165] : memref<1x16x4x32xf32, #tpu.memory_space<vmem>>, vector<1x1x4x32xf32>
    %264 = vector.shape_cast %263 : vector<1x1x4x32xf32> to vector<4x32xf32>
    %265 = vector.shape_cast %261 : vector<4x32xf32> to vector<1x1x4x32xf32>
    tpu.vector_store %arg9[%c0_163, %262, %c0_164, %c0_165], %265 {strides = array<i32>} : memref<1x16x4x32xf32, #tpu.memory_space<vmem>>, vector<1x1x4x32xf32>,
    %c11_i32 = arith.constant 11 : i32
    %c4_i32 = arith.constant 4 : i32
    %266 = arith.select %92, %c11_i32, %c4_i32 : i32
    %cst_166 = arith.constant dense<0.000000e+00> : vector<4x32xf32>
    %267 = tpu.matmul %261, %81, %cst_166 {dimension_numbers = #tpu.dot_dimension_numbers<[1], [0], [0], [1], [0, 0, 1, 1], [], []>} : vector<4x32xf32>, vector<32x32xf32>, vector<4x32xf32> -> vector<4x32xf32>
    %268 = vector.broadcast %87 : vector<1x32xf32> to vector<4x32xf32>
    %269 = arith.addf %267, %268 : vector<4x32xf32>
    %cst_167 = arith.constant dense<0.000000e+00> : vector<4x32xf32>
    %270 = tpu.matmul %261, %83, %cst_167 {dimension_numbers = #tpu.dot_dimension_numbers<[1], [0], [0], [1], [0, 0, 1, 1], [], []>} : vector<4x32xf32>, vector<32x32xf32>, vector<4x32xf32> -> vector<4x32xf32>
    %271 = vector.broadcast %89 : vector<1x32xf32> to vector<4x32xf32>
    %272 = arith.addf %270, %271 : vector<4x32xf32>
    %cst_168 = arith.constant dense<0.000000e+00> : vector<4x32xf32>
    %273 = tpu.matmul %261, %85, %cst_168 {dimension_numbers = #tpu.dot_dimension_numbers<[1], [0], [0], [1], [0, 0, 1, 1], [], []>} : vector<4x32xf32>, vector<32x32xf32>, vector<4x32xf32> -> vector<4x32xf32>
    %274 = vector.broadcast %91 : vector<1x32xf32> to vector<4x32xf32>
    %275 = arith.addf %273, %274 : vector<4x32xf32>
    %c0_169 = arith.constant 0 : index
    %276 = arith.index_cast %266 : i32 to index
    %c0_170 = arith.constant 0 : index
    %c0_171 = arith.constant 0 : index
    %277 = vector.load %arg10[%c0_169, %276, %c0_170, %c0_171] : memref<3x16x4x32xf32, #tpu.memory_space<vmem>>, vector<1x1x4x32xf32>
    %278 = vector.shape_cast %277 : vector<1x1x4x32xf32> to vector<4x32xf32>
    %279 = arith.addf %278, %269 : vector<4x32xf32>
    %280 = arith.negf %279 : vector<4x32xf32>
    %281 = math.exp %280 : vector<4x32xf32>
    %cst_172 = arith.constant 1.000000e+00 : f32
    %282 = vector.broadcast %cst_172 : f32 to vector<4x32xf32>
    %283 = arith.addf %282, %281 : vector<4x32xf32>
    %284 = arith.divf %282, %283 : vector<4x32xf32>
    %c1_173 = arith.constant 1 : index
    %285 = arith.index_cast %266 : i32 to index
    %c0_174 = arith.constant 0 : index
    %c0_175 = arith.constant 0 : index
    %286 = vector.load %arg10[%c1_173, %285, %c0_174, %c0_175] : memref<3x16x4x32xf32, #tpu.memory_space<vmem>>, vector<1x1x4x32xf32>
    %287 = vector.shape_cast %286 : vector<1x1x4x32xf32> to vector<4x32xf32>
    %288 = arith.addf %287, %272 : vector<4x32xf32>
    %289 = arith.negf %288 : vector<4x32xf32>
    %290 = math.exp %289 : vector<4x32xf32>
    %cst_176 = arith.constant 1.000000e+00 : f32
    %291 = vector.broadcast %cst_176 : f32 to vector<4x32xf32>
    %292 = arith.addf %291, %290 : vector<4x32xf32>
    %293 = arith.divf %291, %292 : vector<4x32xf32>
    %c2_177 = arith.constant 2 : index
    %294 = arith.index_cast %266 : i32 to index
    %c0_178 = arith.constant 0 : index
    %c0_179 = arith.constant 0 : index
    %295 = vector.load %arg10[%c2_177, %294, %c0_178, %c0_179] : memref<3x16x4x32xf32, #tpu.memory_space<vmem>>, vector<1x1x4x32xf32>
    %296 = vector.shape_cast %295 : vector<1x1x4x32xf32> to vector<4x32xf32>
    %297 = arith.mulf %284, %275 : vector<4x32xf32>
    %298 = arith.addf %296, %297 : vector<4x32xf32>
    %299 = math.tanh %298 : vector<4x32xf32>
    %cst_180 = arith.constant 1.000000e+00 : f32
    %300 = vector.broadcast %cst_180 : f32 to vector<4x32xf32>
    %301 = arith.subf %300, %293 : vector<4x32xf32>
    %302 = arith.mulf %301, %299 : vector<4x32xf32>
    %303 = arith.mulf %293, %261 : vector<4x32xf32>
    %304 = arith.addf %302, %303 : vector<4x32xf32>
    %c0_181 = arith.constant 0 : index
    %305 = arith.index_cast %266 : i32 to index
    %c0_182 = arith.constant 0 : index
    %c0_183 = arith.constant 0 : index
    %306 = vector.load %arg9[%c0_181, %305, %c0_182, %c0_183] : memref<1x16x4x32xf32, #tpu.memory_space<vmem>>, vector<1x1x4x32xf32>
    %307 = vector.shape_cast %306 : vector<1x1x4x32xf32> to vector<4x32xf32>
    %308 = vector.shape_cast %304 : vector<4x32xf32> to vector<1x1x4x32xf32>
    tpu.vector_store %arg9[%c0_181, %305, %c0_182, %c0_183], %308 {strides = array<i32>} : memref<1x16x4x32xf32, #tpu.memory_space<vmem>>, vector<1x1x4x32xf32>,
    %c10_i32 = arith.constant 10 : i32
    %c5_i32 = arith.constant 5 : i32
    %309 = arith.select %92, %c10_i32, %c5_i32 : i32
    %cst_184 = arith.constant dense<0.000000e+00> : vector<4x32xf32>
    %310 = tpu.matmul %304, %81, %cst_184 {dimension_numbers = #tpu.dot_dimension_numbers<[1], [0], [0], [1], [0, 0, 1, 1], [], []>} : vector<4x32xf32>, vector<32x32xf32>, vector<4x32xf32> -> vector<4x32xf32>
    %311 = vector.broadcast %87 : vector<1x32xf32> to vector<4x32xf32>
    %312 = arith.addf %310, %311 : vector<4x32xf32>
    %cst_185 = arith.constant dense<0.000000e+00> : vector<4x32xf32>
    %313 = tpu.matmul %304, %83, %cst_185 {dimension_numbers = #tpu.dot_dimension_numbers<[1], [0], [0], [1], [0, 0, 1, 1], [], []>} : vector<4x32xf32>, vector<32x32xf32>, vector<4x32xf32> -> vector<4x32xf32>
    %314 = vector.broadcast %89 : vector<1x32xf32> to vector<4x32xf32>
    %315 = arith.addf %313, %314 : vector<4x32xf32>
    %cst_186 = arith.constant dense<0.000000e+00> : vector<4x32xf32>
    %316 = tpu.matmul %304, %85, %cst_186 {dimension_numbers = #tpu.dot_dimension_numbers<[1], [0], [0], [1], [0, 0, 1, 1], [], []>} : vector<4x32xf32>, vector<32x32xf32>, vector<4x32xf32> -> vector<4x32xf32>
    %317 = vector.broadcast %91 : vector<1x32xf32> to vector<4x32xf32>
    %318 = arith.addf %316, %317 : vector<4x32xf32>
    %c0_187 = arith.constant 0 : index
    %319 = arith.index_cast %309 : i32 to index
    %c0_188 = arith.constant 0 : index
    %c0_189 = arith.constant 0 : index
    %320 = vector.load %arg10[%c0_187, %319, %c0_188, %c0_189] : memref<3x16x4x32xf32, #tpu.memory_space<vmem>>, vector<1x1x4x32xf32>
    %321 = vector.shape_cast %320 : vector<1x1x4x32xf32> to vector<4x32xf32>
    %322 = arith.addf %321, %312 : vector<4x32xf32>
    %323 = arith.negf %322 : vector<4x32xf32>
    %324 = math.exp %323 : vector<4x32xf32>
    %cst_190 = arith.constant 1.000000e+00 : f32
    %325 = vector.broadcast %cst_190 : f32 to vector<4x32xf32>
    %326 = arith.addf %325, %324 : vector<4x32xf32>
    %327 = arith.divf %325, %326 : vector<4x32xf32>
    %c1_191 = arith.constant 1 : index
    %328 = arith.index_cast %309 : i32 to index
    %c0_192 = arith.constant 0 : index
    %c0_193 = arith.constant 0 : index
    %329 = vector.load %arg10[%c1_191, %328, %c0_192, %c0_193] : memref<3x16x4x32xf32, #tpu.memory_space<vmem>>, vector<1x1x4x32xf32>
    %330 = vector.shape_cast %329 : vector<1x1x4x32xf32> to vector<4x32xf32>
    %331 = arith.addf %330, %315 : vector<4x32xf32>
    %332 = arith.negf %331 : vector<4x32xf32>
    %333 = math.exp %332 : vector<4x32xf32>
    %cst_194 = arith.constant 1.000000e+00 : f32
    %334 = vector.broadcast %cst_194 : f32 to vector<4x32xf32>
    %335 = arith.addf %334, %333 : vector<4x32xf32>
    %336 = arith.divf %334, %335 : vector<4x32xf32>
    %c2_195 = arith.constant 2 : index
    %337 = arith.index_cast %309 : i32 to index
    %c0_196 = arith.constant 0 : index
    %c0_197 = arith.constant 0 : index
    %338 = vector.load %arg10[%c2_195, %337, %c0_196, %c0_197] : memref<3x16x4x32xf32, #tpu.memory_space<vmem>>, vector<1x1x4x32xf32>
    %339 = vector.shape_cast %338 : vector<1x1x4x32xf32> to vector<4x32xf32>
    %340 = arith.mulf %327, %318 : vector<4x32xf32>
    %341 = arith.addf %339, %340 : vector<4x32xf32>
    %342 = math.tanh %341 : vector<4x32xf32>
    %cst_198 = arith.constant 1.000000e+00 : f32
    %343 = vector.broadcast %cst_198 : f32 to vector<4x32xf32>
    %344 = arith.subf %343, %336 : vector<4x32xf32>
    %345 = arith.mulf %344, %342 : vector<4x32xf32>
    %346 = arith.mulf %336, %304 : vector<4x32xf32>
    %347 = arith.addf %345, %346 : vector<4x32xf32>
    %c0_199 = arith.constant 0 : index
    %348 = arith.index_cast %309 : i32 to index
    %c0_200 = arith.constant 0 : index
    %c0_201 = arith.constant 0 : index
    %349 = vector.load %arg9[%c0_199, %348, %c0_200, %c0_201] : memref<1x16x4x32xf32, #tpu.memory_space<vmem>>, vector<1x1x4x32xf32>
    %350 = vector.shape_cast %349 : vector<1x1x4x32xf32> to vector<4x32xf32>
    %351 = vector.shape_cast %347 : vector<4x32xf32> to vector<1x1x4x32xf32>
    tpu.vector_store %arg9[%c0_199, %348, %c0_200, %c0_201], %351 {strides = array<i32>} : memref<1x16x4x32xf32, #tpu.memory_space<vmem>>, vector<1x1x4x32xf32>,
    %c9_i32 = arith.constant 9 : i32
    %c6_i32 = arith.constant 6 : i32
    %352 = arith.select %92, %c9_i32, %c6_i32 : i32
    %cst_202 = arith.constant dense<0.000000e+00> : vector<4x32xf32>
    %353 = tpu.matmul %347, %81, %cst_202 {dimension_numbers = #tpu.dot_dimension_numbers<[1], [0], [0], [1], [0, 0, 1, 1], [], []>} : vector<4x32xf32>, vector<32x32xf32>, vector<4x32xf32> -> vector<4x32xf32>
    %354 = vector.broadcast %87 : vector<1x32xf32> to vector<4x32xf32>
    %355 = arith.addf %353, %354 : vector<4x32xf32>
    %cst_203 = arith.constant dense<0.000000e+00> : vector<4x32xf32>
    %356 = tpu.matmul %347, %83, %cst_203 {dimension_numbers = #tpu.dot_dimension_numbers<[1], [0], [0], [1], [0, 0, 1, 1], [], []>} : vector<4x32xf32>, vector<32x32xf32>, vector<4x32xf32> -> vector<4x32xf32>
    %357 = vector.broadcast %89 : vector<1x32xf32> to vector<4x32xf32>
    %358 = arith.addf %356, %357 : vector<4x32xf32>
    %cst_204 = arith.constant dense<0.000000e+00> : vector<4x32xf32>
    %359 = tpu.matmul %347, %85, %cst_204 {dimension_numbers = #tpu.dot_dimension_numbers<[1], [0], [0], [1], [0, 0, 1, 1], [], []>} : vector<4x32xf32>, vector<32x32xf32>, vector<4x32xf32> -> vector<4x32xf32>
    %360 = vector.broadcast %91 : vector<1x32xf32> to vector<4x32xf32>
    %361 = arith.addf %359, %360 : vector<4x32xf32>
    %c0_205 = arith.constant 0 : index
    %362 = arith.index_cast %352 : i32 to index
    %c0_206 = arith.constant 0 : index
    %c0_207 = arith.constant 0 : index
    %363 = vector.load %arg10[%c0_205, %362, %c0_206, %c0_207] : memref<3x16x4x32xf32, #tpu.memory_space<vmem>>, vector<1x1x4x32xf32>
    %364 = vector.shape_cast %363 : vector<1x1x4x32xf32> to vector<4x32xf32>
    %365 = arith.addf %364, %355 : vector<4x32xf32>
    %366 = arith.negf %365 : vector<4x32xf32>
    %367 = math.exp %366 : vector<4x32xf32>
    %cst_208 = arith.constant 1.000000e+00 : f32
    %368 = vector.broadcast %cst_208 : f32 to vector<4x32xf32>
    %369 = arith.addf %368, %367 : vector<4x32xf32>
    %370 = arith.divf %368, %369 : vector<4x32xf32>
    %c1_209 = arith.constant 1 : index
    %371 = arith.index_cast %352 : i32 to index
    %c0_210 = arith.constant 0 : index
    %c0_211 = arith.constant 0 : index
    %372 = vector.load %arg10[%c1_209, %371, %c0_210, %c0_211] : memref<3x16x4x32xf32, #tpu.memory_space<vmem>>, vector<1x1x4x32xf32>
    %373 = vector.shape_cast %372 : vector<1x1x4x32xf32> to vector<4x32xf32>
    %374 = arith.addf %373, %358 : vector<4x32xf32>
    %375 = arith.negf %374 : vector<4x32xf32>
    %376 = math.exp %375 : vector<4x32xf32>
    %cst_212 = arith.constant 1.000000e+00 : f32
    %377 = vector.broadcast %cst_212 : f32 to vector<4x32xf32>
    %378 = arith.addf %377, %376 : vector<4x32xf32>
    %379 = arith.divf %377, %378 : vector<4x32xf32>
    %c2_213 = arith.constant 2 : index
    %380 = arith.index_cast %352 : i32 to index
    %c0_214 = arith.constant 0 : index
    %c0_215 = arith.constant 0 : index
    %381 = vector.load %arg10[%c2_213, %380, %c0_214, %c0_215] : memref<3x16x4x32xf32, #tpu.memory_space<vmem>>, vector<1x1x4x32xf32>
    %382 = vector.shape_cast %381 : vector<1x1x4x32xf32> to vector<4x32xf32>
    %383 = arith.mulf %370, %361 : vector<4x32xf32>
    %384 = arith.addf %382, %383 : vector<4x32xf32>
    %385 = math.tanh %384 : vector<4x32xf32>
    %cst_216 = arith.constant 1.000000e+00 : f32
    %386 = vector.broadcast %cst_216 : f32 to vector<4x32xf32>
    %387 = arith.subf %386, %379 : vector<4x32xf32>
    %388 = arith.mulf %387, %385 : vector<4x32xf32>
    %389 = arith.mulf %379, %347 : vector<4x32xf32>
    %390 = arith.addf %388, %389 : vector<4x32xf32>
    %c0_217 = arith.constant 0 : index
    %391 = arith.index_cast %352 : i32 to index
    %c0_218 = arith.constant 0 : index
    %c0_219 = arith.constant 0 : index
    %392 = vector.load %arg9[%c0_217, %391, %c0_218, %c0_219] : memref<1x16x4x32xf32, #tpu.memory_space<vmem>>, vector<1x1x4x32xf32>
    %393 = vector.shape_cast %392 : vector<1x1x4x32xf32> to vector<4x32xf32>
    %394 = vector.shape_cast %390 : vector<4x32xf32> to vector<1x1x4x32xf32>
    tpu.vector_store %arg9[%c0_217, %391, %c0_218, %c0_219], %394 {strides = array<i32>} : memref<1x16x4x32xf32, #tpu.memory_space<vmem>>, vector<1x1x4x32xf32>,
    %c8_i32 = arith.constant 8 : i32
    %c7_i32 = arith.constant 7 : i32
    %395 = arith.select %92, %c8_i32, %c7_i32 : i32
    %cst_220 = arith.constant dense<0.000000e+00> : vector<4x32xf32>
    %396 = tpu.matmul %390, %81, %cst_220 {dimension_numbers = #tpu.dot_dimension_numbers<[1], [0], [0], [1], [0, 0, 1, 1], [], []>} : vector<4x32xf32>, vector<32x32xf32>, vector<4x32xf32> -> vector<4x32xf32>
    %397 = vector.broadcast %87 : vector<1x32xf32> to vector<4x32xf32>
    %398 = arith.addf %396, %397 : vector<4x32xf32>
    %cst_221 = arith.constant dense<0.000000e+00> : vector<4x32xf32>
    %399 = tpu.matmul %390, %83, %cst_221 {dimension_numbers = #tpu.dot_dimension_numbers<[1], [0], [0], [1], [0, 0, 1, 1], [], []>} : vector<4x32xf32>, vector<32x32xf32>, vector<4x32xf32> -> vector<4x32xf32>
    %400 = vector.broadcast %89 : vector<1x32xf32> to vector<4x32xf32>
    %401 = arith.addf %399, %400 : vector<4x32xf32>
    %cst_222 = arith.constant dense<0.000000e+00> : vector<4x32xf32>
    %402 = tpu.matmul %390, %85, %cst_222 {dimension_numbers = #tpu.dot_dimension_numbers<[1], [0], [0], [1], [0, 0, 1, 1], [], []>} : vector<4x32xf32>, vector<32x32xf32>, vector<4x32xf32> -> vector<4x32xf32>
    %403 = vector.broadcast %91 : vector<1x32xf32> to vector<4x32xf32>
    %404 = arith.addf %402, %403 : vector<4x32xf32>
    %c0_223 = arith.constant 0 : index
    %405 = arith.index_cast %395 : i32 to index
    %c0_224 = arith.constant 0 : index
    %c0_225 = arith.constant 0 : index
    %406 = vector.load %arg10[%c0_223, %405, %c0_224, %c0_225] : memref<3x16x4x32xf32, #tpu.memory_space<vmem>>, vector<1x1x4x32xf32>
    %407 = vector.shape_cast %406 : vector<1x1x4x32xf32> to vector<4x32xf32>
    %408 = arith.addf %407, %398 : vector<4x32xf32>
    %409 = arith.negf %408 : vector<4x32xf32>
    %410 = math.exp %409 : vector<4x32xf32>
    %cst_226 = arith.constant 1.000000e+00 : f32
    %411 = vector.broadcast %cst_226 : f32 to vector<4x32xf32>
    %412 = arith.addf %411, %410 : vector<4x32xf32>
    %413 = arith.divf %411, %412 : vector<4x32xf32>
    %c1_227 = arith.constant 1 : index
    %414 = arith.index_cast %395 : i32 to index
    %c0_228 = arith.constant 0 : index
    %c0_229 = arith.constant 0 : index
    %415 = vector.load %arg10[%c1_227, %414, %c0_228, %c0_229] : memref<3x16x4x32xf32, #tpu.memory_space<vmem>>, vector<1x1x4x32xf32>
    %416 = vector.shape_cast %415 : vector<1x1x4x32xf32> to vector<4x32xf32>
    %417 = arith.addf %416, %401 : vector<4x32xf32>
    %418 = arith.negf %417 : vector<4x32xf32>
    %419 = math.exp %418 : vector<4x32xf32>
    %cst_230 = arith.constant 1.000000e+00 : f32
    %420 = vector.broadcast %cst_230 : f32 to vector<4x32xf32>
    %421 = arith.addf %420, %419 : vector<4x32xf32>
    %422 = arith.divf %420, %421 : vector<4x32xf32>
    %c2_231 = arith.constant 2 : index
    %423 = arith.index_cast %395 : i32 to index
    %c0_232 = arith.constant 0 : index
    %c0_233 = arith.constant 0 : index
    %424 = vector.load %arg10[%c2_231, %423, %c0_232, %c0_233] : memref<3x16x4x32xf32, #tpu.memory_space<vmem>>, vector<1x1x4x32xf32>
    %425 = vector.shape_cast %424 : vector<1x1x4x32xf32> to vector<4x32xf32>
    %426 = arith.mulf %413, %404 : vector<4x32xf32>
    %427 = arith.addf %425, %426 : vector<4x32xf32>
    %428 = math.tanh %427 : vector<4x32xf32>
    %cst_234 = arith.constant 1.000000e+00 : f32
    %429 = vector.broadcast %cst_234 : f32 to vector<4x32xf32>
    %430 = arith.subf %429, %422 : vector<4x32xf32>
    %431 = arith.mulf %430, %428 : vector<4x32xf32>
    %432 = arith.mulf %422, %390 : vector<4x32xf32>
    %433 = arith.addf %431, %432 : vector<4x32xf32>
    %c0_235 = arith.constant 0 : index
    %434 = arith.index_cast %395 : i32 to index
    %c0_236 = arith.constant 0 : index
    %c0_237 = arith.constant 0 : index
    %435 = vector.load %arg9[%c0_235, %434, %c0_236, %c0_237] : memref<1x16x4x32xf32, #tpu.memory_space<vmem>>, vector<1x1x4x32xf32>
    %436 = vector.shape_cast %435 : vector<1x1x4x32xf32> to vector<4x32xf32>
    %437 = vector.shape_cast %433 : vector<4x32xf32> to vector<1x1x4x32xf32>
    tpu.vector_store %arg9[%c0_235, %434, %c0_236, %c0_237], %437 {strides = array<i32>} : memref<1x16x4x32xf32, #tpu.memory_space<vmem>>, vector<1x1x4x32xf32>,
    %c7_i32_238 = arith.constant 7 : i32
    %c8_i32_239 = arith.constant 8 : i32
    %438 = arith.select %92, %c7_i32_238, %c8_i32_239 : i32
    %cst_240 = arith.constant dense<0.000000e+00> : vector<4x32xf32>
    %439 = tpu.matmul %433, %81, %cst_240 {dimension_numbers = #tpu.dot_dimension_numbers<[1], [0], [0], [1], [0, 0, 1, 1], [], []>} : vector<4x32xf32>, vector<32x32xf32>, vector<4x32xf32> -> vector<4x32xf32>
    %440 = vector.broadcast %87 : vector<1x32xf32> to vector<4x32xf32>
    %441 = arith.addf %439, %440 : vector<4x32xf32>
    %cst_241 = arith.constant dense<0.000000e+00> : vector<4x32xf32>
    %442 = tpu.matmul %433, %83, %cst_241 {dimension_numbers = #tpu.dot_dimension_numbers<[1], [0], [0], [1], [0, 0, 1, 1], [], []>} : vector<4x32xf32>, vector<32x32xf32>, vector<4x32xf32> -> vector<4x32xf32>
    %443 = vector.broadcast %89 : vector<1x32xf32> to vector<4x32xf32>
    %444 = arith.addf %442, %443 : vector<4x32xf32>
    %cst_242 = arith.constant dense<0.000000e+00> : vector<4x32xf32>
    %445 = tpu.matmul %433, %85, %cst_242 {dimension_numbers = #tpu.dot_dimension_numbers<[1], [0], [0], [1], [0, 0, 1, 1], [], []>} : vector<4x32xf32>, vector<32x32xf32>, vector<4x32xf32> -> vector<4x32xf32>
    %446 = vector.broadcast %91 : vector<1x32xf32> to vector<4x32xf32>
    %447 = arith.addf %445, %446 : vector<4x32xf32>
    %c0_243 = arith.constant 0 : index
    %448 = arith.index_cast %438 : i32 to index
    %c0_244 = arith.constant 0 : index
    %c0_245 = arith.constant 0 : index
    %449 = vector.load %arg10[%c0_243, %448, %c0_244, %c0_245] : memref<3x16x4x32xf32, #tpu.memory_space<vmem>>, vector<1x1x4x32xf32>
    %450 = vector.shape_cast %449 : vector<1x1x4x32xf32> to vector<4x32xf32>
    %451 = arith.addf %450, %441 : vector<4x32xf32>
    %452 = arith.negf %451 : vector<4x32xf32>
    %453 = math.exp %452 : vector<4x32xf32>
    %cst_246 = arith.constant 1.000000e+00 : f32
    %454 = vector.broadcast %cst_246 : f32 to vector<4x32xf32>
    %455 = arith.addf %454, %453 : vector<4x32xf32>
    %456 = arith.divf %454, %455 : vector<4x32xf32>
    %c1_247 = arith.constant 1 : index
    %457 = arith.index_cast %438 : i32 to index
    %c0_248 = arith.constant 0 : index
    %c0_249 = arith.constant 0 : index
    %458 = vector.load %arg10[%c1_247, %457, %c0_248, %c0_249] : memref<3x16x4x32xf32, #tpu.memory_space<vmem>>, vector<1x1x4x32xf32>
    %459 = vector.shape_cast %458 : vector<1x1x4x32xf32> to vector<4x32xf32>
    %460 = arith.addf %459, %444 : vector<4x32xf32>
    %461 = arith.negf %460 : vector<4x32xf32>
    %462 = math.exp %461 : vector<4x32xf32>
    %cst_250 = arith.constant 1.000000e+00 : f32
    %463 = vector.broadcast %cst_250 : f32 to vector<4x32xf32>
    %464 = arith.addf %463, %462 : vector<4x32xf32>
    %465 = arith.divf %463, %464 : vector<4x32xf32>
    %c2_251 = arith.constant 2 : index
    %466 = arith.index_cast %438 : i32 to index
    %c0_252 = arith.constant 0 : index
    %c0_253 = arith.constant 0 : index
    %467 = vector.load %arg10[%c2_251, %466, %c0_252, %c0_253] : memref<3x16x4x32xf32, #tpu.memory_space<vmem>>, vector<1x1x4x32xf32>
    %468 = vector.shape_cast %467 : vector<1x1x4x32xf32> to vector<4x32xf32>
    %469 = arith.mulf %456, %447 : vector<4x32xf32>
    %470 = arith.addf %468, %469 : vector<4x32xf32>
    %471 = math.tanh %470 : vector<4x32xf32>
    %cst_254 = arith.constant 1.000000e+00 : f32
    %472 = vector.broadcast %cst_254 : f32 to vector<4x32xf32>
    %473 = arith.subf %472, %465 : vector<4x32xf32>
    %474 = arith.mulf %473, %471 : vector<4x32xf32>
    %475 = arith.mulf %465, %433 : vector<4x32xf32>
    %476 = arith.addf %474, %475 : vector<4x32xf32>
    %c0_255 = arith.constant 0 : index
    %477 = arith.index_cast %438 : i32 to index
    %c0_256 = arith.constant 0 : index
    %c0_257 = arith.constant 0 : index
    %478 = vector.load %arg9[%c0_255, %477, %c0_256, %c0_257] : memref<1x16x4x32xf32, #tpu.memory_space<vmem>>, vector<1x1x4x32xf32>
    %479 = vector.shape_cast %478 : vector<1x1x4x32xf32> to vector<4x32xf32>
    %480 = vector.shape_cast %476 : vector<4x32xf32> to vector<1x1x4x32xf32>
    tpu.vector_store %arg9[%c0_255, %477, %c0_256, %c0_257], %480 {strides = array<i32>} : memref<1x16x4x32xf32, #tpu.memory_space<vmem>>, vector<1x1x4x32xf32>,
    %c6_i32_258 = arith.constant 6 : i32
    %c9_i32_259 = arith.constant 9 : i32
    %481 = arith.select %92, %c6_i32_258, %c9_i32_259 : i32
    %cst_260 = arith.constant dense<0.000000e+00> : vector<4x32xf32>
    %482 = tpu.matmul %476, %81, %cst_260 {dimension_numbers = #tpu.dot_dimension_numbers<[1], [0], [0], [1], [0, 0, 1, 1], [], []>} : vector<4x32xf32>, vector<32x32xf32>, vector<4x32xf32> -> vector<4x32xf32>
    %483 = vector.broadcast %87 : vector<1x32xf32> to vector<4x32xf32>
    %484 = arith.addf %482, %483 : vector<4x32xf32>
    %cst_261 = arith.constant dense<0.000000e+00> : vector<4x32xf32>
    %485 = tpu.matmul %476, %83, %cst_261 {dimension_numbers = #tpu.dot_dimension_numbers<[1], [0], [0], [1], [0, 0, 1, 1], [], []>} : vector<4x32xf32>, vector<32x32xf32>, vector<4x32xf32> -> vector<4x32xf32>
    %486 = vector.broadcast %89 : vector<1x32xf32> to vector<4x32xf32>
    %487 = arith.addf %485, %486 : vector<4x32xf32>
    %cst_262 = arith.constant dense<0.000000e+00> : vector<4x32xf32>
    %488 = tpu.matmul %476, %85, %cst_262 {dimension_numbers = #tpu.dot_dimension_numbers<[1], [0], [0], [1], [0, 0, 1, 1], [], []>} : vector<4x32xf32>, vector<32x32xf32>, vector<4x32xf32> -> vector<4x32xf32>
    %489 = vector.broadcast %91 : vector<1x32xf32> to vector<4x32xf32>
    %490 = arith.addf %488, %489 : vector<4x32xf32>
    %c0_263 = arith.constant 0 : index
    %491 = arith.index_cast %481 : i32 to index
    %c0_264 = arith.constant 0 : index
    %c0_265 = arith.constant 0 : index
    %492 = vector.load %arg10[%c0_263, %491, %c0_264, %c0_265] : memref<3x16x4x32xf32, #tpu.memory_space<vmem>>, vector<1x1x4x32xf32>
    %493 = vector.shape_cast %492 : vector<1x1x4x32xf32> to vector<4x32xf32>
    %494 = arith.addf %493, %484 : vector<4x32xf32>
    %495 = arith.negf %494 : vector<4x32xf32>
    %496 = math.exp %495 : vector<4x32xf32>
    %cst_266 = arith.constant 1.000000e+00 : f32
    %497 = vector.broadcast %cst_266 : f32 to vector<4x32xf32>
    %498 = arith.addf %497, %496 : vector<4x32xf32>
    %499 = arith.divf %497, %498 : vector<4x32xf32>
    %c1_267 = arith.constant 1 : index
    %500 = arith.index_cast %481 : i32 to index
    %c0_268 = arith.constant 0 : index
    %c0_269 = arith.constant 0 : index
    %501 = vector.load %arg10[%c1_267, %500, %c0_268, %c0_269] : memref<3x16x4x32xf32, #tpu.memory_space<vmem>>, vector<1x1x4x32xf32>
    %502 = vector.shape_cast %501 : vector<1x1x4x32xf32> to vector<4x32xf32>
    %503 = arith.addf %502, %487 : vector<4x32xf32>
    %504 = arith.negf %503 : vector<4x32xf32>
    %505 = math.exp %504 : vector<4x32xf32>
    %cst_270 = arith.constant 1.000000e+00 : f32
    %506 = vector.broadcast %cst_270 : f32 to vector<4x32xf32>
    %507 = arith.addf %506, %505 : vector<4x32xf32>
    %508 = arith.divf %506, %507 : vector<4x32xf32>
    %c2_271 = arith.constant 2 : index
    %509 = arith.index_cast %481 : i32 to index
    %c0_272 = arith.constant 0 : index
    %c0_273 = arith.constant 0 : index
    %510 = vector.load %arg10[%c2_271, %509, %c0_272, %c0_273] : memref<3x16x4x32xf32, #tpu.memory_space<vmem>>, vector<1x1x4x32xf32>
    %511 = vector.shape_cast %510 : vector<1x1x4x32xf32> to vector<4x32xf32>
    %512 = arith.mulf %499, %490 : vector<4x32xf32>
    %513 = arith.addf %511, %512 : vector<4x32xf32>
    %514 = math.tanh %513 : vector<4x32xf32>
    %cst_274 = arith.constant 1.000000e+00 : f32
    %515 = vector.broadcast %cst_274 : f32 to vector<4x32xf32>
    %516 = arith.subf %515, %508 : vector<4x32xf32>
    %517 = arith.mulf %516, %514 : vector<4x32xf32>
    %518 = arith.mulf %508, %476 : vector<4x32xf32>
    %519 = arith.addf %517, %518 : vector<4x32xf32>
    %c0_275 = arith.constant 0 : index
    %520 = arith.index_cast %481 : i32 to index
    %c0_276 = arith.constant 0 : index
    %c0_277 = arith.constant 0 : index
    %521 = vector.load %arg9[%c0_275, %520, %c0_276, %c0_277] : memref<1x16x4x32xf32, #tpu.memory_space<vmem>>, vector<1x1x4x32xf32>
    %522 = vector.shape_cast %521 : vector<1x1x4x32xf32> to vector<4x32xf32>
    %523 = vector.shape_cast %519 : vector<4x32xf32> to vector<1x1x4x32xf32>
    tpu.vector_store %arg9[%c0_275, %520, %c0_276, %c0_277], %523 {strides = array<i32>} : memref<1x16x4x32xf32, #tpu.memory_space<vmem>>, vector<1x1x4x32xf32>,
    %c5_i32_278 = arith.constant 5 : i32
    %c10_i32_279 = arith.constant 10 : i32
    %524 = arith.select %92, %c5_i32_278, %c10_i32_279 : i32
    %cst_280 = arith.constant dense<0.000000e+00> : vector<4x32xf32>
    %525 = tpu.matmul %519, %81, %cst_280 {dimension_numbers = #tpu.dot_dimension_numbers<[1], [0], [0], [1], [0, 0, 1, 1], [], []>} : vector<4x32xf32>, vector<32x32xf32>, vector<4x32xf32> -> vector<4x32xf32>
    %526 = vector.broadcast %87 : vector<1x32xf32> to vector<4x32xf32>
    %527 = arith.addf %525, %526 : vector<4x32xf32>
    %cst_281 = arith.constant dense<0.000000e+00> : vector<4x32xf32>
    %528 = tpu.matmul %519, %83, %cst_281 {dimension_numbers = #tpu.dot_dimension_numbers<[1], [0], [0], [1], [0, 0, 1, 1], [], []>} : vector<4x32xf32>, vector<32x32xf32>, vector<4x32xf32> -> vector<4x32xf32>
    %529 = vector.broadcast %89 : vector<1x32xf32> to vector<4x32xf32>
    %530 = arith.addf %528, %529 : vector<4x32xf32>
    %cst_282 = arith.constant dense<0.000000e+00> : vector<4x32xf32>
    %531 = tpu.matmul %519, %85, %cst_282 {dimension_numbers = #tpu.dot_dimension_numbers<[1], [0], [0], [1], [0, 0, 1, 1], [], []>} : vector<4x32xf32>, vector<32x32xf32>, vector<4x32xf32> -> vector<4x32xf32>
    %532 = vector.broadcast %91 : vector<1x32xf32> to vector<4x32xf32>
    %533 = arith.addf %531, %532 : vector<4x32xf32>
    %c0_283 = arith.constant 0 : index
    %534 = arith.index_cast %524 : i32 to index
    %c0_284 = arith.constant 0 : index
    %c0_285 = arith.constant 0 : index
    %535 = vector.load %arg10[%c0_283, %534, %c0_284, %c0_285] : memref<3x16x4x32xf32, #tpu.memory_space<vmem>>, vector<1x1x4x32xf32>
    %536 = vector.shape_cast %535 : vector<1x1x4x32xf32> to vector<4x32xf32>
    %537 = arith.addf %536, %527 : vector<4x32xf32>
    %538 = arith.negf %537 : vector<4x32xf32>
    %539 = math.exp %538 : vector<4x32xf32>
    %cst_286 = arith.constant 1.000000e+00 : f32
    %540 = vector.broadcast %cst_286 : f32 to vector<4x32xf32>
    %541 = arith.addf %540, %539 : vector<4x32xf32>
    %542 = arith.divf %540, %541 : vector<4x32xf32>
    %c1_287 = arith.constant 1 : index
    %543 = arith.index_cast %524 : i32 to index
    %c0_288 = arith.constant 0 : index
    %c0_289 = arith.constant 0 : index
    %544 = vector.load %arg10[%c1_287, %543, %c0_288, %c0_289] : memref<3x16x4x32xf32, #tpu.memory_space<vmem>>, vector<1x1x4x32xf32>
    %545 = vector.shape_cast %544 : vector<1x1x4x32xf32> to vector<4x32xf32>
    %546 = arith.addf %545, %530 : vector<4x32xf32>
    %547 = arith.negf %546 : vector<4x32xf32>
    %548 = math.exp %547 : vector<4x32xf32>
    %cst_290 = arith.constant 1.000000e+00 : f32
    %549 = vector.broadcast %cst_290 : f32 to vector<4x32xf32>
    %550 = arith.addf %549, %548 : vector<4x32xf32>
    %551 = arith.divf %549, %550 : vector<4x32xf32>
    %c2_291 = arith.constant 2 : index
    %552 = arith.index_cast %524 : i32 to index
    %c0_292 = arith.constant 0 : index
    %c0_293 = arith.constant 0 : index
    %553 = vector.load %arg10[%c2_291, %552, %c0_292, %c0_293] : memref<3x16x4x32xf32, #tpu.memory_space<vmem>>, vector<1x1x4x32xf32>
    %554 = vector.shape_cast %553 : vector<1x1x4x32xf32> to vector<4x32xf32>
    %555 = arith.mulf %542, %533 : vector<4x32xf32>
    %556 = arith.addf %554, %555 : vector<4x32xf32>
    %557 = math.tanh %556 : vector<4x32xf32>
    %cst_294 = arith.constant 1.000000e+00 : f32
    %558 = vector.broadcast %cst_294 : f32 to vector<4x32xf32>
    %559 = arith.subf %558, %551 : vector<4x32xf32>
    %560 = arith.mulf %559, %557 : vector<4x32xf32>
    %561 = arith.mulf %551, %519 : vector<4x32xf32>
    %562 = arith.addf %560, %561 : vector<4x32xf32>
    %c0_295 = arith.constant 0 : index
    %563 = arith.index_cast %524 : i32 to index
    %c0_296 = arith.constant 0 : index
    %c0_297 = arith.constant 0 : index
    %564 = vector.load %arg9[%c0_295, %563, %c0_296, %c0_297] : memref<1x16x4x32xf32, #tpu.memory_space<vmem>>, vector<1x1x4x32xf32>
    %565 = vector.shape_cast %564 : vector<1x1x4x32xf32> to vector<4x32xf32>
    %566 = vector.shape_cast %562 : vector<4x32xf32> to vector<1x1x4x32xf32>
    tpu.vector_store %arg9[%c0_295, %563, %c0_296, %c0_297], %566 {strides = array<i32>} : memref<1x16x4x32xf32, #tpu.memory_space<vmem>>, vector<1x1x4x32xf32>,
    %c4_i32_298 = arith.constant 4 : i32
    %c11_i32_299 = arith.constant 11 : i32
    %567 = arith.select %92, %c4_i32_298, %c11_i32_299 : i32
    %cst_300 = arith.constant dense<0.000000e+00> : vector<4x32xf32>
    %568 = tpu.matmul %562, %81, %cst_300 {dimension_numbers = #tpu.dot_dimension_numbers<[1], [0], [0], [1], [0, 0, 1, 1], [], []>} : vector<4x32xf32>, vector<32x32xf32>, vector<4x32xf32> -> vector<4x32xf32>
    %569 = vector.broadcast %87 : vector<1x32xf32> to vector<4x32xf32>
    %570 = arith.addf %568, %569 : vector<4x32xf32>
    %cst_301 = arith.constant dense<0.000000e+00> : vector<4x32xf32>
    %571 = tpu.matmul %562, %83, %cst_301 {dimension_numbers = #tpu.dot_dimension_numbers<[1], [0], [0], [1], [0, 0, 1, 1], [], []>} : vector<4x32xf32>, vector<32x32xf32>, vector<4x32xf32> -> vector<4x32xf32>
    %572 = vector.broadcast %89 : vector<1x32xf32> to vector<4x32xf32>
    %573 = arith.addf %571, %572 : vector<4x32xf32>
    %cst_302 = arith.constant dense<0.000000e+00> : vector<4x32xf32>
    %574 = tpu.matmul %562, %85, %cst_302 {dimension_numbers = #tpu.dot_dimension_numbers<[1], [0], [0], [1], [0, 0, 1, 1], [], []>} : vector<4x32xf32>, vector<32x32xf32>, vector<4x32xf32> -> vector<4x32xf32>
    %575 = vector.broadcast %91 : vector<1x32xf32> to vector<4x32xf32>
    %576 = arith.addf %574, %575 : vector<4x32xf32>
    %c0_303 = arith.constant 0 : index
    %577 = arith.index_cast %567 : i32 to index
    %c0_304 = arith.constant 0 : index
    %c0_305 = arith.constant 0 : index
    %578 = vector.load %arg10[%c0_303, %577, %c0_304, %c0_305] : memref<3x16x4x32xf32, #tpu.memory_space<vmem>>, vector<1x1x4x32xf32>
    %579 = vector.shape_cast %578 : vector<1x1x4x32xf32> to vector<4x32xf32>
    %580 = arith.addf %579, %570 : vector<4x32xf32>
    %581 = arith.negf %580 : vector<4x32xf32>
    %582 = math.exp %581 : vector<4x32xf32>
    %cst_306 = arith.constant 1.000000e+00 : f32
    %583 = vector.broadcast %cst_306 : f32 to vector<4x32xf32>
    %584 = arith.addf %583, %582 : vector<4x32xf32>
    %585 = arith.divf %583, %584 : vector<4x32xf32>
    %c1_307 = arith.constant 1 : index
    %586 = arith.index_cast %567 : i32 to index
    %c0_308 = arith.constant 0 : index
    %c0_309 = arith.constant 0 : index
    %587 = vector.load %arg10[%c1_307, %586, %c0_308, %c0_309] : memref<3x16x4x32xf32, #tpu.memory_space<vmem>>, vector<1x1x4x32xf32>
    %588 = vector.shape_cast %587 : vector<1x1x4x32xf32> to vector<4x32xf32>
    %589 = arith.addf %588, %573 : vector<4x32xf32>
    %590 = arith.negf %589 : vector<4x32xf32>
    %591 = math.exp %590 : vector<4x32xf32>
    %cst_310 = arith.constant 1.000000e+00 : f32
    %592 = vector.broadcast %cst_310 : f32 to vector<4x32xf32>
    %593 = arith.addf %592, %591 : vector<4x32xf32>
    %594 = arith.divf %592, %593 : vector<4x32xf32>
    %c2_311 = arith.constant 2 : index
    %595 = arith.index_cast %567 : i32 to index
    %c0_312 = arith.constant 0 : index
    %c0_313 = arith.constant 0 : index
    %596 = vector.load %arg10[%c2_311, %595, %c0_312, %c0_313] : memref<3x16x4x32xf32, #tpu.memory_space<vmem>>, vector<1x1x4x32xf32>
    %597 = vector.shape_cast %596 : vector<1x1x4x32xf32> to vector<4x32xf32>
    %598 = arith.mulf %585, %576 : vector<4x32xf32>
    %599 = arith.addf %597, %598 : vector<4x32xf32>
    %600 = math.tanh %599 : vector<4x32xf32>
    %cst_314 = arith.constant 1.000000e+00 : f32
    %601 = vector.broadcast %cst_314 : f32 to vector<4x32xf32>
    %602 = arith.subf %601, %594 : vector<4x32xf32>
    %603 = arith.mulf %602, %600 : vector<4x32xf32>
    %604 = arith.mulf %594, %562 : vector<4x32xf32>
    %605 = arith.addf %603, %604 : vector<4x32xf32>
    %c0_315 = arith.constant 0 : index
    %606 = arith.index_cast %567 : i32 to index
    %c0_316 = arith.constant 0 : index
    %c0_317 = arith.constant 0 : index
    %607 = vector.load %arg9[%c0_315, %606, %c0_316, %c0_317] : memref<1x16x4x32xf32, #tpu.memory_space<vmem>>, vector<1x1x4x32xf32>
    %608 = vector.shape_cast %607 : vector<1x1x4x32xf32> to vector<4x32xf32>
    %609 = vector.shape_cast %605 : vector<4x32xf32> to vector<1x1x4x32xf32>
    tpu.vector_store %arg9[%c0_315, %606, %c0_316, %c0_317], %609 {strides = array<i32>} : memref<1x16x4x32xf32, #tpu.memory_space<vmem>>, vector<1x1x4x32xf32>,
    %c3_i32_318 = arith.constant 3 : i32
    %c12_i32_319 = arith.constant 12 : i32
    %610 = arith.select %92, %c3_i32_318, %c12_i32_319 : i32
    %cst_320 = arith.constant dense<0.000000e+00> : vector<4x32xf32>
    %611 = tpu.matmul %605, %81, %cst_320 {dimension_numbers = #tpu.dot_dimension_numbers<[1], [0], [0], [1], [0, 0, 1, 1], [], []>} : vector<4x32xf32>, vector<32x32xf32>, vector<4x32xf32> -> vector<4x32xf32>
    %612 = vector.broadcast %87 : vector<1x32xf32> to vector<4x32xf32>
    %613 = arith.addf %611, %612 : vector<4x32xf32>
    %cst_321 = arith.constant dense<0.000000e+00> : vector<4x32xf32>
    %614 = tpu.matmul %605, %83, %cst_321 {dimension_numbers = #tpu.dot_dimension_numbers<[1], [0], [0], [1], [0, 0, 1, 1], [], []>} : vector<4x32xf32>, vector<32x32xf32>, vector<4x32xf32> -> vector<4x32xf32>
    %615 = vector.broadcast %89 : vector<1x32xf32> to vector<4x32xf32>
    %616 = arith.addf %614, %615 : vector<4x32xf32>
    %cst_322 = arith.constant dense<0.000000e+00> : vector<4x32xf32>
    %617 = tpu.matmul %605, %85, %cst_322 {dimension_numbers = #tpu.dot_dimension_numbers<[1], [0], [0], [1], [0, 0, 1, 1], [], []>} : vector<4x32xf32>, vector<32x32xf32>, vector<4x32xf32> -> vector<4x32xf32>
    %618 = vector.broadcast %91 : vector<1x32xf32> to vector<4x32xf32>
    %619 = arith.addf %617, %618 : vector<4x32xf32>
    %c0_323 = arith.constant 0 : index
    %620 = arith.index_cast %610 : i32 to index
    %c0_324 = arith.constant 0 : index
    %c0_325 = arith.constant 0 : index
    %621 = vector.load %arg10[%c0_323, %620, %c0_324, %c0_325] : memref<3x16x4x32xf32, #tpu.memory_space<vmem>>, vector<1x1x4x32xf32>
    %622 = vector.shape_cast %621 : vector<1x1x4x32xf32> to vector<4x32xf32>
    %623 = arith.addf %622, %613 : vector<4x32xf32>
    %624 = arith.negf %623 : vector<4x32xf32>
    %625 = math.exp %624 : vector<4x32xf32>
    %cst_326 = arith.constant 1.000000e+00 : f32
    %626 = vector.broadcast %cst_326 : f32 to vector<4x32xf32>
    %627 = arith.addf %626, %625 : vector<4x32xf32>
    %628 = arith.divf %626, %627 : vector<4x32xf32>
    %c1_327 = arith.constant 1 : index
    %629 = arith.index_cast %610 : i32 to index
    %c0_328 = arith.constant 0 : index
    %c0_329 = arith.constant 0 : index
    %630 = vector.load %arg10[%c1_327, %629, %c0_328, %c0_329] : memref<3x16x4x32xf32, #tpu.memory_space<vmem>>, vector<1x1x4x32xf32>
    %631 = vector.shape_cast %630 : vector<1x1x4x32xf32> to vector<4x32xf32>
    %632 = arith.addf %631, %616 : vector<4x32xf32>
    %633 = arith.negf %632 : vector<4x32xf32>
    %634 = math.exp %633 : vector<4x32xf32>
    %cst_330 = arith.constant 1.000000e+00 : f32
    %635 = vector.broadcast %cst_330 : f32 to vector<4x32xf32>
    %636 = arith.addf %635, %634 : vector<4x32xf32>
    %637 = arith.divf %635, %636 : vector<4x32xf32>
    %c2_331 = arith.constant 2 : index
    %638 = arith.index_cast %610 : i32 to index
    %c0_332 = arith.constant 0 : index
    %c0_333 = arith.constant 0 : index
    %639 = vector.load %arg10[%c2_331, %638, %c0_332, %c0_333] : memref<3x16x4x32xf32, #tpu.memory_space<vmem>>, vector<1x1x4x32xf32>
    %640 = vector.shape_cast %639 : vector<1x1x4x32xf32> to vector<4x32xf32>
    %641 = arith.mulf %628, %619 : vector<4x32xf32>
    %642 = arith.addf %640, %641 : vector<4x32xf32>
    %643 = math.tanh %642 : vector<4x32xf32>
    %cst_334 = arith.constant 1.000000e+00 : f32
    %644 = vector.broadcast %cst_334 : f32 to vector<4x32xf32>
    %645 = arith.subf %644, %637 : vector<4x32xf32>
    %646 = arith.mulf %645, %643 : vector<4x32xf32>
    %647 = arith.mulf %637, %605 : vector<4x32xf32>
    %648 = arith.addf %646, %647 : vector<4x32xf32>
    %c0_335 = arith.constant 0 : index
    %649 = arith.index_cast %610 : i32 to index
    %c0_336 = arith.constant 0 : index
    %c0_337 = arith.constant 0 : index
    %650 = vector.load %arg9[%c0_335, %649, %c0_336, %c0_337] : memref<1x16x4x32xf32, #tpu.memory_space<vmem>>, vector<1x1x4x32xf32>
    %651 = vector.shape_cast %650 : vector<1x1x4x32xf32> to vector<4x32xf32>
    %652 = vector.shape_cast %648 : vector<4x32xf32> to vector<1x1x4x32xf32>
    tpu.vector_store %arg9[%c0_335, %649, %c0_336, %c0_337], %652 {strides = array<i32>} : memref<1x16x4x32xf32, #tpu.memory_space<vmem>>, vector<1x1x4x32xf32>,
    %c2_i32_338 = arith.constant 2 : i32
    %c13_i32_339 = arith.constant 13 : i32
    %653 = arith.select %92, %c2_i32_338, %c13_i32_339 : i32
    %cst_340 = arith.constant dense<0.000000e+00> : vector<4x32xf32>
    %654 = tpu.matmul %648, %81, %cst_340 {dimension_numbers = #tpu.dot_dimension_numbers<[1], [0], [0], [1], [0, 0, 1, 1], [], []>} : vector<4x32xf32>, vector<32x32xf32>, vector<4x32xf32> -> vector<4x32xf32>
    %655 = vector.broadcast %87 : vector<1x32xf32> to vector<4x32xf32>
    %656 = arith.addf %654, %655 : vector<4x32xf32>
    %cst_341 = arith.constant dense<0.000000e+00> : vector<4x32xf32>
    %657 = tpu.matmul %648, %83, %cst_341 {dimension_numbers = #tpu.dot_dimension_numbers<[1], [0], [0], [1], [0, 0, 1, 1], [], []>} : vector<4x32xf32>, vector<32x32xf32>, vector<4x32xf32> -> vector<4x32xf32>
    %658 = vector.broadcast %89 : vector<1x32xf32> to vector<4x32xf32>
    %659 = arith.addf %657, %658 : vector<4x32xf32>
    %cst_342 = arith.constant dense<0.000000e+00> : vector<4x32xf32>
    %660 = tpu.matmul %648, %85, %cst_342 {dimension_numbers = #tpu.dot_dimension_numbers<[1], [0], [0], [1], [0, 0, 1, 1], [], []>} : vector<4x32xf32>, vector<32x32xf32>, vector<4x32xf32> -> vector<4x32xf32>
    %661 = vector.broadcast %91 : vector<1x32xf32> to vector<4x32xf32>
    %662 = arith.addf %660, %661 : vector<4x32xf32>
    %c0_343 = arith.constant 0 : index
    %663 = arith.index_cast %653 : i32 to index
    %c0_344 = arith.constant 0 : index
    %c0_345 = arith.constant 0 : index
    %664 = vector.load %arg10[%c0_343, %663, %c0_344, %c0_345] : memref<3x16x4x32xf32, #tpu.memory_space<vmem>>, vector<1x1x4x32xf32>
    %665 = vector.shape_cast %664 : vector<1x1x4x32xf32> to vector<4x32xf32>
    %666 = arith.addf %665, %656 : vector<4x32xf32>
    %667 = arith.negf %666 : vector<4x32xf32>
    %668 = math.exp %667 : vector<4x32xf32>
    %cst_346 = arith.constant 1.000000e+00 : f32
    %669 = vector.broadcast %cst_346 : f32 to vector<4x32xf32>
    %670 = arith.addf %669, %668 : vector<4x32xf32>
    %671 = arith.divf %669, %670 : vector<4x32xf32>
    %c1_347 = arith.constant 1 : index
    %672 = arith.index_cast %653 : i32 to index
    %c0_348 = arith.constant 0 : index
    %c0_349 = arith.constant 0 : index
    %673 = vector.load %arg10[%c1_347, %672, %c0_348, %c0_349] : memref<3x16x4x32xf32, #tpu.memory_space<vmem>>, vector<1x1x4x32xf32>
    %674 = vector.shape_cast %673 : vector<1x1x4x32xf32> to vector<4x32xf32>
    %675 = arith.addf %674, %659 : vector<4x32xf32>
    %676 = arith.negf %675 : vector<4x32xf32>
    %677 = math.exp %676 : vector<4x32xf32>
    %cst_350 = arith.constant 1.000000e+00 : f32
    %678 = vector.broadcast %cst_350 : f32 to vector<4x32xf32>
    %679 = arith.addf %678, %677 : vector<4x32xf32>
    %680 = arith.divf %678, %679 : vector<4x32xf32>
    %c2_351 = arith.constant 2 : index
    %681 = arith.index_cast %653 : i32 to index
    %c0_352 = arith.constant 0 : index
    %c0_353 = arith.constant 0 : index
    %682 = vector.load %arg10[%c2_351, %681, %c0_352, %c0_353] : memref<3x16x4x32xf32, #tpu.memory_space<vmem>>, vector<1x1x4x32xf32>
    %683 = vector.shape_cast %682 : vector<1x1x4x32xf32> to vector<4x32xf32>
    %684 = arith.mulf %671, %662 : vector<4x32xf32>
    %685 = arith.addf %683, %684 : vector<4x32xf32>
    %686 = math.tanh %685 : vector<4x32xf32>
    %cst_354 = arith.constant 1.000000e+00 : f32
    %687 = vector.broadcast %cst_354 : f32 to vector<4x32xf32>
    %688 = arith.subf %687, %680 : vector<4x32xf32>
    %689 = arith.mulf %688, %686 : vector<4x32xf32>
    %690 = arith.mulf %680, %648 : vector<4x32xf32>
    %691 = arith.addf %689, %690 : vector<4x32xf32>
    %c0_355 = arith.constant 0 : index
    %692 = arith.index_cast %653 : i32 to index
    %c0_356 = arith.constant 0 : index
    %c0_357 = arith.constant 0 : index
    %693 = vector.load %arg9[%c0_355, %692, %c0_356, %c0_357] : memref<1x16x4x32xf32, #tpu.memory_space<vmem>>, vector<1x1x4x32xf32>
    %694 = vector.shape_cast %693 : vector<1x1x4x32xf32> to vector<4x32xf32>
    %695 = vector.shape_cast %691 : vector<4x32xf32> to vector<1x1x4x32xf32>
    tpu.vector_store %arg9[%c0_355, %692, %c0_356, %c0_357], %695 {strides = array<i32>} : memref<1x16x4x32xf32, #tpu.memory_space<vmem>>, vector<1x1x4x32xf32>,
    %c1_i32_358 = arith.constant 1 : i32
    %c14_i32_359 = arith.constant 14 : i32
    %696 = arith.select %92, %c1_i32_358, %c14_i32_359 : i32
    %cst_360 = arith.constant dense<0.000000e+00> : vector<4x32xf32>
    %697 = tpu.matmul %691, %81, %cst_360 {dimension_numbers = #tpu.dot_dimension_numbers<[1], [0], [0], [1], [0, 0, 1, 1], [], []>} : vector<4x32xf32>, vector<32x32xf32>, vector<4x32xf32> -> vector<4x32xf32>
    %698 = vector.broadcast %87 : vector<1x32xf32> to vector<4x32xf32>
    %699 = arith.addf %697, %698 : vector<4x32xf32>
    %cst_361 = arith.constant dense<0.000000e+00> : vector<4x32xf32>
    %700 = tpu.matmul %691, %83, %cst_361 {dimension_numbers = #tpu.dot_dimension_numbers<[1], [0], [0], [1], [0, 0, 1, 1], [], []>} : vector<4x32xf32>, vector<32x32xf32>, vector<4x32xf32> -> vector<4x32xf32>
    %701 = vector.broadcast %89 : vector<1x32xf32> to vector<4x32xf32>
    %702 = arith.addf %700, %701 : vector<4x32xf32>
    %cst_362 = arith.constant dense<0.000000e+00> : vector<4x32xf32>
    %703 = tpu.matmul %691, %85, %cst_362 {dimension_numbers = #tpu.dot_dimension_numbers<[1], [0], [0], [1], [0, 0, 1, 1], [], []>} : vector<4x32xf32>, vector<32x32xf32>, vector<4x32xf32> -> vector<4x32xf32>
    %704 = vector.broadcast %91 : vector<1x32xf32> to vector<4x32xf32>
    %705 = arith.addf %703, %704 : vector<4x32xf32>
    %c0_363 = arith.constant 0 : index
    %706 = arith.index_cast %696 : i32 to index
    %c0_364 = arith.constant 0 : index
    %c0_365 = arith.constant 0 : index
    %707 = vector.load %arg10[%c0_363, %706, %c0_364, %c0_365] : memref<3x16x4x32xf32, #tpu.memory_space<vmem>>, vector<1x1x4x32xf32>
    %708 = vector.shape_cast %707 : vector<1x1x4x32xf32> to vector<4x32xf32>
    %709 = arith.addf %708, %699 : vector<4x32xf32>
    %710 = arith.negf %709 : vector<4x32xf32>
    %711 = math.exp %710 : vector<4x32xf32>
    %cst_366 = arith.constant 1.000000e+00 : f32
    %712 = vector.broadcast %cst_366 : f32 to vector<4x32xf32>
    %713 = arith.addf %712, %711 : vector<4x32xf32>
    %714 = arith.divf %712, %713 : vector<4x32xf32>
    %c1_367 = arith.constant 1 : index
    %715 = arith.index_cast %696 : i32 to index
    %c0_368 = arith.constant 0 : index
    %c0_369 = arith.constant 0 : index
    %716 = vector.load %arg10[%c1_367, %715, %c0_368, %c0_369] : memref<3x16x4x32xf32, #tpu.memory_space<vmem>>, vector<1x1x4x32xf32>
    %717 = vector.shape_cast %716 : vector<1x1x4x32xf32> to vector<4x32xf32>
    %718 = arith.addf %717, %702 : vector<4x32xf32>
    %719 = arith.negf %718 : vector<4x32xf32>
    %720 = math.exp %719 : vector<4x32xf32>
    %cst_370 = arith.constant 1.000000e+00 : f32
    %721 = vector.broadcast %cst_370 : f32 to vector<4x32xf32>
    %722 = arith.addf %721, %720 : vector<4x32xf32>
    %723 = arith.divf %721, %722 : vector<4x32xf32>
    %c2_371 = arith.constant 2 : index
    %724 = arith.index_cast %696 : i32 to index
    %c0_372 = arith.constant 0 : index
    %c0_373 = arith.constant 0 : index
    %725 = vector.load %arg10[%c2_371, %724, %c0_372, %c0_373] : memref<3x16x4x32xf32, #tpu.memory_space<vmem>>, vector<1x1x4x32xf32>
    %726 = vector.shape_cast %725 : vector<1x1x4x32xf32> to vector<4x32xf32>
    %727 = arith.mulf %714, %705 : vector<4x32xf32>
    %728 = arith.addf %726, %727 : vector<4x32xf32>
    %729 = math.tanh %728 : vector<4x32xf32>
    %cst_374 = arith.constant 1.000000e+00 : f32
    %730 = vector.broadcast %cst_374 : f32 to vector<4x32xf32>
    %731 = arith.subf %730, %723 : vector<4x32xf32>
    %732 = arith.mulf %731, %729 : vector<4x32xf32>
    %733 = arith.mulf %723, %691 : vector<4x32xf32>
    %734 = arith.addf %732, %733 : vector<4x32xf32>
    %c0_375 = arith.constant 0 : index
    %735 = arith.index_cast %696 : i32 to index
    %c0_376 = arith.constant 0 : index
    %c0_377 = arith.constant 0 : index
    %736 = vector.load %arg9[%c0_375, %735, %c0_376, %c0_377] : memref<1x16x4x32xf32, #tpu.memory_space<vmem>>, vector<1x1x4x32xf32>
    %737 = vector.shape_cast %736 : vector<1x1x4x32xf32> to vector<4x32xf32>
    %738 = vector.shape_cast %734 : vector<4x32xf32> to vector<1x1x4x32xf32>
    tpu.vector_store %arg9[%c0_375, %735, %c0_376, %c0_377], %738 {strides = array<i32>} : memref<1x16x4x32xf32, #tpu.memory_space<vmem>>, vector<1x1x4x32xf32>,
    %c0_i32_378 = arith.constant 0 : i32
    %c15_i32_379 = arith.constant 15 : i32
    %739 = arith.select %92, %c0_i32_378, %c15_i32_379 : i32
    %cst_380 = arith.constant dense<0.000000e+00> : vector<4x32xf32>
    %740 = tpu.matmul %734, %81, %cst_380 {dimension_numbers = #tpu.dot_dimension_numbers<[1], [0], [0], [1], [0, 0, 1, 1], [], []>} : vector<4x32xf32>, vector<32x32xf32>, vector<4x32xf32> -> vector<4x32xf32>
    %741 = vector.broadcast %87 : vector<1x32xf32> to vector<4x32xf32>
    %742 = arith.addf %740, %741 : vector<4x32xf32>
    %cst_381 = arith.constant dense<0.000000e+00> : vector<4x32xf32>
    %743 = tpu.matmul %734, %83, %cst_381 {dimension_numbers = #tpu.dot_dimension_numbers<[1], [0], [0], [1], [0, 0, 1, 1], [], []>} : vector<4x32xf32>, vector<32x32xf32>, vector<4x32xf32> -> vector<4x32xf32>
    %744 = vector.broadcast %89 : vector<1x32xf32> to vector<4x32xf32>
    %745 = arith.addf %743, %744 : vector<4x32xf32>
    %cst_382 = arith.constant dense<0.000000e+00> : vector<4x32xf32>
    %746 = tpu.matmul %734, %85, %cst_382 {dimension_numbers = #tpu.dot_dimension_numbers<[1], [0], [0], [1], [0, 0, 1, 1], [], []>} : vector<4x32xf32>, vector<32x32xf32>, vector<4x32xf32> -> vector<4x32xf32>
    %747 = vector.broadcast %91 : vector<1x32xf32> to vector<4x32xf32>
    %748 = arith.addf %746, %747 : vector<4x32xf32>
    %c0_383 = arith.constant 0 : index
    %749 = arith.index_cast %739 : i32 to index
    %c0_384 = arith.constant 0 : index
    %c0_385 = arith.constant 0 : index
    %750 = vector.load %arg10[%c0_383, %749, %c0_384, %c0_385] : memref<3x16x4x32xf32, #tpu.memory_space<vmem>>, vector<1x1x4x32xf32>
    %751 = vector.shape_cast %750 : vector<1x1x4x32xf32> to vector<4x32xf32>
    %752 = arith.addf %751, %742 : vector<4x32xf32>
    %753 = arith.negf %752 : vector<4x32xf32>
    %754 = math.exp %753 : vector<4x32xf32>
    %cst_386 = arith.constant 1.000000e+00 : f32
    %755 = vector.broadcast %cst_386 : f32 to vector<4x32xf32>
    %756 = arith.addf %755, %754 : vector<4x32xf32>
    %757 = arith.divf %755, %756 : vector<4x32xf32>
    %c1_387 = arith.constant 1 : index
    %758 = arith.index_cast %739 : i32 to index
    %c0_388 = arith.constant 0 : index
    %c0_389 = arith.constant 0 : index
    %759 = vector.load %arg10[%c1_387, %758, %c0_388, %c0_389] : memref<3x16x4x32xf32, #tpu.memory_space<vmem>>, vector<1x1x4x32xf32>
    %760 = vector.shape_cast %759 : vector<1x1x4x32xf32> to vector<4x32xf32>
    %761 = arith.addf %760, %745 : vector<4x32xf32>
    %762 = arith.negf %761 : vector<4x32xf32>
    %763 = math.exp %762 : vector<4x32xf32>
    %cst_390 = arith.constant 1.000000e+00 : f32
    %764 = vector.broadcast %cst_390 : f32 to vector<4x32xf32>
    %765 = arith.addf %764, %763 : vector<4x32xf32>
    %766 = arith.divf %764, %765 : vector<4x32xf32>
    %c2_391 = arith.constant 2 : index
    %767 = arith.index_cast %739 : i32 to index
    %c0_392 = arith.constant 0 : index
    %c0_393 = arith.constant 0 : index
    %768 = vector.load %arg10[%c2_391, %767, %c0_392, %c0_393] : memref<3x16x4x32xf32, #tpu.memory_space<vmem>>, vector<1x1x4x32xf32>
    %769 = vector.shape_cast %768 : vector<1x1x4x32xf32> to vector<4x32xf32>
    %770 = arith.mulf %757, %748 : vector<4x32xf32>
    %771 = arith.addf %769, %770 : vector<4x32xf32>
    %772 = math.tanh %771 : vector<4x32xf32>
    %cst_394 = arith.constant 1.000000e+00 : f32
    %773 = vector.broadcast %cst_394 : f32 to vector<4x32xf32>
    %774 = arith.subf %773, %766 : vector<4x32xf32>
    %775 = arith.mulf %774, %772 : vector<4x32xf32>
    %776 = arith.mulf %766, %734 : vector<4x32xf32>
    %777 = arith.addf %775, %776 : vector<4x32xf32>
    %c0_395 = arith.constant 0 : index
    %778 = arith.index_cast %739 : i32 to index
    %c0_396 = arith.constant 0 : index
    %c0_397 = arith.constant 0 : index
    %779 = vector.load %arg9[%c0_395, %778, %c0_396, %c0_397] : memref<1x16x4x32xf32, #tpu.memory_space<vmem>>, vector<1x1x4x32xf32>
    %780 = vector.shape_cast %779 : vector<1x1x4x32xf32> to vector<4x32xf32>
    %781 = vector.shape_cast %777 : vector<4x32xf32> to vector<1x1x4x32xf32>
    tpu.vector_store %arg9[%c0_395, %778, %c0_396, %c0_397], %781 {strides = array<i32>} : memref<1x16x4x32xf32, #tpu.memory_space<vmem>>, vector<1x1x4x32xf32>,
    return
  }
  func.func @transform_0(%arg0: i32) -> (i32, i32, i32) {
    %c0_i32 = arith.constant 0 : i32
    %c0_i32_0 = arith.constant 0 : i32
    %c0_i32_1 = arith.constant 0 : i32
    %c0_i32_2 = arith.constant 0 : i32
    return %c0_i32, %c0_i32_0, %c0_i32_1 : i32, i32, i32
  }
  func.func @transform_1(%arg0: i32) -> (i32, i32, i32) {
    %c0_i32 = arith.constant 0 : i32
    %c0_i32_0 = arith.constant 0 : i32
    %c0_i32_1 = arith.constant 0 : i32
    %c0_i32_2 = arith.constant 0 : i32
    return %c0_i32, %c0_i32_0, %c0_i32_1 : i32, i32, i32
  }
  func.func @transform_2(%arg0: i32) -> (i32, i32) {
    %c0_i32 = arith.constant 0 : i32
    %c0_i32_0 = arith.constant 0 : i32
    %c0_i32_1 = arith.constant 0 : i32
    return %c0_i32, %c0_i32_0 : i32, i32
  }
  func.func @transform_3(%arg0: i32) -> (i32, i32, i32, i32) {
    %c0_i32 = arith.constant 0 : i32
    %c0_i32_0 = arith.constant 0 : i32
    %c0_i32_1 = arith.constant 0 : i32
    %c0_i32_2 = arith.constant 0 : i32
    return %arg0, %c0_i32, %c0_i32_0, %c0_i32_1 : i32, i32, i32, i32
  }
  func.func @transform_4(%arg0: i32) -> (i32, i32, i32, i32) {
    %c0_i32 = arith.constant 0 : i32
    %c0_i32_0 = arith.constant 0 : i32
    %c0_i32_1 = arith.constant 0 : i32
    %c0_i32_2 = arith.constant 0 : i32
    return %arg0, %c0_i32, %c0_i32_0, %c0_i32_1 : i32, i32, i32, i32
  }
  func.func @transform_5(%arg0: i32) -> (i32, i32, i32, i32) {
    %c0_i32 = arith.constant 0 : i32
    %c0_i32_0 = arith.constant 0 : i32
    %c0_i32_1 = arith.constant 0 : i32
    %c0_i32_2 = arith.constant 0 : i32
    return %arg0, %c0_i32, %c0_i32_0, %c0_i32_1 : i32, i32, i32, i32
  }
  func.func @transform_6(%arg0: i32) -> (i32, i32, i32, i32) {
    %c0_i32 = arith.constant 0 : i32
    %c0_i32_0 = arith.constant 0 : i32
    %c0_i32_1 = arith.constant 0 : i32
    %c0_i32_2 = arith.constant 0 : i32
    return %arg0, %c0_i32, %c0_i32_0, %c0_i32_1 : i32, i32, i32, i32
  }
  func.func @transform_7(%arg0: i32) -> (i32, i32, i32, i32) {
    %c0_i32 = arith.constant 0 : i32
    %c0_i32_0 = arith.constant 0 : i32
    %c0_i32_1 = arith.constant 0 : i32
    %c0_i32_2 = arith.constant 0 : i32
    return %arg0, %c0_i32, %c0_i32_0, %c0_i32_1 : i32, i32, i32, i32
  }
  func.func @transform_8(%arg0: i32) -> (i32, i32, i32, i32) {
    %c0_i32 = arith.constant 0 : i32
    %c0_i32_0 = arith.constant 0 : i32
    %c0_i32_1 = arith.constant 0 : i32
    %c0_i32_2 = arith.constant 0 : i32
    return %arg0, %c0_i32, %c0_i32_0, %c0_i32_1 : i32, i32, i32, i32
  }
}

</mosaic_0001>

<bundles_post_ra>
// kernel: sentence_attention_forward.3
= control target key start
LH: loop header
LB: loop body
LE: loop exit
PB: predicated region body
PF: predicated region fallthrough
CT: control target
= control target key end

     0   :  { %8 = vsyncpa [#allocation3], 0  ;;  %vm20_vm0 = vcmask 523264   ;;  %s1153_s0 = inlined_call_operand.vmem [shape: f32[4,16,64], index: 0, kind: input, shape index: {}]   ;;  %s1154_s1 = inlined_call_operand.hbm [shape: f32[4,16,64], index: 1, kind: output, shape index: {0}]   ;;  %s1155_s2 = inlined_call_operand.hbm [shape: f32[4,16,16], index: 2, kind: output, shape index: {1}]  }
   0x1   :  { %v13_v0 = vld [vmem:[%s1153_s0 + $0x8] sm:$0xff]  ;;  %v15_v1 = vld [vmem:[%s1153_s0 + $0x18] sm:$0xff]  ;;  %v12_v2 = vld [vmem:[%s1153_s0] sm:$0xff] }
   0x2   :  { %870 = vmatprep.subr.msk.mxu0 %vm20_vm0, %v13_v0  ;;  %877 = vmatprep.subr.msk.mxu1 %vm20_vm0, %v15_v1  ;;  %v14_v3 = vld [vmem:[%s1153_s0 + $0x10] sm:$0xff] }
   0x3   :  { %871 = vmatpush3.xpose.msk.msra.mxu0 %vm20_vm0, %v13_v0  ;;  %878 = vmatpush3.xpose.msk.msra.mxu1 %vm20_vm0, %v15_v1 }
   0x4   :  { %9 = vsyncpa [#allocation5], 0  ;;  %872 = vmatprep.subr.msk.mxu0 %vm20_vm0, %v12_v2  ;;  %879 = vmatprep.subr.msk.mxu1 %vm20_vm0, %v14_v3  ;;  %v1048_v4 = vld [vmem:[%s1153_s0 + $0x28] sm:$0xff]  ;;  %v1053_v5 = vld [vmem:[%s1153_s0 + $0x38] sm:$0xff]  ;;  %vm353_vm1 = vcmask 130048  }
   0x5   :  { %874 = vmatprep.mubr.msk.f32.mxu0 %vm20_vm0, %v12_v2  ;;  %881 = vmatprep.mubr.msk.f32.mxu1 %vm20_vm0, %v14_v3  ;;  %v1064_v6 = vld [vmem:[%s1153_s0 + $0x20] sm:$0xff]  ;;  %v1069_v7 = vld [vmem:[%s1153_s0 + $0x30] sm:$0xff]  ;;  %s1006_s0 = smov [#allocation4]  }
   0x6   :  { %s799_s25 = sshll.u32 %s1006_s0, 4  ;;  %s800_s25 = int_to_ptr.vmem [resolvable:$true] %s799_s25 }
   0x7   :  { %873 = vmatpush3.xpose.msk.msra.mxu0 %vm20_vm0, %v12_v2  ;;  %880 = vmatpush3.xpose.msk.msra.mxu1 %vm20_vm0, %v14_v3  ;;  %s962_s26 = scalar_lea.vmem %s800_s25, 1024  ;;  %p967_p1 = scmp.lt.s32.totalorder %s800_s25, %s800_s25 }
   0x8   :  { %884 = vmatprep.subr.msk.mxu0 %vm20_vm0, %v1048_v4  ;;  %891 = vmatprep.subr.msk.mxu1 %vm20_vm0, %v1053_v5  ;;  %p963_p0 = scmp.ne.s32.totalorder %s800_s25, %s962_s26  ;;  %p968_p2 = scmp.lt.s32.totalorder %s962_s26, %s962_s26 }
   0xa   :  { %875 = vmatmul.mubr.msk.f32.vlgmr.msra.gmra.mxu0 %vm20_vm0, %v13_v0  ;;  %882 = vmatmul.mubr.msk.f32.vlgmr.msra.gmra.mxu1 %vm20_vm0, %v15_v1  ;;  %p969_p3 = por %p968_p2, %p967_p1 }
   0xb   :  { %885 = vmatpush3.xpose.msk.msra.mxu0 %vm20_vm0, %v1048_v4  ;;  %892 = vmatpush3.xpose.msk.msra.mxu1 %vm20_vm0, %v1053_v5 }
   0xc   :  { %886 = vmatprep.subr.msk.mxu0 %vm20_vm0, %v1064_v6  ;;  %893 = vmatprep.subr.msk.mxu1 %vm20_vm0, %v1069_v7  ;;  %p970_p4 = pnand %p969_p3, %p963_p0 }
   0xd   :  { %888 = vmatprep.mubr.msk.f32.mxu0 %vm20_vm0, %v1064_v6  ;;  %895 = vmatprep.mubr.msk.f32.mxu1 %vm20_vm0, %v1069_v7 }
   0xf   :  { %887 = vmatpush3.xpose.msk.msra.mxu0 %vm20_vm0, %v1064_v6  ;;  %894 = vmatpush3.xpose.msk.msra.mxu1 %vm20_vm0, %v1069_v7 }
  0x10   :  { %898 = vmatprep.subr.mxu0 %v13_v0  ;;  %905 = vmatprep.subr.mxu1 %v15_v1 }
  0x12   :  { %889 = vmatmul.mubr.msk.f32.vlgmr.msra.gmra.mxu0 %vm20_vm0, %v1048_v4  ;;  %896 = vmatmul.mubr.msk.f32.vlgmr.msra.gmra.mxu1 %vm20_vm0, %v1053_v5 }
  0x13   :  { %899 = vmatpush3.msra.mxu0 %v13_v0  ;;  %906 = vmatpush3.msra.mxu1 %v15_v1 }
  0x14   :  { %900 = vmatprep.subr.mxu0 %v12_v2  ;;  %907 = vmatprep.subr.mxu1 %v14_v3 }
  0x15   :  { %901 = vmatpush3.msra.mxu0 %v12_v2  ;;  %908 = vmatpush3.msra.mxu1 %v14_v3 }
  0x16   :  { %912 = vmatprep.subr.mxu0 %v1048_v4  ;;  %919 = vmatprep.subr.mxu1 %v1053_v5 }
  0xca   :  { %v876_v8 = vpop.f32.mrf.mxu0  ;;  %v883_v9 = vpop.f32.mrf.mxu1 }
  0xcb   :  { %v346_v10 = vmul.f32 0.125, %v876_v8  ;;  %v348_v11 = vmul.f32 0.125, %v883_v9 }
  0xcc   :  { %v93_v12 = vpop.f32.mrf.mxu0  ;;  %v174_v13 = vpop.f32.mrf.mxu1 }
  0xcd   :  { %v345_v14 = vmul.f32 0.125, %v93_v12  ;;  %v357_v15 = vsel %vm353_vm1, %v346_v10, -inf  ;;  %v347_v16 = vmul.f32 0.125, %v174_v13  ;;  %v363_v18 = vsel %vm353_vm1, %v348_v11, -inf }
  0xce   :  { %358 = vmax.xlane.f32.xlu1 %v357_v15 }
  0xcf   :  { %v354_v17 = vsel %vm353_vm1, %v345_v14, -inf  ;;  %v360_v21 = vsel %vm353_vm1, %v347_v16, -inf }
  0xd0   :  { %355 = vmax.xlane.f32.xlu0 %v354_v17 }
  0xd2   :  { %v897_v19 = vpop.f32.mrf.mxu1  ;;  %364 = vmax.xlane.f32.xlu1 %v363_v18  ;;  %v890_v20 = vpop.f32.mrf.mxu0 }
  0xd3   :  { %v352_v26 = vmul.f32 0.125, %v897_v19  ;;  %v350_v27 = vmul.f32 0.125, %v890_v20 }
  0xd4   :  { %v336_v22 = vpop.f32.mrf.mxu1  ;;  %361 = vmax.xlane.f32.xlu0 %v360_v21  ;;  %v255_v23 = vpop.f32.mrf.mxu0 }
  0xd5   :  { %v351_v24 = vmul.f32 0.125, %v336_v22  ;;  %v349_v25 = vmul.f32 0.125, %v255_v23  ;;  %v375_v30 = vsel %vm353_vm1, %v352_v26, -inf  ;;  %v369_v31 = vsel %vm353_vm1, %v350_v27, -inf }
  0xd7   :  { %v372_v28 = vsel %vm353_vm1, %v351_v24, -inf  ;;  %v366_v29 = vsel %vm353_vm1, %v349_v25, -inf }
  0xd8   :  { %373 = vmax.xlane.f32.xlu1 %v372_v28  ;;  %367 = vmax.xlane.f32.xlu0 %v366_v29 }
  0xdc   :  { %376 = vmax.xlane.f32.xlu1 %v375_v30  ;;  %370 = vmax.xlane.f32.xlu0 %v369_v31 }
 0x157   :  { %v359_v32 = vpop.xlane.xlu1 %358 }
 0x158   :  { %v379_v33 = vsub.f32 %v346_v10, %v359_v32 }
 0x159   :  { %v356_v34 = vpop.xlane.xlu0 %355 }
 0x15a   :  { %v388_v35 = vmul.f32 1.442695, %v379_v33  ;;  %v378_v36 = vsub.f32 %v345_v14, %v356_v34 }
 0x15b   :  { %v365_v37 = vpop.xlane.xlu1 %364 }
 0x15c   :  { %930 = vpow2.f32 %v388_v35  ;;  %v386_v38 = vmul.f32 1.442695, %v378_v36  ;;  %v381_v39 = vsub.f32 %v348_v11, %v365_v37 }
 0x15d   :  { %v362_v40 = vpop.xlane.xlu0 %361 }
 0x15e   :  { %932 = vpow2.f32 %v386_v38  ;;  %v392_v41 = vmul.f32 1.442695, %v381_v39  ;;  %v380_v42 = vsub.f32 %v347_v16, %v362_v40 }
 0x160   :  { %934 = vpow2.f32 %v392_v41  ;;  %v390_v43 = vmul.f32 1.442695, %v380_v42 }
 0x161   :  { %v374_v44 = vpop.xlane.xlu1 %373  ;;  %v368_v45 = vpop.xlane.xlu0 %367 }
 0x162   :  { %936 = vpow2.f32 %v390_v43  ;;  %v384_v46 = vsub.f32 %v351_v24, %v374_v44  ;;  %v382_v47 = vsub.f32 %v349_v25, %v368_v45 }
 0x164   :  { %v398_v48 = vmul.f32 1.442695, %v384_v46  ;;  %v394_v49 = vmul.f32 1.442695, %v382_v47 }
 0x165   :  { %v377_v50 = vpop.xlane.xlu1 %376  ;;  %v371_v51 = vpop.xlane.xlu0 %370 }
 0x166   :  { %938 = vpow2.f32 %v398_v48  ;;  %v385_v52 = vsub.f32 %v352_v26, %v377_v50  ;;  %v383_v53 = vsub.f32 %v350_v27, %v371_v51 }
 0x167   :  { %940 = vpow2.f32 %v394_v49 }
 0x168   :  { %v400_v54 = vmul.f32 1.442695, %v385_v52  ;;  %v396_v55 = vmul.f32 1.442695, %v383_v53 }
 0x169   :  { %v931_v56 = vpop.eup %930 }
 0x16a   :  { %942 = vpow2.f32 %v400_v54  ;;  %v405_v57 = vsel %vm353_vm1, %v931_v56, 0.0 }
 0x16b   :  { %v933_v58 = vpop.eup %932  ;;  %944 = vpow2.f32 %v396_v55  ;;  %406 = vadd.xlane.f32.xlu0 %v405_v57 }
 0x16c   :  { %v402_v61 = vsel %vm353_vm1, %v933_v58, 0.0 }
 0x16d   :  { %v935_v59 = vpop.eup %934 }
 0x16e   :  { %v411_v60 = vsel %vm353_vm1, %v935_v59, 0.0 }
 0x16f   :  { %v937_v62 = vpop.eup %936  ;;  %412 = vadd.xlane.f32.xlu1 %v411_v60  ;;  %403 = vadd.xlane.f32.xlu0 %v402_v61 }
 0x170   :  { %v408_v63 = vsel %vm353_vm1, %v937_v62, 0.0 }
 0x173   :  { %v939_v0 = vpop.eup %938  ;;  %409 = vadd.xlane.f32.xlu1 %v408_v63 }
 0x174   :  { %v941_v1 = vpop.eup %940  ;;  %v420_v3 = vsel %vm353_vm1, %v939_v0, 0.0 }
 0x175   :  { %v414_v2 = vsel %vm353_vm1, %v941_v1, 0.0 }
 0x176   :  { %415 = vadd.xlane.f32.xlu0 %v414_v2 }
 0x177   :  { %v943_v8 = vpop.eup %942  ;;  %421 = vadd.xlane.f32.xlu1 %v420_v3 }
 0x178   :  { %v945_v9 = vpop.eup %944  ;;  %v423_v11 = vsel %vm353_vm1, %v943_v8, 0.0 }
 0x179   :  { %v417_v10 = vsel %vm353_vm1, %v945_v9, 0.0 }
 0x17a   :  { %418 = vadd.xlane.f32.xlu0 %v417_v10 }
 0x17b   :  { %424 = vadd.xlane.f32.xlu1 %v423_v11 }
 0x1f4   :  { %v407_v12 = vpop.xlane.xlu0 %406 }
 0x1f5   :  { %946 = vrcp.f32 %v407_v12 }
 0x1f8   :  { %v413_v13 = vpop.xlane.xlu1 %412  ;;  %v404_v14 = vpop.xlane.xlu0 %403 }
 0x1f9   :  { %948 = vrcp.f32 %v413_v13 }
 0x1fa   :  { %950 = vrcp.f32 %v404_v14 }
 0x1fc   :  { %v410_v15 = vpop.xlane.xlu1 %409 }
 0x1fd   :  { %952 = vrcp.f32 %v410_v15 }
 0x1ff   :  { %v416_v16 = vpop.xlane.xlu0 %415 }
 0x200   :  { %954 = vrcp.f32 %v416_v16  ;;  %v422_v17 = vpop.xlane.xlu1 %421 }
 0x201   :  { %956 = vrcp.f32 %v422_v17 }
 0x202   :  { %v947_v18 = vpop.eup %946 }
 0x203   :  { %v419_v19 = vpop.xlane.xlu0 %418  ;;  %v429_v20 = vmul.f32 %v947_v18, %v931_v56 }
 0x204   :  { %958 = vrcp.f32 %v419_v19  ;;  %v425_v21 = vpop.xlane.xlu1 %424 }
 0x205   :  { %960 = vrcp.f32 %v425_v21  ;;  %443 = vst.msk [vmem:[#allocation4 + $0x8] sm:$0xff] %vm353_vm1, %v429_v20 }
 0x206   :  { %v949_v22 = vpop.eup %948 }
 0x207   :  { %v951_v23 = vpop.eup %950  ;;  %v433_v24 = vmul.f32 %v949_v22, %v935_v59 }
 0x208   :  { %v427_v25 = vmul.f32 %v951_v23, %v933_v58 }
 0x209   :  { %445 = vst.msk [vmem:[#allocation4 + $0x18] sm:$0xff] %vm353_vm1, %v433_v24 }
 0x20a   :  { %v953_v26 = vpop.eup %952  ;;  %442 = vst.msk [vmem:[#allocation4] sm:$0xff] %vm353_vm1, %v427_v25  ;;  %902 = vmatprep.mubr.msk.f32.mxu0 %vm353_vm1, %v427_v25 }
 0x20b   :  { %903 = vmatmul.mubr.msk.f32.vlgmr.msra.gmra.mxu0 %vm353_vm1, %v429_v20  ;;  %v431_v27 = vmul.f32 %v953_v26, %v937_v62 }
 0x20c   :  { %913 = vmatpush3.msra.mxu0 %v1048_v4 }
 0x20d   :  { %v955_v28 = vpop.eup %954  ;;  %444 = vst.msk [vmem:[#allocation4 + $0x10] sm:$0xff] %vm353_vm1, %v431_v27  ;;  %909 = vmatprep.mubr.msk.f32.mxu1 %vm353_vm1, %v431_v27  ;;  %914 = vmatprep.subr.mxu0 %v1064_v6 }
 0x20e   :  { %v957_v29 = vpop.eup %956  ;;  %910 = vmatmul.mubr.msk.f32.vlgmr.msra.gmra.mxu1 %vm353_vm1, %v433_v24  ;;  %v435_v30 = vmul.f32 %v955_v28, %v941_v1  ;;  %915 = vmatpush3.msra.mxu0 %v1064_v6 }
 0x20f   :  { %920 = vmatpush3.msra.mxu1 %v1053_v5  ;;  %v439_v31 = vmul.f32 %v957_v29, %v939_v0 }
 0x210   :  { %446 = vst.msk [vmem:[#allocation4 + $0x20] sm:$0xff] %vm353_vm1, %v435_v30  ;;  %916 = vmatprep.mubr.msk.f32.mxu0 %vm353_vm1, %v435_v30  ;;  %921 = vmatprep.subr.mxu1 %v1069_v7 }
 0x211   :  { %v959_v4 = vpop.eup %958  ;;  %448 = vst.msk [vmem:[#allocation4 + $0x30] sm:$0xff] %vm353_vm1, %v439_v31  ;;  %923 = vmatprep.mubr.msk.f32.mxu1 %vm353_vm1, %v439_v31  ;;  %922 = vmatpush3.msra.mxu1 %v1069_v7 }
 0x212   :  { %v961_v32 = vpop.eup %960  ;;  %v437_v33 = vmul.f32 %v959_v4, %v945_v9 }
 0x213   :  { %v441_v34 = vmul.f32 %v961_v32, %v943_v8 }
 0x214   :  { %447 = vst.msk [vmem:[#allocation4 + $0x28] sm:$0xff] %vm353_vm1, %v437_v33  ;;  %917 = vmatmul.mubr.msk.f32.vlgmr.msra.gmra.mxu0 %vm353_vm1, %v437_v33 }
 0x215   :  { %449 = vst.msk [vmem:[#allocation4 + $0x38] sm:$0xff] %vm353_vm1, %v441_v34  ;;  %924 = vmatmul.mubr.msk.f32.vlgmr.msra.gmra.mxu1 %vm353_vm1, %v441_v34 }
 0x216   :  { %973 = shalt.err (!%p970_p4)
}
 0x217   :  { %s1007_s27 = smov 128   ;;  %s1008_s28 = smov 8  }
 0x218   :  { %805 = dma.vmem_to_hbm [thread:$0]  %s800_s25, 1024, %s1155_s2, [#allocation5], %s1007_s27, %s1007_s27, %s1008_s28  }
 0x219   :  { %s1009_s3 = smov [#allocation2]  }
 0x21a   :  { %s787_s4 = sshll.u32 %s1009_s3, 4  ;;  %s788_s4 = int_to_ptr.vmem [resolvable:$true] %s787_s4 }
 0x21b   :  { %s982_s2 = scalar_lea.vmem %s788_s4, 1024  ;;  %p987_p6 = scmp.lt.s32.totalorder %s788_s4, %s788_s4 }
 0x21c   :  { %p983_p5 = scmp.ne.s32.totalorder %s788_s4, %s982_s2  ;;  %p988_p7 = scmp.lt.s32.totalorder %s982_s2, %s982_s2 }
 0x21e   :  { %p989_p8 = por %p988_p7, %p987_p6 }
 0x220   :  { %p990_p9 = pnand %p989_p8, %p983_p5 }
 0x2cb   :  { %v904_v5 = vpop.f32.mrf.mxu0 }
 0x2cc   :  { %775 = vst.msk [vmem:[#allocation2 + $0x8] sm:$0xff] %vm20_vm0, %v904_v5 }
 0x2cd   :  { %v522_v6 = vpop.f32.mrf.mxu0 }
 0x2ce   :  { %774 = vst.msk [vmem:[#allocation2] sm:$0xff] %vm20_vm0, %v522_v6  ;;  %v911_v7 = vpop.f32.mrf.mxu1 }
 0x2cf   :  { %777 = vst.msk [vmem:[#allocation2 + $0x18] sm:$0xff] %vm20_vm0, %v911_v7 }
 0x2d0   :  { %v603_v35 = vpop.f32.mrf.mxu1 }
 0x2d1   :  { %776 = vst.msk [vmem:[#allocation2 + $0x10] sm:$0xff] %vm20_vm0, %v603_v35 }
 0x2d4   :  { %v918_v36 = vpop.f32.mrf.mxu0 }
 0x2d5   :  { %779 = vst.msk [vmem:[#allocation2 + $0x28] sm:$0xff] %vm20_vm0, %v918_v36  ;;  %v925_v37 = vpop.f32.mrf.mxu1 }
 0x2d6   :  { %v684_v38 = vpop.f32.mrf.mxu0  ;;  %781 = vst.msk [vmem:[#allocation2 + $0x38] sm:$0xff] %vm20_vm0, %v925_v37 }
 0x2d7   :  { %778 = vst.msk [vmem:[#allocation2 + $0x20] sm:$0xff] %vm20_vm0, %v684_v38  ;;  %v765_v39 = vpop.f32.mrf.mxu1 }
 0x2d8   :  { %780 = vst.msk [vmem:[#allocation2 + $0x30] sm:$0xff] %vm20_vm0, %v765_v39 }
 0x2d9   :  { %993 = shalt.err (!%p990_p9)
}
 0x2da   :  { %793 = dma.vmem_to_hbm [thread:$0]  %s788_s4, 1024, %s1154_s1, [#allocation3], %s1007_s27, %s1007_s27, %s1008_s28  }
 0x2db   :  { %1002 = dma.done.wait [#allocation3], 1024  }
 0x2dc   :  { %1003 = vsyncadd [#allocation3], 4294966272 }
 0x2dd   :  { %1004 = dma.done.wait [#allocation5], 1024  }
 0x2de   :  { %1005 = vsyncadd [#allocation5], 4294966272 }
 0x2df   :  { %812 = vsyncpa [#allocation3], 1 }
 0x2e0   :  { %813 = vsyncpa [#allocation5], 1 }

// kernel: sentence_attention_forward.2
= control target key start
LH: loop header
LB: loop body
LE: loop exit
PB: predicated region body
PF: predicated region fallthrough
CT: control target
= control target key end

     0   :  { %s7692_s27 = smov 0   ;;  %s9300_s0 = inlined_call_operand.vmem [shape: f32[16,4,32], index: 0, kind: input, shape index: {}]   ;;  %s9301_s1 = inlined_call_operand.vmem [shape: s32[16,4,1], index: 1, kind: input, shape index: {}]   ;;  %s9302_s2 = inlined_call_operand.vmem [shape: f32[128,48], index: 2, kind: input, shape index: {}]   ;;  %s9303_s3 = inlined_call_operand.vmem [shape: f32[2,3,32,32], index: 3, kind: input, shape index: {}]   ;;  %s9304_s4 = inlined_call_operand.vmem [shape: f32[2,3,48,32], index: 4, kind: input, shape index: {}]   ;;  %s9305_s5 = inlined_call_operand.vmem [shape: f32[2,3,32,32], index: 5, kind: input, shape index: {}]   ;;  %s9306_s6 = inlined_call_operand.vmem [shape: f32[2,3,1,32], index: 6, kind: input, shape index: {}]   ;;  %s9307_s7 = inlined_call_operand.vmem [shape: f32[2,3,1,32], index: 7, kind: input, shape index: {}]   ;;  %s9308_s8 = inlined_call_operand.vmem [shape: f32[2,16,4,32], index: 8, kind: output, shape index: {}]  }
   0x1 LB: > { %s7698_s28 = sadd.s32 4294967295, %s7640_s27   ;;  %p6113_p0 = scmp.ge.s32.totalorder %s7640_s27, 1  ;;  %s7640_s27 = sphi %s7692_s27, %s18_s27  }
   0x2   : > { %p300_p1 = scmp.lt.s32.totalorder %s7640_s27, 3 }
   0x4   : > { %p301_p2 = pnand %p6113_p0, %p300_p1 }
   0x5   : > { %p352_p3 = scmp.lt.s32.totalorder (!%p301_p2), %s7698_s28, 1  ;;  %p1891_p4 = scmp.eq.s32.totalorder (!%p301_p2), %s7698_s28, 1 }
   0x6   : > { %304 = sbr.rel (%p301_p2) target bundleno = 4524 (0x11ac), region = 52 }
   0xb   : > { %v644_v0 = vld [vmem:[%s9301_s1 + $0x8] sm:$0xf]  ;;  %v642_v1 = vld [vmem:[%s9301_s1] sm:$0xf]  ;;  %v7642_v2 = vmov 0   ;;  %v867_v5 = vld [vmem:[%s9302_s2 + $0x78] sm:$0xff] }
   0xc   : > { %7444 = vset.pattern.permute.xlu1 %v7642_v2  ;;  %7443 = vset.pattern.permute.xlu0 %v7642_v2  ;;  %v645_v3 = vld [vmem:[%s9301_s1 + $0xc] sm:$0xf]  ;;  %v643_v4 = vld [vmem:[%s9301_s1 + $0x4] sm:$0xf]  ;;  %v647_v6 = vld [vmem:[%s9301_s1 + $0x14] sm:$0xf] }
   0xd   : > { %681 = vperm.xlu1 %7444, %v644_v0   ;;  %661 = vperm.xlu0 %7443, %v642_v1   ;;  %v646_v7 = vld [vmem:[%s9301_s1 + $0x10] sm:$0xf]  ;;  %v649_v8 = vld [vmem:[%s9301_s1 + $0x1c] sm:$0xf]  ;;  %v648_v9 = vld [vmem:[%s9301_s1 + $0x18] sm:$0xf]  ;;  %v658_v1 = vlaneseq }
   0xe   : > { %6723 = vmatprep.subr.mxu0 %v867_v5  ;;  %v866_v10 = vld [vmem:[%s9302_s2 + $0x70] sm:$0xff]  ;;  %v865_v11 = vld [vmem:[%s9302_s2 + $0x68] sm:$0xff]  ;;  %v651_v12 = vld [vmem:[%s9301_s1 + $0x24] sm:$0xf]  ;;  %vm396_vm0 = vcmask 257024   ;;  %s7933_s23 = scalar_select %p352_p3, %s7698_s28, 1 }
   0xf   : > { %6724 = vmatpush3.msra.mxu0 %v867_v5  ;;  %v650_v13 = vld [vmem:[%s9301_s1 + $0x20] sm:$0xf]  ;;  %v653_v15 = vld [vmem:[%s9301_s1 + $0x2c] sm:$0xf]  ;;  %v652_v16 = vld [vmem:[%s9301_s1 + $0x28] sm:$0xf] }
  0x10   : > { %6725 = vmatprep.subr.mxu0 %v866_v10  ;;  %v864_v14 = vld [vmem:[%s9302_s2 + $0x60] sm:$0xff]  ;;  %v863_v17 = vld [vmem:[%s9302_s2 + $0x58] sm:$0xff]  ;;  %v862_v18 = vld [vmem:[%s9302_s2 + $0x50] sm:$0xff]  ;;  %v7643_v2 = vmov 839922192   ;;  %v667_v5 = vshrl.u32 %v658_v1, 7 }
  0x11   : > { %691 = vperm.xlu1 %7444, %v645_v3   ;;  %671 = vperm.xlu0 %7443, %v643_v4   ;;  %v655_v19 = vld [vmem:[%s9301_s1 + $0x34] sm:$0xf]  ;;  %v654_v20 = vld [vmem:[%s9301_s1 + $0x30] sm:$0xf]  ;;  %v861_v21 = vld [vmem:[%s9302_s2 + $0x48] sm:$0xff]  ;;  %v664_v3 = vunpack.c.l.s4 %v7643_v2  ;;  %s7428_s24 = smul.u32 144, %s7933_s23 }
  0x12   : > { %6726 = vmatpush3.msra.mxu0 %v866_v10  ;;  %v657_v22 = vld [vmem:[%s9301_s1 + $0x3c] sm:$0xf]  ;;  %v656_v23 = vld [vmem:[%s9301_s1 + $0x38] sm:$0xf]  ;;  %v860_v24 = vld [vmem:[%s9302_s2 + $0x40] sm:$0xff]  ;;  %vm462_vm9 = vcmask 1043456  }
  0x13   : > { %6727 = vmatprep.subr.mxu0 %v865_v11  ;;  %v859_v25 = vld [vmem:[%s9302_s2 + $0x38] sm:$0xff]  ;;  %v858_v26 = vld [vmem:[%s9302_s2 + $0x30] sm:$0xff]  ;;  %v857_v27 = vld [vmem:[%s9302_s2 + $0x28] sm:$0xff]  ;;  %v665_v4 = vunpack.c.0.s8 %v664_v3  ;;  %s7942_s29 = scalar_lea.vmem %s9304_s4, %s7428_s24  ;;  %s7427_s30 = smul.u32 96, %s7933_s23  ;;  %vm983_vm10 = vcmask 392192   ;;  %vm1137_vm11 = vcmask 261120  }
  0x14   : > { %6728 = vmatpush3.msra.mxu0 %v865_v11  ;;  %v856_v28 = vld [vmem:[%s9302_s2 + $0x20] sm:$0xff]  ;;  %v855_v29 = vld [vmem:[%s9302_s2 + $0x18] sm:$0xff]  ;;  %v854_v30 = vld [vmem:[%s9302_s2 + $0x10] sm:$0xff]  ;;  %v7912_v11 = vand.u32 127, %v658_v1  ;;  %vm7646_vm12 = vmmov 0   ;;  %s7429_s15 = smul.u32 3, %s7933_s23 }
  0x15   : > { %711 = vperm.xlu1 %7444, %v647_v6   ;;  %701 = vperm.xlu0 %7443, %v646_v7   ;;  %v853_v31 = vld [vmem:[%s9302_s2 + $0x8] sm:$0xff]  ;;  %v852_v32 = vld [vmem:[%s9302_s2] sm:$0xff]  ;;  %v7827_v40 = vld [vmem:[%s9300_s0 + $0x10] sm:$0xf]  ;;  %s8072_s11 = scalar_lea.vmem %s9303_s3, %s7427_s30  ;;  %s8200_s14 = scalar_lea.vmem %s9305_s5, %s7427_s30 }
  0x16   : > { %6729 = vmatprep.subr.mxu0 %v864_v14  ;;  %v7801_v33 = vld [vmem:[%s9300_s0] sm:$0xf]  ;;  %v7808_v35 = vld [vmem:[%s9300_s0 + $0x8] sm:$0xf]  ;;  %v7813_v36 = vld [vmem:[%s9300_s0 + $0x4] sm:$0xf]  ;;  %s8345_s18 = scalar_lea.vmem %s9306_s6, %s7429_s15  ;;  %s8400_s24 = scalar_lea.vmem %s9307_s7, %s7429_s15 }
  0x17   : > { %6730 = vmatpush3.msra.mxu0 %v864_v14  ;;  %v397_v34 = vsel %vm396_vm0, %v7801_v33, 0.0  ;;  %v403_v37 = vsel %vm396_vm0, %v7808_v35, 0.0  ;;  %v400_v38 = vsel %vm396_vm0, %v7813_v36, 0.0  ;;  %v7822_v39 = vld [vmem:[%s9300_s0 + $0xc] sm:$0xf]  ;;  %v409_v42 = vsel %vm396_vm0, %v7827_v40, 0.0 }
  0x18   : > { %6731 = vmatprep.subr.mxu0 %v863_v17  ;;  %v406_v41 = vsel %vm396_vm0, %v7822_v39, 0.0  ;;  %v7836_v43 = vld [vmem:[%s9300_s0 + $0x14] sm:$0xf]  ;;  %v7841_v44 = vld [vmem:[%s9300_s0 + $0x18] sm:$0xf]  ;;  %s6380_s26 = sshll.u32 %s7933_s23, 6 }
  0x19   : > { %731 = vperm.xlu1 %7444, %v649_v8   ;;  %721 = vperm.xlu0 %7443, %v648_v9   ;;  %v412_v45 = vsel %vm396_vm0, %v7836_v43, 0.0  ;;  %v415_v46 = vsel %vm396_vm0, %v7841_v44, 0.0  ;;  %v7850_v47 = vld [vmem:[%s9300_s0 + $0x1c] sm:$0xf]  ;;  %v7855_v48 = vld [vmem:[%s9300_s0 + $0x20] sm:$0xf]  ;;  %v7910_v8 = vsub.s32 %v665_v4, %v667_v5  ;;  %s8429_s9 = scalar_lea.vmem %s9308_s8, %s6380_s26 }
  0x1a   : > { %6732 = vmatpush3.msra.mxu0 %v863_v17  ;;  %v418_v49 = vsel %vm396_vm0, %v7850_v47, 0.0  ;;  %v421_v50 = vsel %vm396_vm0, %v7855_v48, 0.0  ;;  %v7864_v51 = vld [vmem:[%s9300_s0 + $0x24] sm:$0xf]  ;;  %v7869_v52 = vld [vmem:[%s9300_s0 + $0x28] sm:$0xf] }
  0x1b   : > { %6733 = vmatprep.subr.mxu0 %v862_v18  ;;  %v424_v53 = vsel %vm396_vm0, %v7864_v51, 0.0  ;;  %v427_v54 = vsel %vm396_vm0, %v7869_v52, 0.0  ;;  %v7878_v55 = vld [vmem:[%s9300_s0 + $0x2c] sm:$0xf]  ;;  %v7883_v56 = vld [vmem:[%s9300_s0 + $0x30] sm:$0xf] }
  0x1c   : > { %6734 = vmatpush3.msra.mxu0 %v862_v18  ;;  %v430_v57 = vsel %vm396_vm0, %v7878_v55, 0.0  ;;  %v433_v58 = vsel %vm396_vm0, %v7883_v56, 0.0  ;;  %v7892_v59 = vld [vmem:[%s9300_s0 + $0x34] sm:$0xf]  ;;  %v7897_v60 = vld [vmem:[%s9300_s0 + $0x38] sm:$0xf] }
  0x1d   : > { %751 = vperm.xlu1 %7444, %v651_v12   ;;  %741 = vperm.xlu0 %7443, %v650_v13   ;;  %v436_v61 = vsel %vm396_vm0, %v7892_v59, 0.0  ;;  %v439_v62 = vsel %vm396_vm0, %v7897_v60, 0.0  ;;  %v7906_v63 = vld [vmem:[%s9300_s0 + $0x3c] sm:$0xf]  ;;  %v979_v3 = vld [vmem:[%s7942_s29 + $0x10] sm:$0xff] }
  0x1e   : > { %6735 = vmatprep.subr.mxu0 %v861_v21  ;;  %v442_v0 = vsel %vm396_vm0, %v7906_v63, 0.0  ;;  %s8388_s19 = scalar_select %p1891_p4, 15, 0 }
  0x1f   : > { %6736 = vmatpush3.msra.mxu0 %v861_v21  ;;  %s8476_s23 = scalar_select %p1891_p4, 14, 1 }
  0x20   : > { %6737 = vmatprep.subr.mxu0 %v860_v24  ;;  %s6221_s20 = sshll.u32 %s8388_s19, 2 }
  0x21   : > { %771 = vperm.xlu1 %7444, %v653_v15   ;;  %761 = vperm.xlu0 %7443, %v652_v16   ;;  %s2125_s25 = scalar_lea.vmem [#allocation2], %s6221_s20  ;;  %s2154_s10 = scalar_lea.vmem %s8429_s9, %s6221_s20 }
  0x22   : > { %6738 = vmatpush3.msra.mxu0 %v860_v24  ;;  %s8530_s15 = scalar_select %p1891_p4, 13, 2 }
  0x23   : > { %6739 = vmatprep.subr.mxu0 %v859_v25  ;;  %s8584_s19 = scalar_select %p1891_p4, 12, 3 }
  0x24   : > { %6740 = vmatpush3.msra.mxu0 %v859_v25  ;;  %s6241_s16 = sshll.u32 %s8530_s15, 2 }
  0x25   : > { %791 = vperm.xlu1 %7444, %v655_v19   ;;  %781 = vperm.xlu0 %7443, %v654_v20   ;;  %s2617_s17 = scalar_lea.vmem [#allocation2], %s6241_s16  ;;  %s6251_s20 = sshll.u32 %s8584_s19, 2 }
  0x26   : > { %6741 = vmatprep.subr.mxu0 %v858_v26  ;;  %s2863_s21 = scalar_lea.vmem [#allocation2], %s6251_s20  ;;  %s2892_s22 = scalar_lea.vmem %s8429_s9, %s6251_s20 }
  0x27   : > { %6742 = vmatpush3.msra.mxu0 %v858_v26 }
  0x28   : > { %6743 = vmatprep.subr.mxu0 %v857_v27 }
  0x29   : > { %811 = vperm.xlu1 %7444, %v657_v22   ;;  %801 = vperm.xlu0 %7443, %v656_v23   ;;  %v7644_v22 = vmov 1.0  }
  0x2a   : > { %6744 = vmatpush3.msra.mxu0 %v857_v27 }
  0x2b   : > { %6745 = vmatprep.subr.mxu0 %v856_v28 }
  0x2c   : > { %6746 = vmatpush3.msra.mxu0 %v856_v28 }
  0x2d   : > { %6747 = vmatprep.subr.mxu0 %v855_v29 }
  0x2e   : > { %6748 = vmatpush3.msra.mxu0 %v855_v29 }
  0x2f   : > { %6749 = vmatprep.subr.mxu0 %v854_v30 }
  0x30   : > { %6750 = vmatpush3.msra.mxu0 %v854_v30 }
  0x31   : > { %6751 = vmatprep.subr.mxu0 %v853_v31 }
  0x32   : > { %6752 = vmatpush3.msra.mxu0 %v853_v31 }
  0x33   : > { %6753 = vmatprep.subr.mxu0 %v852_v32 }
  0x34   : > { %6754 = vmatpush3.msra.mxu0 %v852_v32 }
  0x48   : > { %398 = vadd.xlane.f32.xlu0 %v397_v34 }
  0x4c   : > { %404 = vadd.xlane.f32.xlu0 %v403_v37 }
  0x4d   : > { %401 = vadd.xlane.f32.xlu1 %v400_v38 }
  0x50   : > { %407 = vadd.xlane.f32.xlu0 %v406_v41 }
  0x51   : > { %410 = vadd.xlane.f32.xlu1 %v409_v42 }
  0x54   : > { %413 = vadd.xlane.f32.xlu0 %v412_v45 }
  0x55   : > { %416 = vadd.xlane.f32.xlu1 %v415_v46 }
  0x58   : > { %419 = vadd.xlane.f32.xlu0 %v418_v49 }
  0x59   : > { %422 = vadd.xlane.f32.xlu1 %v421_v50 }
  0x5c   : > { %425 = vadd.xlane.f32.xlu0 %v424_v53 }
  0x5d   : > { %428 = vadd.xlane.f32.xlu1 %v427_v54  ;;  %v982_v54 = vld [vmem:[%s7942_s29 + $0x28] sm:$0xff] }
  0x5e   : > { %6767 = vmatprep.subr.mxu1 %v982_v54 }
  0x5f   : > { %6768 = vmatpush3.msra.mxu1 %v982_v54 }
  0x60   : > { %431 = vadd.xlane.f32.xlu0 %v430_v57  ;;  %v981_v57 = vld [vmem:[%s7942_s29 + $0x20] sm:$0xff] }
  0x61   : > { %434 = vadd.xlane.f32.xlu1 %v433_v58  ;;  %6769 = vmatprep.subr.mxu1 %v981_v57 }
  0x62   : > { %6770 = vmatpush3.msra.mxu1 %v981_v57 }
  0x64   : > { %437 = vadd.xlane.f32.xlu0 %v436_v61 }
  0x65   : > { %440 = vadd.xlane.f32.xlu1 %v439_v62 }
  0x68   : > { %443 = vadd.xlane.f32.xlu0 %v442_v0  ;;  %v980_v0 = vld [vmem:[%s7942_s29 + $0x18] sm:$0xff] }
  0x69   : > { %6771 = vmatprep.subr.mxu1 %v980_v0 }
  0x6a   : > { %6772 = vmatpush3.msra.mxu1 %v980_v0 }
  0x6b   : > { %6773 = vmatprep.subr.mxu1 %v979_v3 }
  0x6c   : > { %6774 = vmatpush3.msra.mxu1 %v979_v3 }
  0x88   : > { %v682_v6 = vpop.permute.xlu1 %681  ;;  %v662_v7 = vpop.permute.xlu0 %661 }
  0x89   : > { %v689_v12 = vrot.slane %v682_v6, %v7910_v8  ;;  %v669_v13 = vrot.slane %v662_v7, %v7910_v8  ;;  %v978_v6 = vld [vmem:[%s7942_s29 + $0x8] sm:$0xff] }
  0x8a   : > { %6775 = vmatprep.subr.mxu1 %v978_v6 }
  0x8b   : > { %6776 = vmatpush3.msra.mxu1 %v978_v6 }
  0x8c   : > { %v692_v9 = vpop.permute.xlu1 %691  ;;  %v672_v10 = vpop.permute.xlu0 %671 }
  0x8d   : > { %v699_v14 = vrot.slane %v692_v9, %v7910_v8  ;;  %v679_v15 = vrot.slane %v672_v10, %v7910_v8  ;;  %v977_v9 = vld [vmem:[%s7942_s29] sm:$0xff] }
  0x8e   : > { %6777 = vmatprep.subr.mxu1 %v977_v9 }
  0x8f   : > { %v821_v16 = vcombine.low %v689_v12, %v699_v14  ;;  %v820_v17 = vcombine.low %v669_v13, %v679_v15  ;;  %6778 = vmatpush3.msra.mxu1 %v977_v9 }
  0x90   : > { %v712_v18 = vpop.permute.xlu1 %711  ;;  %v702_v19 = vpop.permute.xlu0 %701 }
  0x91   : > { %v719_v20 = vrot.slane %v712_v18, %v7910_v8  ;;  %v709_v21 = vrot.slane %v702_v19, %v7910_v8  ;;  %vm828_vm1 = vcmp.eq.s32.totalorder %v7912_v11, %v820_v17  ;;  %vm829_vm2 = vcmp.eq.s32.totalorder %v7912_v11, %v821_v16 }
  0x92   : > { %6755 = vmatprep.mubr.msk.f32.mxu0 %vm828_vm1, %v7644_v22 }
  0x93   : > { %v822_v23 = vcombine.low %v709_v21, %v719_v20  ;;  %6756 = vmatmul.mubr.msk.f32.vlgmr.msra.gmra.mxu0 %vm829_vm2, %v7644_v22 }
  0x94   : > { %v732_v24 = vpop.permute.xlu1 %731  ;;  %v722_v25 = vpop.permute.xlu0 %721 }
  0x95   : > { %v739_v26 = vrot.slane %v732_v24, %v7910_v8  ;;  %v729_v27 = vrot.slane %v722_v25, %v7910_v8  ;;  %vm830_vm3 = vcmp.eq.s32.totalorder %v7912_v11, %v822_v23 }
  0x96   : > { %6758 = vmatprep.mubr.msk.f32.mxu0 %vm830_vm3, %v7644_v22 }
  0x97   : > { %v823_v28 = vcombine.low %v729_v27, %v739_v26 }
  0x98   : > { %v752_v29 = vpop.permute.xlu1 %751  ;;  %v742_v30 = vpop.permute.xlu0 %741 }
  0x99   : > { %v759_v31 = vrot.slane %v752_v29, %v7910_v8  ;;  %v749_v32 = vrot.slane %v742_v30, %v7910_v8  ;;  %vm831_vm4 = vcmp.eq.s32.totalorder %v7912_v11, %v823_v28 }
  0x9a   : > { %6759 = vmatmul.mubr.msk.f32.gmra.mxu0 %vm831_vm4, %v7644_v22 }
  0x9b   : > { %v824_v34 = vcombine.low %v749_v32, %v759_v31 }
  0x9c   : > { %v772_v37 = vpop.permute.xlu1 %771  ;;  %v762_v38 = vpop.permute.xlu0 %761 }
  0x9d   : > { %v779_v41 = vrot.slane %v772_v37, %v7910_v8  ;;  %v769_v42 = vrot.slane %v762_v38, %v7910_v8  ;;  %vm832_vm5 = vcmp.eq.s32.totalorder %v7912_v11, %v824_v34 }
  0x9e   : > { %6761 = vmatprep.mubr.msk.f32.mxu0 %vm832_vm5, %v7644_v22 }
  0x9f   : > { %v825_v45 = vcombine.low %v769_v42, %v779_v41 }
  0xa0   : > { %v792_v46 = vpop.permute.xlu1 %791  ;;  %v782_v49 = vpop.permute.xlu0 %781 }
  0xa1   : > { %v799_v50 = vrot.slane %v792_v46, %v7910_v8  ;;  %v789_v53 = vrot.slane %v782_v49, %v7910_v8  ;;  %vm833_vm6 = vcmp.eq.s32.totalorder %v7912_v11, %v825_v45 }
  0xa2   : > { %6762 = vmatmul.mubr.msk.f32.gmra.mxu0 %vm833_vm6, %v7644_v22 }
  0xa3   : > { %v826_v58 = vcombine.low %v789_v53, %v799_v50 }
  0xa4   : > { %v812_v61 = vpop.permute.xlu1 %811  ;;  %v802_v62 = vpop.permute.xlu0 %801 }
  0xa5   : > { %v819_v1 = vrot.slane %v812_v61, %v7910_v8  ;;  %v809_v2 = vrot.slane %v802_v62, %v7910_v8  ;;  %vm834_vm7 = vcmp.eq.s32.totalorder %v7912_v11, %v826_v58 }
  0xa6   : > { %6764 = vmatprep.mubr.msk.f32.mxu0 %vm834_vm7, %v7644_v22 }
  0xa7   : > { %v827_v4 = vcombine.low %v809_v2, %v819_v1 }
  0xa9   : > { %vm835_vm8 = vcmp.eq.s32.totalorder %v7912_v11, %v827_v4 }
  0xaa   : > { %6765 = vmatmul.mubr.msk.f32.gmra.mxu0 %vm835_vm8, %v7644_v22 }
  0xd1   : > { %v399_v5 = vpop.xlane.xlu0 %398 }
  0xd2   : > { %v446_v7 = vmul.f32 0.03125, %v399_v5 }
  0xd4   : > { %v463_v14 = vsel %vm462_vm9, %v446_v7, 0.0 }
  0xd5   : > { %v405_v8 = vpop.xlane.xlu0 %404 }
  0xd6   : > { %v402_v10 = vpop.xlane.xlu1 %401  ;;  %v448_v13 = vmul.f32 0.03125, %v405_v8 }
  0xd7   : > { %v447_v12 = vmul.f32 0.03125, %v402_v10 }
  0xd8   : > { %v466_v19 = vsel %vm462_vm9, %v448_v13, 0.0 }
  0xd9   : > { %v464_v11 = vsel %vm462_vm9, %v447_v12, 0.0  ;;  %v408_v15 = vpop.xlane.xlu0 %407 }
  0xda   : > { %v465_v16 = vadd.f32 %v464_v11, %v463_v14  ;;  %v449_v17 = vmul.f32 0.03125, %v408_v15  ;;  %v411_v18 = vpop.xlane.xlu1 %410 }
  0xdb   : > { %v450_v20 = vmul.f32 0.03125, %v411_v18 }
  0xdc   : > { %v467_v21 = vadd.f32 %v466_v19, %v465_v16  ;;  %v468_v22 = vsel %vm462_vm9, %v449_v17, 0.0 }
  0xdd   : > { %v470_v23 = vsel %vm462_vm9, %v450_v20, 0.0  ;;  %v414_v24 = vpop.xlane.xlu0 %413 }
  0xde   : > { %v469_v25 = vadd.f32 %v468_v22, %v467_v21  ;;  %v451_v26 = vmul.f32 0.03125, %v414_v24  ;;  %v417_v27 = vpop.xlane.xlu1 %416 }
  0xdf   : > { %v452_v28 = vmul.f32 0.03125, %v417_v27 }
  0xe0   : > { %v471_v29 = vadd.f32 %v470_v23, %v469_v25  ;;  %v472_v30 = vsel %vm462_vm9, %v451_v26, 0.0 }
  0xe1   : > { %v474_v31 = vsel %vm462_vm9, %v452_v28, 0.0  ;;  %v420_v32 = vpop.xlane.xlu0 %419 }
  0xe2   : > { %v473_v34 = vadd.f32 %v472_v30, %v471_v29  ;;  %v453_v37 = vmul.f32 0.03125, %v420_v32  ;;  %v423_v38 = vpop.xlane.xlu1 %422 }
  0xe3   : > { %v454_v41 = vmul.f32 0.03125, %v423_v38 }
  0xe4   : > { %v475_v42 = vadd.f32 %v474_v31, %v473_v34  ;;  %v476_v45 = vsel %vm462_vm9, %v453_v37, 0.0 }
  0xe5   : > { %v478_v46 = vsel %vm462_vm9, %v454_v41, 0.0  ;;  %v426_v49 = vpop.xlane.xlu0 %425 }
  0xe6   : > { %v477_v50 = vadd.f32 %v476_v45, %v475_v42  ;;  %v455_v53 = vmul.f32 0.03125, %v426_v49  ;;  %v429_v54 = vpop.xlane.xlu1 %428 }
  0xe7   : > { %v456_v57 = vmul.f32 0.03125, %v429_v54 }
  0xe8   : > { %v479_v58 = vadd.f32 %v478_v46, %v477_v50  ;;  %v480_v61 = vsel %vm462_vm9, %v455_v53, 0.0 }
  0xe9   : > { %v482_v62 = vsel %vm462_vm9, %v456_v57, 0.0  ;;  %v432_v0 = vpop.xlane.xlu0 %431 }
  0xea   : > { %v481_v1 = vadd.f32 %v480_v61, %v479_v58  ;;  %v457_v2 = vmul.f32 0.03125, %v432_v0  ;;  %v435_v3 = vpop.xlane.xlu1 %434 }
  0xeb   : > { %v458_v4 = vmul.f32 0.03125, %v435_v3 }
  0xec   : > { %v483_v5 = vadd.f32 %v482_v62, %v481_v1  ;;  %v484_v6 = vsel %vm462_vm9, %v457_v2, 0.0 }
  0xed   : > { %v486_v7 = vsel %vm462_vm9, %v458_v4, 0.0  ;;  %v438_v8 = vpop.xlane.xlu0 %437 }
  0xee   : > { %v485_v9 = vadd.f32 %v484_v6, %v483_v5  ;;  %v459_v10 = vmul.f32 0.03125, %v438_v8  ;;  %v441_v12 = vpop.xlane.xlu1 %440  ;;  %v6155_v8 = vld [vmem:[%s8072_s11 + $0x38] sm:$0xff] }
  0xef   : > { %v460_v13 = vmul.f32 0.03125, %v441_v12  ;;  %6835 = vmatprep.subr.mxu0 %v6155_v8  ;;  %v6152_v12 = vld [vmem:[%s8072_s11 + $0x20] sm:$0xff] }
  0xf0   : > { %v487_v14 = vadd.f32 %v486_v7, %v485_v9  ;;  %v488_v11 = vsel %vm462_vm9, %v459_v10, 0.0  ;;  %v976_v7 = vld [vmem:[%s8072_s11 + $0x18] sm:$0xff]  ;;  %v6154_v9 = vld [vmem:[%s8072_s11 + $0x30] sm:$0xff]  ;;  %6836 = vmatpush3.msra.mxu0 %v6155_v8  ;;  %v6153_v10 = vld [vmem:[%s8072_s11 + $0x28] sm:$0xff] }
  0xf1   : > { %v490_v15 = vsel %vm462_vm9, %v460_v13, 0.0  ;;  %v444_v16 = vpop.xlane.xlu0 %443  ;;  %6791 = vmatprep.subr.mxu1 %v976_v7  ;;  %6837 = vmatprep.subr.mxu0 %v6154_v9  ;;  %v8080_v13 = vld [vmem:[%s8072_s11 + $0x58] sm:$0xff] }
  0xf2   : > { %v489_v17 = vadd.f32 %v488_v11, %v487_v14  ;;  %v461_v18 = vmul.f32 0.03125, %v444_v16  ;;  %6838 = vmatpush3.msra.mxu0 %v6154_v9  ;;  %v974_v16 = vld [vmem:[%s8072_s11 + $0x8] sm:$0xff] }
  0xf3   : > { %6839 = vmatprep.subr.mxu0 %v6153_v10 }
  0xf4   : > { %v491_v19 = vadd.f32 %v490_v15, %v489_v17  ;;  %v492_v20 = vsel %vm462_vm9, %v461_v18, 0.0  ;;  %6840 = vmatpush3.msra.mxu0 %v6153_v10  ;;  %v975_v15 = vld [vmem:[%s8072_s11 + $0x10] sm:$0xff]  ;;  %v973_v18 = vld [vmem:[%s8072_s11] sm:$0xff] }
  0xf5   : > { %6841 = vmatprep.subr.mxu0 %v6152_v12 }
  0xf6   : > { %v493_v21 = vadd.f32 %v492_v20, %v491_v19  ;;  %6842 = vmatpush3.msra.mxu0 %v6152_v12  ;;  %v8101_v20 = vld [vmem:[%s7942_s29 + $0x58] sm:$0xff] }
  0xf7   : > { %6879 = vmatprep.subr.mxu0 %v8080_v13 }
  0xf8   : > { %v495_v22 = vmul.f32 0.0625, %v493_v21 }
  0xfa   : > { %v7971_v23 = vsub.f32 %v7813_v36, %v495_v22  ;;  %v7974_v24 = vsub.f32 %v7801_v33, %v495_v22  ;;  %v7977_v25 = vsub.f32 %v7822_v39, %v495_v22  ;;  %v7980_v26 = vsub.f32 %v7808_v35, %v495_v22 }
  0xfb   : > { %v7987_v29 = vsub.f32 %v7836_v43, %v495_v22  ;;  %v7990_v36 = vsub.f32 %v7827_v40, %v495_v22  ;;  %v7999_v31 = vsub.f32 %v7850_v47, %v495_v22  ;;  %v8002_v43 = vsub.f32 %v7841_v44, %v495_v22 }
  0xfc   : > { %v513_v27 = vmul.f32 %v7971_v23, %v7971_v23  ;;  %v512_v28 = vmul.f32 %v7974_v24, %v7974_v24  ;;  %v515_v35 = vmul.f32 %v7977_v25, %v7977_v25  ;;  %v514_v30 = vmul.f32 %v7980_v26, %v7980_v26 }
  0xfd   : > { %v517_v34 = vmul.f32 %v7987_v29, %v7987_v29  ;;  %v516_v37 = vmul.f32 %v7990_v36, %v7990_v36  ;;  %v519_v38 = vmul.f32 %v7999_v31, %v7999_v31  ;;  %v518_v47 = vmul.f32 %v8002_v43, %v8002_v43 }
  0xfe   : > { %v531_v33 = vsel %vm396_vm0, %v513_v27, 0.0  ;;  %v528_v39 = vsel %vm396_vm0, %v512_v28, 0.0  ;;  %v537_v40 = vsel %vm396_vm0, %v515_v35, 0.0  ;;  %v534_v32 = vsel %vm396_vm0, %v514_v30, 0.0 }
  0xff   : > { %532 = vadd.xlane.f32.xlu0 %v531_v33  ;;  %529 = vadd.xlane.f32.xlu1 %v528_v39  ;;  %v543_v44 = vsel %vm396_vm0, %v517_v34, 0.0  ;;  %v540_v41 = vsel %vm396_vm0, %v516_v37, 0.0  ;;  %v8017_v42 = vsub.f32 %v7864_v51, %v495_v22  ;;  %v8020_v45 = vsub.f32 %v7855_v48, %v495_v22 }
 0x100   : > { %v549_v46 = vsel %vm396_vm0, %v519_v38, 0.0  ;;  %v546_v49 = vsel %vm396_vm0, %v518_v47, 0.0  ;;  %v8029_v54 = vsub.f32 %v7878_v55, %v495_v22  ;;  %v8032_v51 = vsub.f32 %v7869_v52, %v495_v22 }
 0x101   : > { %v521_v50 = vmul.f32 %v8017_v42, %v8017_v42  ;;  %v520_v53 = vmul.f32 %v8020_v45, %v8020_v45  ;;  %v8035_v48 = vsub.f32 %v7892_v59, %v495_v22  ;;  %v8038_v57 = vsub.f32 %v7883_v56, %v495_v22 }
 0x102   : > { %v523_v62 = vmul.f32 %v8029_v54, %v8029_v54  ;;  %v522_v55 = vmul.f32 %v8032_v51, %v8032_v51  ;;  %v8047_v52 = vsub.f32 %v7906_v63, %v495_v22  ;;  %v8050_v59 = vsub.f32 %v7897_v60, %v495_v22 }
 0x103   : > { %538 = vadd.xlane.f32.xlu0 %v537_v40  ;;  %535 = vadd.xlane.f32.xlu1 %v534_v32  ;;  %v555_v58 = vsel %vm396_vm0, %v521_v50, 0.0  ;;  %v552_v61 = vsel %vm396_vm0, %v520_v53, 0.0  ;;  %v525_v1 = vmul.f32 %v8035_v48, %v8035_v48  ;;  %v524_v2 = vmul.f32 %v8038_v57, %v8038_v57 }
 0x104   : > { %v561_v56 = vsel %vm396_vm0, %v523_v62, 0.0  ;;  %v558_v0 = vsel %vm396_vm0, %v522_v55, 0.0  ;;  %v527_v60 = vmul.f32 %v8047_v52, %v8047_v52  ;;  %v526_v4 = vmul.f32 %v8050_v59, %v8050_v59 }
 0x105   : > { %v567_v63 = vsel %vm396_vm0, %v525_v1, 0.0  ;;  %v564_v3 = vsel %vm396_vm0, %v524_v2, 0.0 }
 0x106   : > { %v573_v5 = vsel %vm396_vm0, %v527_v60, 0.0  ;;  %v570_v6 = vsel %vm396_vm0, %v526_v4, 0.0 }
 0x107   : > { %544 = vadd.xlane.f32.xlu0 %v543_v44  ;;  %541 = vadd.xlane.f32.xlu1 %v540_v41 }
 0x10b   : > { %550 = vadd.xlane.f32.xlu0 %v549_v46  ;;  %547 = vadd.xlane.f32.xlu1 %v546_v49 }
 0x10f   : > { %556 = vadd.xlane.f32.xlu0 %v555_v58  ;;  %553 = vadd.xlane.f32.xlu1 %v552_v61 }
 0x113   : > { %562 = vadd.xlane.f32.xlu0 %v561_v56  ;;  %559 = vadd.xlane.f32.xlu1 %v558_v0 }
 0x117   : > { %568 = vadd.xlane.f32.xlu0 %v567_v63  ;;  %565 = vadd.xlane.f32.xlu1 %v564_v3 }
 0x11b   : > { %574 = vadd.xlane.f32.xlu0 %v573_v5  ;;  %571 = vadd.xlane.f32.xlu1 %v570_v6 }
 0x153   : > { %v8083_v14 = vpop.f32.mrf.mxu0 }
 0x155   : > { %v8085_v11 = vpop.f32.mrf.mxu0 }
 0x156   : > { %6779 = vmatprep.mubr.msk.f32.mxu1 %vm983_vm10, %v8085_v11 }
 0x157   : > { %6780 = vmatmul.mubr.msk.f32.vlgmr.msra.gmra.mxu1 %vm983_vm10, %v8083_v14 }
 0x158   : > { %6792 = vmatpush3.msra.mxu1 %v976_v7 }
 0x159   : > { %6793 = vmatprep.subr.mxu1 %v975_v15 }
 0x15a   : > { %v8093_v17 = vpop.f32.mrf.mxu0  ;;  %6794 = vmatpush3.msra.mxu1 %v975_v15 }
 0x15b   : > { %6795 = vmatprep.subr.mxu1 %v974_v16 }
 0x15c   : > { %v8096_v19 = vpop.f32.mrf.mxu0  ;;  %6796 = vmatpush3.msra.mxu1 %v974_v16 }
 0x15d   : > { %6782 = vmatprep.mubr.msk.f32.mxu1 %vm983_vm10, %v8096_v19  ;;  %6797 = vmatprep.subr.mxu1 %v973_v18 }
 0x15e   : > { %6783 = vmatmul.mubr.msk.f32.gmra.mxu1 %vm983_vm10, %v8093_v17 }
 0x15f   : > { %6798 = vmatpush3.msra.mxu1 %v973_v18 }
 0x160   : > { %6811 = vmatprep.subr.mxu1 %v8101_v20 }
 0x162   : > { %v8106_v21 = vpop.f32.mrf.mxu0 }
 0x164   : > { %v8108_v22 = vpop.f32.mrf.mxu0 }
 0x165   : > { %6785 = vmatprep.mubr.msk.f32.mxu1 %vm983_vm10, %v8108_v22 }
 0x166   : > { %6786 = vmatmul.mubr.msk.f32.gmra.mxu1 %vm983_vm10, %v8106_v21 }
 0x16a   : > { %v8114_v27 = vpop.f32.mrf.mxu0 }
 0x16c   : > { %v8116_v28 = vpop.f32.mrf.mxu0 }
 0x16d   : > { %6788 = vmatprep.mubr.msk.f32.mxu1 %vm983_vm10, %v8116_v28 }
 0x16e   : > { %6789 = vmatmul.mubr.msk.f32.gmra.mxu1 %vm983_vm10, %v8114_v27 }
 0x188   : > { %v533_v33 = vpop.xlane.xlu0 %532  ;;  %v530_v39 = vpop.xlane.xlu1 %529 }
 0x189   : > { %v577_v35 = vmul.f32 0.03125, %v533_v33  ;;  %v576_v30 = vmul.f32 0.03125, %v530_v39 }
 0x18b   : > { %v593_v40 = vsel %vm462_vm9, %v577_v35, 0.0  ;;  %v592_v32 = vsel %vm462_vm9, %v576_v30, 0.0 }
 0x18c   : > { %v539_v34 = vpop.xlane.xlu0 %538  ;;  %v536_v37 = vpop.xlane.xlu1 %535  ;;  %v594_v44 = vadd.f32 %v593_v40, %v592_v32 }
 0x18d   : > { %v579_v38 = vmul.f32 0.03125, %v539_v34  ;;  %v578_v47 = vmul.f32 0.03125, %v536_v37 }
 0x18f   : > { %v595_v41 = vsel %vm462_vm9, %v578_v47, 0.0  ;;  %v597_v53 = vsel %vm462_vm9, %v579_v38, 0.0 }
 0x190   : > { %v596_v46 = vadd.f32 %v595_v41, %v594_v44  ;;  %v545_v49 = vpop.xlane.xlu0 %544  ;;  %v542_v50 = vpop.xlane.xlu1 %541 }
 0x191   : > { %v581_v58 = vmul.f32 0.03125, %v545_v49  ;;  %v580_v61 = vmul.f32 0.03125, %v542_v50 }
 0x192   : > { %v598_v62 = vadd.f32 %v597_v53, %v596_v46 }
 0x193   : > { %v599_v55 = vsel %vm462_vm9, %v580_v61, 0.0  ;;  %v601_v2 = vsel %vm462_vm9, %v581_v58, 0.0 }
 0x194   : > { %v600_v56 = vadd.f32 %v599_v55, %v598_v62  ;;  %v551_v0 = vpop.xlane.xlu0 %550  ;;  %v548_v1 = vpop.xlane.xlu1 %547 }
 0x195   : > { %v583_v63 = vmul.f32 0.03125, %v551_v0  ;;  %v582_v3 = vmul.f32 0.03125, %v548_v1 }
 0x196   : > { %v602_v60 = vadd.f32 %v601_v2, %v600_v56 }
 0x197   : > { %v603_v4 = vsel %vm462_vm9, %v582_v3, 0.0  ;;  %v605_v8 = vsel %vm462_vm9, %v583_v63, 0.0 }
 0x198   : > { %v604_v5 = vadd.f32 %v603_v4, %v602_v60  ;;  %v557_v6 = vpop.xlane.xlu0 %556  ;;  %v554_v7 = vpop.xlane.xlu1 %553 }
 0x199   : > { %v585_v9 = vmul.f32 0.03125, %v557_v6  ;;  %v584_v10 = vmul.f32 0.03125, %v554_v7 }
 0x19a   : > { %v606_v12 = vadd.f32 %v605_v8, %v604_v5 }
 0x19b   : > { %v607_v15 = vsel %vm462_vm9, %v584_v10, 0.0  ;;  %v609_v39 = vsel %vm462_vm9, %v585_v9, 0.0 }
 0x19c   : > { %v608_v16 = vadd.f32 %v607_v15, %v606_v12  ;;  %v563_v18 = vpop.xlane.xlu0 %562  ;;  %v560_v33 = vpop.xlane.xlu1 %559 }
 0x19d   : > { %v587_v35 = vmul.f32 0.03125, %v563_v18  ;;  %v586_v30 = vmul.f32 0.03125, %v560_v33  ;;  %v6158_v33 = vld [vmem:[%s7942_s29 + $0x40] sm:$0xff] }
 0x19e   : > { %v610_v40 = vadd.f32 %v609_v39, %v608_v16  ;;  %v6182_v39 = vld [vmem:[%s8072_s11 + $0x50] sm:$0xff] }
 0x19f   : > { %v611_v32 = vsel %vm462_vm9, %v586_v30, 0.0  ;;  %v613_v47 = vsel %vm462_vm9, %v587_v35, 0.0  ;;  %v6181_v35 = vld [vmem:[%s8072_s11 + $0x48] sm:$0xff]  ;;  %v6180_v30 = vld [vmem:[%s8072_s11 + $0x40] sm:$0xff]  ;;  %s6231_s11 = sshll.u32 %s8476_s23, 2 }
 0x1a0   : > { %v612_v34 = vadd.f32 %v611_v32, %v610_v40  ;;  %v569_v37 = vpop.xlane.xlu0 %568  ;;  %v566_v38 = vpop.xlane.xlu1 %565  ;;  %v6189_v40 = vld [vmem:[%s7942_s29 + $0x88] sm:$0xff]  ;;  %v6188_v32 = vld [vmem:[%s7942_s29 + $0x80] sm:$0xff]  ;;  %s2371_s12 = scalar_lea.vmem [#allocation2], %s6231_s11  ;;  %s2400_s13 = scalar_lea.vmem %s8429_s9, %s6231_s11 }
 0x1a1   : > { %v589_v44 = vmul.f32 0.03125, %v569_v37  ;;  %v588_v41 = vmul.f32 0.03125, %v566_v38  ;;  %v6187_v37 = vld [vmem:[%s7942_s29 + $0x78] sm:$0xff]  ;;  %v7645_v38 = vmov 0.0  }
 0x1a2   : > { %v614_v46 = vadd.f32 %v613_v47, %v612_v34  ;;  %v8209_v34 = vld [vmem:[%s8200_s14 + $0x38] sm:$0xff]  ;;  %v6186_v47 = vld [vmem:[%s7942_s29 + $0x70] sm:$0xff] }
 0x1a3   : > { %v615_v49 = vsel %vm462_vm9, %v588_v41, 0.0  ;;  %v617_v61 = vsel %vm462_vm9, %v589_v44, 0.0  ;;  %v6185_v44 = vld [vmem:[%s7942_s29 + $0x68] sm:$0xff]  ;;  %v8232_v41 = vld [vmem:[%s8200_s14 + $0x30] sm:$0xff] }
 0x1a4   : > { %v616_v50 = vadd.f32 %v615_v49, %v614_v46  ;;  %v575_v53 = vpop.xlane.xlu0 %574  ;;  %v572_v58 = vpop.xlane.xlu1 %571  ;;  %v6184_v46 = vld [vmem:[%s7942_s29 + $0x60] sm:$0xff]  ;;  %v8243_v49 = vld [vmem:[%s8200_s14 + $0x28] sm:$0xff] }
 0x1a5   : > { %v591_v62 = vmul.f32 0.03125, %v575_v53  ;;  %v590_v55 = vmul.f32 0.03125, %v572_v58  ;;  %v8254_v53 = vld [vmem:[%s8200_s14 + $0x20] sm:$0xff]  ;;  %v8259_v58 = vld [vmem:[%s8200_s14 + $0x10] sm:$0xff] }
 0x1a6   : > { %v618_v56 = vadd.f32 %v617_v61, %v616_v50  ;;  %v8248_v50 = vld [vmem:[%s8200_s14 + $0x18] sm:$0xff] }
 0x1a7   : > { %v619_v0 = vsel %vm462_vm9, %v590_v55, 0.0  ;;  %v621_v2 = vsel %vm462_vm9, %v591_v62, 0.0 }
 0x1a8   : > { %v620_v1 = vadd.f32 %v619_v0, %v618_v56 }
 0x1aa   : > { %v622_v63 = vadd.f32 %v621_v2, %v620_v1 }
 0x1ac   : > { %v623_v3 = vmul.f32 0.0625, %v622_v63  ;;  %v6151_v63 = vld [vmem:[%s8345_s18] ss:$0 sm:$0xff] }
 0x1ae   : > { %v624_v60 = vadd.f32 1e-05, %v623_v3 }
 0x1b0   : > { %7445 = vrsqrt.f32 %v624_v60 }
 0x1bd   : > { %v7446_v4 = vpop.eup %7445 }
 0x1be   : > { %v626_v5 = vmul.f32 %v7446_v4, %v7974_v24  ;;  %v627_v6 = vmul.f32 %v7446_v4, %v7971_v23  ;;  %v628_v7 = vmul.f32 %v7446_v4, %v7980_v26  ;;  %v629_v8 = vmul.f32 %v7446_v4, %v7977_v25  ;;  %v6160_v24 = vld [vmem:[%s7942_s29 + $0x50] sm:$0xff] }
 0x1bf   : > { %v630_v9 = vmul.f32 %v7446_v4, %v7990_v36  ;;  %v631_v10 = vmul.f32 %v7446_v4, %v7987_v29  ;;  %v632_v16 = vmul.f32 %v7446_v4, %v8002_v43  ;;  %v633_v18 = vmul.f32 %v7446_v4, %v7999_v31  ;;  %v6159_v36 = vld [vmem:[%s7942_s29 + $0x48] sm:$0xff] }
 0x1c0   : > { %v1129_v12 = vcombine.low %v626_v5, %v627_v6  ;;  %v8144_v15 = vcombine.low %v628_v7, %v629_v8  ;;  %v634_v25 = vmul.f32 %v7446_v4, %v8020_v45  ;;  %v635_v26 = vmul.f32 %v7446_v4, %v8017_v42 }
 0x1c1   : > { %v8150_v23 = vcombine.low %v630_v9, %v631_v10  ;;  %v8164_v29 = vcombine.low %v632_v16, %v633_v18  ;;  %v636_v31 = vmul.f32 %v7446_v4, %v8032_v51  ;;  %v637_v43 = vmul.f32 %v7446_v4, %v8029_v54 }
 0x1c2   : > { %6799 = vmatprep.mubr.msk.f32.mxu1 %vm1137_vm11, %v1129_v12  ;;  %6843 = vmatprep.mubr.msk.f32.mxu0 %vm1137_vm11, %v1129_v12  ;;  %v1133_v42 = vcombine.low %v634_v25, %v635_v26  ;;  %v638_v45 = vmul.f32 %v7446_v4, %v8038_v57  ;;  %v640_v51 = vmul.f32 %v7446_v4, %v8050_v59 }
 0x1c3   : > { %6800 = vmatmul.mubr.msk.f32.vlgmr.msra.gmra.mxu1 %vm1137_vm11, %v8144_v15  ;;  %6844 = vmatmul.mubr.msk.f32.vlgmr.msra.gmra.mxu0 %vm1137_vm11, %v8144_v15  ;;  %v1134_v54 = vcombine.low %v636_v31, %v637_v43 }
 0x1c4   : > { %6812 = vmatpush3.msra.mxu1 %v8101_v20  ;;  %6802 = vmatprep.mubr.msk.f32.mxu1 %vm1137_vm11, %v8150_v23  ;;  %v639_v20 = vmul.f32 %v7446_v4, %v8035_v48  ;;  %v641_v48 = vmul.f32 %v7446_v4, %v8047_v52  ;;  %v6156_v52 = vld [vmem:[%s7942_s29 + $0x30] sm:$0xff] }
 0x1c5   : > { %6846 = vmatprep.mubr.msk.f32.mxu0 %vm1137_vm11, %v8150_v23  ;;  %6813 = vmatprep.subr.mxu1 %v6160_v24 }
 0x1c6   : > { %6814 = vmatpush3.msra.mxu1 %v6160_v24  ;;  %6880 = vmatpush3.msra.mxu0 %v8080_v13  ;;  %v1135_v57 = vcombine.low %v638_v45, %v639_v20  ;;  %v6157_v13 = vld [vmem:[%s7942_s29 + $0x38] sm:$0xff]  ;;  %v1136_v59 = vcombine.low %v640_v51, %v641_v48 }
 0x1c7   : > { %6803 = vmatmul.mubr.msk.f32.gmra.mxu1 %vm1137_vm11, %v8164_v29  ;;  %6847 = vmatmul.mubr.msk.f32.gmra.mxu0 %vm1137_vm11, %v8164_v29 }
 0x1c8   : > { %6805 = vmatprep.mubr.msk.f32.mxu1 %vm1137_vm11, %v1133_v42  ;;  %6815 = vmatprep.subr.mxu1 %v6159_v36 }
 0x1c9   : > { %6849 = vmatprep.mubr.msk.f32.mxu0 %vm1137_vm11, %v1133_v42  ;;  %6816 = vmatpush3.msra.mxu1 %v6159_v36 }
 0x1ca   : > { %6817 = vmatprep.subr.mxu1 %v6158_v33  ;;  %6881 = vmatprep.subr.mxu0 %v6182_v39 }
 0x1cb   : > { %6806 = vmatmul.mubr.msk.f32.gmra.mxu1 %vm1137_vm11, %v1134_v54  ;;  %6850 = vmatmul.mubr.msk.f32.gmra.mxu0 %vm1137_vm11, %v1134_v54 }
 0x1cc   : > { %6818 = vmatpush3.msra.mxu1 %v6158_v33  ;;  %6808 = vmatprep.mubr.msk.f32.mxu1 %vm1137_vm11, %v1135_v57 }
 0x1cd   : > { %6852 = vmatprep.mubr.msk.f32.mxu0 %vm1137_vm11, %v1135_v57  ;;  %6819 = vmatprep.subr.mxu1 %v6157_v13 }
 0x1ce   : > { %6820 = vmatpush3.msra.mxu1 %v6157_v13  ;;  %6882 = vmatpush3.msra.mxu0 %v6182_v39 }
 0x1cf   : > { %6809 = vmatmul.mubr.msk.f32.gmra.mxu1 %vm1137_vm11, %v1136_v59  ;;  %6853 = vmatmul.mubr.msk.f32.gmra.mxu0 %vm1137_vm11, %v1136_v59 }
 0x1d0   : > { %6883 = vmatprep.subr.mxu0 %v6181_v35  ;;  %6821 = vmatprep.subr.mxu1 %v6156_v52 }
 0x1d1   : > { %6823 = vmatprep.mubr.msk.f32.mxu1 %vm983_vm10, %v8085_v11  ;;  %6884 = vmatpush3.msra.mxu0 %v6181_v35 }
 0x1d2   : > { %6887 = vmatprep.mubr.msk.f32.mxu0 %vm1137_vm11, %v1129_v12  ;;  %6822 = vmatpush3.msra.mxu1 %v6156_v52 }
 0x1d3   : > { %6885 = vmatprep.subr.mxu0 %v6180_v30  ;;  %6855 = vmatprep.subr.mxu1 %v6189_v40 }
 0x1d4   : > { %6886 = vmatpush3.msra.mxu0 %v6180_v30  ;;  %6824 = vmatmul.mubr.msk.f32.vlgmr.msra.gmra.mxu1 %vm983_vm10, %v8083_v14 }
 0x1d5   : > { %6856 = vmatpush3.msra.mxu1 %v6189_v40  ;;  %6888 = vmatmul.mubr.msk.f32.vlgmr.msra.gmra.mxu0 %vm1137_vm11, %v8144_v15 }
 0x1d6   : > { %6826 = vmatprep.mubr.msk.f32.mxu1 %vm983_vm10, %v8096_v19  ;;  %6890 = vmatprep.mubr.msk.f32.mxu0 %vm1137_vm11, %v8150_v23 }
 0x1d7   : > { %6857 = vmatprep.subr.mxu1 %v6188_v32  ;;  %6910 = vmatprep.subr.mxu0 %v7645_v38 }
 0x1d8   : > { %6858 = vmatpush3.msra.mxu1 %v6188_v32  ;;  %6911 = vmatpush3.msra.mxu0 %v8209_v34 }
 0x1d9   : > { %6827 = vmatmul.mubr.msk.f32.gmra.mxu1 %vm983_vm10, %v8093_v17  ;;  %6891 = vmatmul.mubr.msk.f32.gmra.mxu0 %vm1137_vm11, %v8164_v29 }
 0x1da   : > { %6829 = vmatprep.mubr.msk.f32.mxu1 %vm983_vm10, %v8108_v22  ;;  %6859 = vmatprep.subr.mxu1 %v6187_v37 }
 0x1db   : > { %6893 = vmatprep.mubr.msk.f32.mxu0 %vm1137_vm11, %v1133_v42  ;;  %6860 = vmatpush3.msra.mxu1 %v6187_v37 }
 0x1dc   : > { %6861 = vmatprep.subr.mxu1 %v6186_v47  ;;  %6912 = vmatprep.subr.mxu0 %v7645_v38 }
 0x1dd   : > { %6830 = vmatmul.mubr.msk.f32.gmra.mxu1 %vm983_vm10, %v8106_v21  ;;  %6894 = vmatmul.mubr.msk.f32.gmra.mxu0 %vm1137_vm11, %v1134_v54 }
 0x1de   : > { %6862 = vmatpush3.msra.mxu1 %v6186_v47  ;;  %6832 = vmatprep.mubr.msk.f32.mxu1 %vm983_vm10, %v8116_v28 }
 0x1df   : > { %6896 = vmatprep.mubr.msk.f32.mxu0 %vm1137_vm11, %v1135_v57  ;;  %6863 = vmatprep.subr.mxu1 %v6185_v44 }
 0x1e0   : > { %6864 = vmatpush3.msra.mxu1 %v6185_v44  ;;  %6913 = vmatpush3.msra.mxu0 %v8232_v41  ;;  %v6179_v44 = vld [vmem:[%s8345_s18 + $0x1] ss:$0 sm:$0xff] }
 0x1e1   : > { %6833 = vmatmul.mubr.msk.f32.gmra.mxu1 %vm983_vm10, %v8114_v27  ;;  %6897 = vmatmul.mubr.msk.f32.gmra.mxu0 %vm1137_vm11, %v1136_v59 }
 0x1e2   : > { %6865 = vmatprep.subr.mxu1 %v6184_v46  ;;  %6867 = vmatprep.mubr.msk.f32.mxu1 %vm983_vm10, %v8085_v11  ;;  %v8268_v11 = vld [vmem:[%s8200_s14 + $0x8] sm:$0xff] }
 0x1e3   : > { %6866 = vmatpush3.msra.mxu1 %v6184_v46  ;;  %6914 = vmatprep.subr.mxu0 %v7645_v38 }
 0x1e4   : > { %6899 = vmatprep.subr.mxu1 %v7645_v38  ;;  %6915 = vmatpush3.msra.mxu0 %v8243_v49 }
 0x1e5   : > { %6868 = vmatmul.mubr.msk.f32.vlgmr.msra.gmra.mxu1 %vm983_vm10, %v8083_v14  ;;  %6916 = vmatprep.subr.mxu0 %v7645_v38  ;;  %v8277_v14 = vld [vmem:[%s8200_s14] sm:$0xff] }
 0x1e6   : > { %6900 = vmatpush3.msra.mxu1 %v8248_v50  ;;  %6870 = vmatprep.mubr.msk.f32.mxu1 %vm983_vm10, %v8096_v19  ;;  %v8309_v19 = vld [vmem:[%s8200_s14 + $0x50] sm:$0xff] }
 0x1e7   : > { %6901 = vmatprep.subr.mxu1 %v7645_v38  ;;  %6917 = vmatpush3.msra.mxu0 %v8254_v53 }
 0x1e8   : > { %6902 = vmatpush3.msra.mxu1 %v8259_v58  ;;  %6918 = vmatprep.mubr.msk.f32.mxu0 %vm7646_vm12, %v7645_v38 }
 0x1e9   : > { %6871 = vmatmul.mubr.msk.f32.gmra.mxu1 %vm983_vm10, %v8093_v17  ;;  %6903 = vmatprep.subr.mxu1 %v7645_v38  ;;  %v8303_v17 = vld [vmem:[%s8200_s14 + $0x58] sm:$0xff] }
 0x1ea   : > { %6873 = vmatprep.mubr.msk.f32.mxu1 %vm983_vm10, %v8108_v22  ;;  %6904 = vmatpush3.msra.mxu1 %v8268_v11  ;;  %v8322_v22 = vld [vmem:[%s8200_s14 + $0x40] sm:$0xff] }
 0x1eb   : > { %6919 = vmatmul.mubr.f32.vlgmr.msra.gmra.mxu0 %v7645_v38  ;;  %6905 = vmatprep.subr.mxu1 %v7645_v38 }
 0x1ec   : > { %6906 = vmatpush3.msra.mxu1 %v8277_v14  ;;  %6932 = vmatprep.subr.mxu0 %v7645_v38 }
 0x1ed   : > { %6874 = vmatmul.mubr.msk.f32.gmra.mxu1 %vm983_vm10, %v8106_v21  ;;  %6921 = vmatprep.subr.mxu1 %v7645_v38  ;;  %v8317_v21 = vld [vmem:[%s8200_s14 + $0x48] sm:$0xff] }
 0x1ee   : > { %6876 = vmatprep.mubr.msk.f32.mxu1 %vm983_vm10, %v8116_v28  ;;  %6933 = vmatpush3.msra.mxu0 %v8248_v50 }
 0x1ef   : > { %6934 = vmatprep.subr.mxu0 %v7645_v38  ;;  %6940 = vmatprep.mubr.msk.f32.mxu0 %vm7646_vm12, %v7645_v38 }
 0x1f0   : > { %6935 = vmatpush3.msra.mxu0 %v8259_v58 }
 0x1f1   : > { %6877 = vmatmul.mubr.msk.f32.gmra.mxu1 %vm983_vm10, %v8114_v27  ;;  %6936 = vmatprep.subr.mxu0 %v7645_v38 }
 0x1f2   : > { %6907 = vmatprep.mubr.msk.f32.mxu1 %vm7646_vm12, %v7645_v38  ;;  %6937 = vmatpush3.msra.mxu0 %v8268_v11 }
 0x1f3   : > { %6938 = vmatprep.subr.mxu0 %v7645_v38 }
 0x1f4   : > { %6939 = vmatpush3.msra.mxu0 %v8277_v14 }
 0x1f5   : > { %6908 = vmatmul.mubr.f32.vlgmr.msra.gmra.mxu1 %v7645_v38  ;;  %6954 = vmatprep.subr.mxu0 %v7645_v38 }
 0x1f6   : > { %6922 = vmatpush3.msra.mxu1 %v8303_v17  ;;  %6929 = vmatprep.mubr.msk.f32.mxu1 %vm7646_vm12, %v7645_v38 }
 0x1f7   : > { %6923 = vmatprep.subr.mxu1 %v7645_v38 }
 0x1f8   : > { %6924 = vmatpush3.msra.mxu1 %v8309_v19 }
 0x1f9   : > { %6925 = vmatprep.subr.mxu1 %v7645_v38 }
 0x1fa   : > { %6926 = vmatpush3.msra.mxu1 %v8317_v21 }
 0x1fb   : > { %6927 = vmatprep.subr.mxu1 %v7645_v38 }
 0x1fc   : > { %6928 = vmatpush3.msra.mxu1 %v8322_v22 }
 0x1fd   : > { %6930 = vmatmul.mubr.f32.vlgmr.msra.gmra.mxu1 %v7645_v38  ;;  %6943 = vmatprep.subr.mxu1 %v7645_v38 }
 0x1fe   : > { %6944 = vmatpush3.msra.mxu1 %v8209_v34  ;;  %6951 = vmatprep.mubr.msk.f32.mxu1 %vm7646_vm12, %v7645_v38 }
 0x1ff   : > { %6945 = vmatprep.subr.mxu1 %v7645_v38 }
 0x200   : > { %6946 = vmatpush3.msra.mxu1 %v8232_v41 }
 0x201   : > { %6947 = vmatprep.subr.mxu1 %v7645_v38 }
 0x202   : > { %6948 = vmatpush3.msra.mxu1 %v8243_v49 }
 0x203   : > { %6949 = vmatprep.subr.mxu1 %v7645_v38 }
 0x204   : > { %6950 = vmatpush3.msra.mxu1 %v8254_v53 }
 0x205   : > { %6965 = vmatprep.subr.mxu1 %v7645_v38 }
 0x217   : > { %v6781_v27 = vpop.f32.mrf.mxu1 }
 0x219   : > { %v1074_v28 = vpop.f32.mrf.mxu1 }
 0x21e   : > { %v6784_v61 = vpop.f32.mrf.mxu1 }
 0x220   : > { %v1084_v62 = vpop.f32.mrf.mxu1 }
 0x226   : > { %v6787_v55 = vpop.f32.mrf.mxu1 }
 0x228   : > { %v1094_v56 = vpop.f32.mrf.mxu1 }
 0x22e   : > { %v6790_v0 = vpop.f32.mrf.mxu1 }
 0x230   : > { %v1104_v1 = vpop.f32.mrf.mxu1 }
 0x283   : > { %v6801_v2 = vpop.f32.mrf.mxu1  ;;  %v6845_v3 = vpop.f32.mrf.mxu0 }
 0x284   : > { %v1226_v60 = vadd.f32 %v6801_v2, %v6781_v27 }
 0x285   : > { %v1220_v4 = vpop.f32.mrf.mxu1  ;;  %v1497_v5 = vpop.f32.mrf.mxu0 }
 0x286   : > { %v1267_v6 = vadd.f32 %v6151_v63, %v1226_v60  ;;  %v1221_v7 = vadd.f32 %v1220_v4, %v1074_v28 }
 0x287   : > { %v6804_v8 = vpop.f32.mrf.mxu1  ;;  %v6848_v9 = vpop.f32.mrf.mxu0 }
 0x288   : > { %v1283_v10 = vcombine.high %v1267_v6, %v1267_v6  ;;  %1300 = vst.msk [vmem:[#allocation2 + $0x8] sm:$0xf] %vm396_vm0, %v1267_v6  ;;  %v1266_v12 = vadd.f32 %v6151_v63, %v1221_v7  ;;  %v1236_v15 = vadd.f32 %v6804_v8, %v6784_v61 }
 0x289   : > { %v1230_v16 = vpop.f32.mrf.mxu1  ;;  %v1507_v18 = vpop.f32.mrf.mxu0 }
 0x28a   : > { %1301 = vst.msk [vmem:[#allocation2 + $0xc] sm:$0xf] %vm396_vm0, %v1283_v10  ;;  %v1282_v23 = vcombine.high %v1266_v12, %v1266_v12  ;;  %1298 = vst.msk [vmem:[#allocation2] sm:$0xf] %vm396_vm0, %v1266_v12  ;;  %v1269_v24 = vadd.f32 %v6151_v63, %v1236_v15  ;;  %v1231_v25 = vadd.f32 %v1230_v16, %v1084_v62 }
 0x28b   : > { %v6807_v26 = vpop.f32.mrf.mxu1  ;;  %v6851_v29 = vpop.f32.mrf.mxu0 }
 0x28c   : > { %1299 = vst.msk [vmem:[#allocation2 + $0x4] sm:$0xf] %vm396_vm0, %v1282_v23  ;;  %v1285_v36 = vcombine.high %v1269_v24, %v1269_v24  ;;  %1304 = vst.msk [vmem:[#allocation2 + $0x18] sm:$0xf] %vm396_vm0, %v1269_v24  ;;  %v1268_v31 = vadd.f32 %v6151_v63, %v1231_v25  ;;  %v1246_v43 = vadd.f32 %v6807_v26, %v6787_v55 }
 0x28d   : > { %v1240_v42 = vpop.f32.mrf.mxu1  ;;  %v1517_v45 = vpop.f32.mrf.mxu0 }
 0x28e   : > { %1305 = vst.msk [vmem:[#allocation2 + $0x1c] sm:$0xf] %vm396_vm0, %v1285_v36  ;;  %v1284_v20 = vcombine.high %v1268_v31, %v1268_v31  ;;  %1302 = vst.msk [vmem:[#allocation2 + $0x10] sm:$0xf] %vm396_vm0, %v1268_v31  ;;  %v1271_v33 = vadd.f32 %v6151_v63, %v1246_v43  ;;  %v1241_v39 = vadd.f32 %v1240_v42, %v1094_v56 }
 0x28f   : > { %v6810_v54 = vpop.f32.mrf.mxu1  ;;  %v6854_v51 = vpop.f32.mrf.mxu0 }
 0x290   : > { %1303 = vst.msk [vmem:[#allocation2 + $0x14] sm:$0xf] %vm396_vm0, %v1284_v20  ;;  %v1287_v48 = vcombine.high %v1271_v33, %v1271_v33  ;;  %1308 = vst.msk [vmem:[#allocation2 + $0x28] sm:$0xf] %vm396_vm0, %v1271_v33  ;;  %v1270_v57 = vadd.f32 %v6151_v63, %v1241_v39  ;;  %v1256_v13 = vadd.f32 %v6810_v54, %v6790_v0  ;;  %v6207_v54 = vld [vmem:[%s8345_s18 + $0x2] ss:$0 sm:$0xff]  ;;  %s2646_s18 = scalar_lea.vmem %s8429_s9, %s6241_s16 }
 0x291   : > { %v1250_v59 = vpop.f32.mrf.mxu1  ;;  %v1527_v35 = vpop.f32.mrf.mxu0 }
 0x292   : > { %1309 = vst.msk [vmem:[#allocation2 + $0x2c] sm:$0xf] %vm396_vm0, %v1287_v48  ;;  %v1286_v52 = vcombine.high %v1270_v57, %v1270_v57  ;;  %1306 = vst.msk [vmem:[#allocation2 + $0x20] sm:$0xf] %vm396_vm0, %v1270_v57  ;;  %v1273_v30 = vadd.f32 %v6151_v63, %v1256_v13  ;;  %v1251_v40 = vadd.f32 %v1250_v59, %v1104_v1 }
 0x294   : > { %1307 = vst.msk [vmem:[#allocation2 + $0x24] sm:$0xf] %vm396_vm0, %v1286_v52  ;;  %v1289_v32 = vcombine.high %v1273_v30, %v1273_v30  ;;  %1312 = vst.msk [vmem:[#allocation2 + $0x38] sm:$0xf] %vm396_vm0, %v1273_v30  ;;  %v1272_v37 = vadd.f32 %v6151_v63, %v1251_v40  ;;  %v6825_v47 = vpop.f32.mrf.mxu1 }
 0x295   : > { %v1503_v46 = vadd.f32 %v6845_v3, %v6825_v47  ;;  %v6889_v27 = vpop.f32.mrf.mxu0 }
 0x296   : > { %1313 = vst.msk [vmem:[#allocation2 + $0x3c] sm:$0xf] %vm396_vm0, %v1289_v32  ;;  %v1288_v28 = vcombine.high %v1272_v37, %v1272_v37  ;;  %1310 = vst.msk [vmem:[#allocation2 + $0x30] sm:$0xf] %vm396_vm0, %v1272_v37  ;;  %v1392_v61 = vpop.f32.mrf.mxu1 }
 0x297   : > { %v1545_v62 = vadd.f32 %v6179_v44, %v1503_v46  ;;  %v1498_v55 = vadd.f32 %v1497_v5, %v1392_v61  ;;  %v1776_v56 = vpop.f32.mrf.mxu0 }
 0x298   : > { %1311 = vst.msk [vmem:[#allocation2 + $0x34] sm:$0xf] %vm396_vm0, %v1288_v28 }
 0x299   : > { %v1561_v0 = vcombine.high %v1545_v62, %v1545_v62  ;;  %1579 = vst.msk [vmem:[#allocation2 + $0x48] sm:$0xf] %vm396_vm0, %v1545_v62  ;;  %v1544_v1 = vadd.f32 %v6179_v44, %v1498_v55  ;;  %v6828_v2 = vpop.f32.mrf.mxu1  ;;  %v6892_v63 = vpop.f32.mrf.mxu0 }
 0x29a   : > { %v1513_v60 = vadd.f32 %v6848_v9, %v6828_v2 }
 0x29b   : > { %1580 = vst.msk [vmem:[#allocation2 + $0x4c] sm:$0xf] %vm396_vm0, %v1561_v0  ;;  %v1560_v3 = vcombine.high %v1544_v1, %v1544_v1  ;;  %1577 = vst.msk [vmem:[#allocation2 + $0x40] sm:$0xf] %vm396_vm0, %v1544_v1  ;;  %v1402_v4 = vpop.f32.mrf.mxu1  ;;  %v1786_v6 = vpop.f32.mrf.mxu0 }
 0x29c   : > { %v1547_v7 = vadd.f32 %v6179_v44, %v1513_v60  ;;  %v1508_v8 = vadd.f32 %v1507_v18, %v1402_v4 }
 0x29d   : > { %1578 = vst.msk [vmem:[#allocation2 + $0x44] sm:$0xf] %vm396_vm0, %v1560_v3  ;;  %v6831_v5 = vpop.f32.mrf.mxu1  ;;  %v6895_v10 = vpop.f32.mrf.mxu0 }
 0x29e   : > { %v1563_v12 = vcombine.high %v1547_v7, %v1547_v7  ;;  %1583 = vst.msk [vmem:[#allocation2 + $0x58] sm:$0xf] %vm396_vm0, %v1547_v7  ;;  %v1546_v15 = vadd.f32 %v6179_v44, %v1508_v8  ;;  %v1523_v16 = vadd.f32 %v6851_v29, %v6831_v5  ;;  %v8405_v5 = vld [vmem:[%s8400_s24] ss:$0 sm:$0xff] }
 0x29f   : > { %v1412_v23 = vpop.f32.mrf.mxu1  ;;  %v1796_v26 = vpop.f32.mrf.mxu0 }
 0x2a0   : > { %1584 = vst.msk [vmem:[#allocation2 + $0x5c] sm:$0xf] %vm396_vm0, %v1563_v12  ;;  %v1562_v9 = vcombine.high %v1546_v15, %v1546_v15  ;;  %1581 = vst.msk [vmem:[#allocation2 + $0x50] sm:$0xf] %vm396_vm0, %v1546_v15  ;;  %v1549_v24 = vadd.f32 %v6179_v44, %v1523_v16  ;;  %v1518_v25 = vadd.f32 %v1517_v45, %v1412_v23 }
 0x2a1   : > { %v6834_v18 = vpop.f32.mrf.mxu1  ;;  %v6898_v39 = vpop.f32.mrf.mxu0 }
 0x2a2   : > { %1582 = vst.msk [vmem:[#allocation2 + $0x54] sm:$0xf] %vm396_vm0, %v1562_v9  ;;  %v1565_v36 = vcombine.high %v1549_v24, %v1549_v24  ;;  %1587 = vst.msk [vmem:[#allocation2 + $0x68] sm:$0xf] %vm396_vm0, %v1549_v24  ;;  %v1548_v31 = vadd.f32 %v6179_v44, %v1518_v25  ;;  %v1533_v43 = vadd.f32 %v6854_v51, %v6834_v18 }
 0x2a3   : > { %v1422_v42 = vpop.f32.mrf.mxu1 }
 0x2a4   : > { %1588 = vst.msk [vmem:[#allocation2 + $0x6c] sm:$0xf] %vm396_vm0, %v1565_v36  ;;  %v1564_v29 = vcombine.high %v1548_v31, %v1548_v31  ;;  %1585 = vst.msk [vmem:[#allocation2 + $0x60] sm:$0xf] %vm396_vm0, %v1548_v31  ;;  %v1551_v20 = vadd.f32 %v6179_v44, %v1533_v43  ;;  %v1528_v33 = vadd.f32 %v1527_v35, %v1422_v42  ;;  %v1806_v35 = vpop.f32.mrf.mxu0 }
 0x2a5   : > { %v6869_v45 = vpop.f32.mrf.mxu1 }
 0x2a6   : > { %1586 = vst.msk [vmem:[#allocation2 + $0x64] sm:$0xf] %vm396_vm0, %v1564_v29  ;;  %v1567_v48 = vcombine.high %v1551_v20, %v1551_v20  ;;  %1591 = vst.msk [vmem:[#allocation2 + $0x78] sm:$0xf] %vm396_vm0, %v1551_v20  ;;  %v1550_v57 = vadd.f32 %v6179_v44, %v1528_v33  ;;  %v1782_v13 = vadd.f32 %v6889_v27, %v6869_v45 }
 0x2a7   : > { %v1671_v51 = vpop.f32.mrf.mxu1 }
 0x2a8   : > { %1592 = vst.msk [vmem:[#allocation2 + $0x7c] sm:$0xf] %vm396_vm0, %v1567_v48  ;;  %v1566_v59 = vcombine.high %v1550_v57, %v1550_v57  ;;  %1589 = vst.msk [vmem:[#allocation2 + $0x70] sm:$0xf] %vm396_vm0, %v1550_v57  ;;  %v1824_v52 = vadd.f32 %v6207_v54, %v1782_v13  ;;  %v1777_v30 = vadd.f32 %v1776_v56, %v1671_v51  ;;  %v8422_v51 = vld [vmem:[%s8400_s24 + $0x2] ss:$0 sm:$0xff] }
 0x2a9   : > { %v6872_v40 = vpop.f32.mrf.mxu1 }
 0x2aa   : > { %1590 = vst.msk [vmem:[#allocation2 + $0x74] sm:$0xf] %vm396_vm0, %v1566_v59  ;;  %v1840_v32 = vcombine.high %v1824_v52, %v1824_v52  ;;  %1858 = vst.msk [vmem:[#allocation2 + $0x88] sm:$0xf] %vm396_vm0, %v1824_v52  ;;  %v1823_v37 = vadd.f32 %v6207_v54, %v1777_v30  ;;  %v1792_v47 = vadd.f32 %v6892_v63, %v6872_v40 }
 0x2ab   : > { %v1681_v44 = vpop.f32.mrf.mxu1  ;;  %v2044_v46 = vpop.f32.mrf.mxu0 }
 0x2ac   : > { %1859 = vst.msk [vmem:[#allocation2 + $0x8c] sm:$0xf] %vm396_vm0, %v1840_v32  ;;  %v1839_v27 = vcombine.high %v1823_v37, %v1823_v37  ;;  %1856 = vst.msk [vmem:[#allocation2 + $0x80] sm:$0xf] %vm396_vm0, %v1823_v37  ;;  %v1826_v28 = vadd.f32 %v6207_v54, %v1792_v47  ;;  %v1787_v61 = vadd.f32 %v1786_v6, %v1681_v44 }
 0x2ad   : > { %v6875_v62 = vpop.f32.mrf.mxu1  ;;  %v6920_v55 = vpop.f32.mrf.mxu0 }
 0x2ae   : > { %1857 = vst.msk [vmem:[#allocation2 + $0x84] sm:$0xf] %vm396_vm0, %v1839_v27  ;;  %v1842_v56 = vcombine.high %v1826_v28, %v1826_v28  ;;  %1862 = vst.msk [vmem:[#allocation2 + $0x98] sm:$0xf] %vm396_vm0, %v1826_v28  ;;  %v1825_v0 = vadd.f32 %v6207_v54, %v1787_v61  ;;  %v1802_v1 = vadd.f32 %v6895_v10, %v6875_v62 }
 0x2af   : > { %v1691_v2 = vpop.f32.mrf.mxu1 }
 0x2b0   : > { %1863 = vst.msk [vmem:[#allocation2 + $0x9c] sm:$0xf] %vm396_vm0, %v1842_v56  ;;  %v1841_v63 = vcombine.high %v1825_v0, %v1825_v0  ;;  %1860 = vst.msk [vmem:[#allocation2 + $0x90] sm:$0xf] %vm396_vm0, %v1825_v0  ;;  %v1828_v60 = vadd.f32 %v6207_v54, %v1802_v1  ;;  %v1797_v3 = vadd.f32 %v1796_v26, %v1691_v2  ;;  %v8413_v26 = vld [vmem:[%s8400_s24 + $0x1] ss:$0 sm:$0xff] }
 0x2b1   : > { %v6878_v4 = vpop.f32.mrf.mxu1  ;;  %v2045_v42 = vadd.f32 %v8413_v26, %v2044_v46 }
 0x2b2   : > { %1861 = vst.msk [vmem:[#allocation2 + $0x94] sm:$0xf] %vm396_vm0, %v1841_v63  ;;  %v1844_v6 = vcombine.high %v1828_v60, %v1828_v60  ;;  %1866 = vst.msk [vmem:[#allocation2 + $0xa8] sm:$0xf] %vm396_vm0, %v1828_v60  ;;  %v1827_v7 = vadd.f32 %v6207_v54, %v1797_v3  ;;  %v1812_v8 = vadd.f32 %v6898_v39, %v6878_v4 }
 0x2b3   : > { %v1701_v10 = vpop.f32.mrf.mxu1 }
 0x2b4   : > { %1867 = vst.msk [vmem:[#allocation2 + $0xac] sm:$0xf] %vm396_vm0, %v1844_v6  ;;  %v1843_v12 = vcombine.high %v1827_v7, %v1827_v7  ;;  %1864 = vst.msk [vmem:[#allocation2 + $0xa0] sm:$0xf] %vm396_vm0, %v1827_v7  ;;  %v1830_v15 = vadd.f32 %v6207_v54, %v1812_v8  ;;  %v1807_v16 = vadd.f32 %v1806_v35, %v1701_v10 }
 0x2b5   : > { %v1968_v23 = vpop.f32.mrf.mxu1 }
 0x2b6   : > { %1865 = vst.msk [vmem:[#allocation2 + $0xa4] sm:$0xf] %vm396_vm0, %v1843_v12  ;;  %v1846_v9 = vcombine.high %v1830_v15, %v1830_v15  ;;  %1870 = vst.msk [vmem:[#allocation2 + $0xb8] sm:$0xf] %vm396_vm0, %v1830_v15  ;;  %v1829_v24 = vadd.f32 %v6207_v54, %v1807_v16  ;;  %v1969_v25 = vadd.f32 %v8405_v5, %v1968_v23 }
 0x2b7   : > { %v6909_v36 = vpop.f32.mrf.mxu1 }
 0x2b8   : > { %v1845_v31 = vcombine.high %v1829_v24, %v1829_v24 }
 0x2bd   : > { %v2126_v18 = vld [vmem:[%s2125_s25] sm:$0xf]  ;;  %v2120_v33 = vpop.f32.mrf.mxu1 }
 0x2be   : > { %1871 = vst.msk [vmem:[#allocation2 + $0xbc] sm:$0xf] %vm396_vm0, %v1846_v9  ;;  %1868 = vst.msk [vmem:[#allocation2 + $0xb0] sm:$0xf] %vm396_vm0, %v1829_v24  ;;  %v2127_v43 = vadd.f32 %v2126_v18, %v1969_v25  ;;  %v2121_v52 = vadd.f32 %v8422_v51, %v2120_v33 }
 0x2bf   : > { %1869 = vst.msk [vmem:[#allocation2 + $0xb4] sm:$0xf] %vm396_vm0, %v1845_v31  ;;  %v6931_v45 = vpop.f32.mrf.mxu1 }
 0x2c0   : > { %v6222_v29 = vmul.f32 -1.442695, %v2127_v43 }
 0x2c2   : > { %7447 = vpow2.f32 %v6222_v29 }
 0x2c6   : > { %v6224_v20 = vld [vmem:[%s2125_s25 + $0x40] sm:$0xf] }
 0x2c7   : > { %v2137_v39 = vadd.f32 %v6224_v20, %v2045_v42  ;;  %v6227_v40 = vld [vmem:[%s2125_s25 + $0x80] sm:$0xf]  ;;  %s8650_s25 = scalar_select %p1891_p4, 11, 4 }
 0x2c8   : > { %v2372_v56 = vld [vmem:[%s2371_s12] sm:$0xf] }
 0x2c9   : > { %v6225_v54 = vmul.f32 -1.442695, %v2137_v39  ;;  %v6234_v3 = vld [vmem:[%s2371_s12 + $0x40] sm:$0xf]  ;;  %s6261_s26 = sshll.u32 %s8650_s25, 2 }
 0x2ca   : > { %v6237_v25 = vld [vmem:[%s2371_s12 + $0x80] sm:$0xf]  ;;  %s3109_s29 = scalar_lea.vmem [#allocation2], %s6261_s26  ;;  %s3138_s30 = scalar_lea.vmem %s8429_s9, %s6261_s26 }
 0x2cb   : > { %7449 = vpow2.f32 %v6225_v54  ;;  %v2618_v54 = vld [vmem:[%s2617_s17] sm:$0xf] }
 0x2cf   : > { %v7448_v48 = vpop.eup %7447 }
 0x2d0   : > { %v2131_v57 = vadd.f32 1.0, %v7448_v48 }
 0x2d2   : > { %7451 = vrcp.f32 %v2131_v57 }
 0x2d8   : > { %v7450_v13 = vpop.eup %7449 }
 0x2d9   : > { %v2141_v59 = vadd.f32 1.0, %v7450_v13 }
 0x2db   : > { %7453 = vrcp.f32 %v2141_v59 }
 0x2df   : > { %v7452_v30 = vpop.eup %7451 }
 0x2e0   : > { %v2147_v35 = vmul.f32 %v7452_v30, %v2121_v52  ;;  %v6244_v30 = vld [vmem:[%s2617_s17 + $0x40] sm:$0xf] }
 0x2e2   : > { %v2148_v32 = vadd.f32 %v6227_v40, %v2147_v35 }
 0x2e4   : > { %7455 = vtanh.f32 %v2148_v32 }
 0x2e8   : > { %v7454_v37 = vpop.eup %7453 }
 0x2e9   : > { %v2150_v47 = vsub.f32 1.0, %v7454_v37  ;;  %v2152_v27 = vmul.f32 0.0, %v7454_v37 }
 0x2f1   : > { %v7456_v44 = vpop.eup %7455 }
 0x2f2   : > { %v2151_v46 = vmul.f32 %v7456_v44, %v2150_v47 }
 0x2f4   : > { %v8434_v28 = vadd.f32 %v2152_v27, %v2151_v46 }
 0x2f6   : > { %2155 = vst.msk [vmem:[%s2154_s10] sm:$0xf] %vm396_vm0, %v8434_v28  ;;  %6941 = vmatmul.mubr.msk.f32.vlgmr.msra.gmra.mxu0 %vm1137_vm11, %v8434_v28  ;;  %6952 = vmatmul.mubr.msk.f32.vlgmr.msra.gmra.mxu1 %vm1137_vm11, %v8434_v28  ;;  %s8728_s10 = scalar_select %p1891_p4, 10, 5 }
 0x2f7   : > { %6955 = vmatpush3.msra.mxu0 %v8303_v17  ;;  %6962 = vmatprep.mubr.msk.f32.mxu0 %vm7646_vm12, %v7645_v38 }
 0x2f8   : > { %6956 = vmatprep.subr.mxu0 %v7645_v38  ;;  %6966 = vmatpush3.msra.mxu1 %v8248_v50  ;;  %s6271_s23 = sshll.u32 %s8728_s10, 2 }
 0x2f9   : > { %6957 = vmatpush3.msra.mxu0 %v8309_v19  ;;  %6967 = vmatprep.subr.mxu1 %v7645_v38  ;;  %s3355_s11 = scalar_lea.vmem [#allocation2], %s6271_s23  ;;  %s3384_s12 = scalar_lea.vmem %s8429_s9, %s6271_s23 }
 0x2fa   : > { %6958 = vmatprep.subr.mxu0 %v7645_v38  ;;  %6968 = vmatpush3.msra.mxu1 %v8259_v58 }
 0x2fb   : > { %6959 = vmatpush3.msra.mxu0 %v8317_v21  ;;  %6969 = vmatprep.subr.mxu1 %v7645_v38 }
 0x2fc   : > { %6960 = vmatprep.subr.mxu0 %v7645_v38  ;;  %6970 = vmatpush3.msra.mxu1 %v8268_v11 }
 0x2fd   : > { %6961 = vmatpush3.msra.mxu0 %v8322_v22  ;;  %6971 = vmatprep.subr.mxu1 %v7645_v38 }
 0x2fe   : > { %6963 = vmatmul.mubr.msk.f32.vlgmr.msra.gmra.mxu0 %vm1137_vm11, %v8434_v28  ;;  %6976 = vmatprep.subr.mxu0 %v7645_v38 }
 0x2ff   : > { %6977 = vmatpush3.msra.mxu0 %v8209_v34  ;;  %6972 = vmatpush3.msra.mxu1 %v8277_v14 }
 0x300   : > { %6978 = vmatprep.subr.mxu0 %v7645_v38  ;;  %6973 = vmatprep.mubr.msk.f32.mxu1 %vm7646_vm12, %v7645_v38 }
 0x301   : > { %6979 = vmatpush3.msra.mxu0 %v8232_v41  ;;  %6984 = vmatprep.mubr.msk.f32.mxu0 %vm7646_vm12, %v7645_v38 }
 0x302   : > { %6980 = vmatprep.subr.mxu0 %v7645_v38  ;;  %6987 = vmatprep.subr.mxu1 %v7645_v38 }
 0x303   : > { %6981 = vmatpush3.msra.mxu0 %v8243_v49 }
 0x304   : > { %6982 = vmatprep.subr.mxu0 %v7645_v38 }
 0x305   : > { %6983 = vmatpush3.msra.mxu0 %v8254_v53 }
 0x306   : > { %6998 = vmatprep.subr.mxu0 %v7645_v38 }
 0x3b6   : > { %v2226_v61 = vpop.f32.mrf.mxu0  ;;  %v2296_v62 = vpop.f32.mrf.mxu1 }
 0x3b7   : > { %v2227_v55 = vadd.f32 %v8405_v5, %v2226_v61  ;;  %v2297_v60 = vadd.f32 %v8413_v26, %v2296_v62 }
 0x3b8   : > { %v6942_v0 = vpop.f32.mrf.mxu0  ;;  %v6953_v1 = vpop.f32.mrf.mxu1 }
 0x3b9   : > { %v2373_v2 = vadd.f32 %v2372_v56, %v2227_v55  ;;  %v2383_v6 = vadd.f32 %v6234_v3, %v2297_v60  ;;  %v6247_v55 = vld [vmem:[%s2617_s17 + $0x80] sm:$0xf] }
 0x3bb   : > { %v6232_v63 = vmul.f32 -1.442695, %v2373_v2  ;;  %v6235_v8 = vmul.f32 -1.442695, %v2383_v6  ;;  %v2864_v6 = vld [vmem:[%s2863_s21] sm:$0xf] }
 0x3bd   : > { %7457 = vpow2.f32 %v6232_v63 }
 0x3be   : > { %v2366_v4 = vpop.f32.mrf.mxu0  ;;  %7459 = vpow2.f32 %v6235_v8 }
 0x3bf   : > { %v2367_v23 = vadd.f32 %v8422_v51, %v2366_v4 }
 0x3c0   : > { %v6964_v7 = vpop.f32.mrf.mxu0 }
 0x3ca   : > { %v7458_v10 = vpop.eup %7457 }
 0x3cb   : > { %v2377_v12 = vadd.f32 1.0, %v7458_v10  ;;  %v7460_v15 = vpop.eup %7459 }
 0x3cc   : > { %v2387_v16 = vadd.f32 1.0, %v7460_v15 }
 0x3cd   : > { %7461 = vrcp.f32 %v2377_v12  ;;  %v6254_v12 = vld [vmem:[%s2863_s21 + $0x40] sm:$0xf] }
 0x3ce   : > { %7463 = vrcp.f32 %v2387_v16 }
 0x3da   : > { %v7462_v9 = vpop.eup %7461 }
 0x3db   : > { %v2393_v24 = vmul.f32 %v7462_v9, %v2367_v23  ;;  %v7464_v36 = vpop.eup %7463 }
 0x3dc   : > { %v2396_v31 = vsub.f32 1.0, %v7464_v36  ;;  %v2398_v29 = vmul.f32 %v7464_v36, %v8434_v28 }
 0x3dd   : > { %v2394_v18 = vadd.f32 %v6237_v25, %v2393_v24 }
 0x3df   : > { %7465 = vtanh.f32 %v2394_v18 }
 0x3ec   : > { %v7466_v43 = vpop.eup %7465 }
 0x3ed   : > { %v2397_v42 = vmul.f32 %v7466_v43, %v2396_v31 }
 0x3ef   : > { %v8488_v20 = vadd.f32 %v2398_v29, %v2397_v42  ;;  %v6257_v29 = vld [vmem:[%s2863_s21 + $0x80] sm:$0xf] }
 0x3f1   : > { %2401 = vst.msk [vmem:[%s2400_s13] sm:$0xf] %vm396_vm0, %v8488_v20  ;;  %6974 = vmatmul.mubr.msk.f32.vlgmr.msra.gmra.mxu1 %vm1137_vm11, %v8488_v20  ;;  %6985 = vmatmul.mubr.msk.f32.vlgmr.msra.gmra.mxu0 %vm1137_vm11, %v8488_v20  ;;  %s8782_s13 = scalar_select %p1891_p4, 9, 6 }
 0x3f2   : > { %6988 = vmatpush3.msra.mxu1 %v8303_v17  ;;  %6995 = vmatprep.mubr.msk.f32.mxu1 %vm7646_vm12, %v7645_v38 }
 0x3f3   : > { %6989 = vmatprep.subr.mxu1 %v7645_v38  ;;  %6999 = vmatpush3.msra.mxu0 %v8248_v50  ;;  %s6281_s15 = sshll.u32 %s8782_s13, 2 }
 0x3f4   : > { %6990 = vmatpush3.msra.mxu1 %v8309_v19  ;;  %7000 = vmatprep.subr.mxu0 %v7645_v38  ;;  %s3601_s16 = scalar_lea.vmem [#allocation2], %s6281_s15  ;;  %s3630_s17 = scalar_lea.vmem %s8429_s9, %s6281_s15 }
 0x3f5   : > { %6991 = vmatprep.subr.mxu1 %v7645_v38  ;;  %7001 = vmatpush3.msra.mxu0 %v8259_v58 }
 0x3f6   : > { %6992 = vmatpush3.msra.mxu1 %v8317_v21  ;;  %7002 = vmatprep.subr.mxu0 %v7645_v38 }
 0x3f7   : > { %6993 = vmatprep.subr.mxu1 %v7645_v38  ;;  %7003 = vmatpush3.msra.mxu0 %v8268_v11 }
 0x3f8   : > { %6994 = vmatpush3.msra.mxu1 %v8322_v22  ;;  %7004 = vmatprep.subr.mxu0 %v7645_v38 }
 0x3f9   : > { %6996 = vmatmul.mubr.msk.f32.vlgmr.msra.gmra.mxu1 %vm1137_vm11, %v8488_v20  ;;  %7009 = vmatprep.subr.mxu1 %v7645_v38 }
 0x3fa   : > { %7010 = vmatpush3.msra.mxu1 %v8209_v34  ;;  %7005 = vmatpush3.msra.mxu0 %v8277_v14 }
 0x3fb   : > { %7011 = vmatprep.subr.mxu1 %v7645_v38  ;;  %7006 = vmatprep.mubr.msk.f32.mxu0 %vm7646_vm12, %v7645_v38 }
 0x3fc   : > { %7012 = vmatpush3.msra.mxu1 %v8232_v41  ;;  %7017 = vmatprep.mubr.msk.f32.mxu1 %vm7646_vm12, %v7645_v38 }
 0x3fd   : > { %7013 = vmatprep.subr.mxu1 %v7645_v38  ;;  %7020 = vmatprep.subr.mxu0 %v7645_v38 }
 0x3fe   : > { %7014 = vmatpush3.msra.mxu1 %v8243_v49 }
 0x3ff   : > { %7015 = vmatprep.subr.mxu1 %v7645_v38 }
 0x400   : > { %7016 = vmatpush3.msra.mxu1 %v8254_v53 }
 0x401   : > { %7031 = vmatprep.subr.mxu1 %v7645_v38 }
 0x4b1   : > { %v2472_v33 = vpop.f32.mrf.mxu1  ;;  %v2542_v39 = vpop.f32.mrf.mxu0 }
 0x4b2   : > { %v2473_v45 = vadd.f32 %v8405_v5, %v2472_v33  ;;  %v2543_v52 = vadd.f32 %v8413_v26, %v2542_v39 }
 0x4b3   : > { %v6975_v48 = vpop.f32.mrf.mxu1  ;;  %v6986_v57 = vpop.f32.mrf.mxu0 }
 0x4b4   : > { %v2619_v13 = vadd.f32 %v2618_v54, %v2473_v45  ;;  %v2629_v40 = vadd.f32 %v6244_v30, %v2543_v52 }
 0x4b6   : > { %v6242_v59 = vmul.f32 -1.442695, %v2619_v13  ;;  %v6245_v37 = vmul.f32 -1.442695, %v2629_v40  ;;  %v6264_v40 = vld [vmem:[%s3109_s29 + $0x40] sm:$0xf] }
 0x4b8   : > { %7467 = vpow2.f32 %v6242_v59 }
 0x4b9   : > { %v2612_v35 = vpop.f32.mrf.mxu1  ;;  %7469 = vpow2.f32 %v6245_v37 }
 0x4ba   : > { %v2613_v28 = vadd.f32 %v8422_v51, %v2612_v35 }
 0x4bb   : > { %v6997_v32 = vpop.f32.mrf.mxu1 }
 0x4c5   : > { %v7468_v47 = vpop.eup %7467 }
 0x4c6   : > { %v2623_v44 = vadd.f32 1.0, %v7468_v47  ;;  %v7470_v46 = vpop.eup %7469 }
 0x4c7   : > { %v2633_v27 = vadd.f32 1.0, %v7470_v46 }
 0x4c8   : > { %7471 = vrcp.f32 %v2623_v44 }
 0x4c9   : > { %7473 = vrcp.f32 %v2633_v27 }
 0x4d5   : > { %v7472_v61 = vpop.eup %7471 }
 0x4d6   : > { %v2639_v62 = vmul.f32 %v7472_v61, %v2613_v28  ;;  %v7474_v0 = vpop.eup %7473 }
 0x4d7   : > { %v2642_v1 = vsub.f32 1.0, %v7474_v0  ;;  %v2644_v60 = vmul.f32 %v7474_v0, %v8488_v20  ;;  %v6267_v0 = vld [vmem:[%s3109_s29 + $0x80] sm:$0xf] }
 0x4d8   : > { %v2640_v56 = vadd.f32 %v6247_v55, %v2639_v62 }
 0x4da   : > { %7475 = vtanh.f32 %v2640_v56 }
 0x4e7   : > { %v7476_v2 = vpop.eup %7475 }
 0x4e8   : > { %v2643_v63 = vmul.f32 %v7476_v2, %v2642_v1 }
 0x4ea   : > { %v8542_v3 = vadd.f32 %v2644_v60, %v2643_v63 }
 0x4ec   : > { %2647 = vst.msk [vmem:[%s2646_s18] sm:$0xf] %vm396_vm0, %v8542_v3  ;;  %7007 = vmatmul.mubr.msk.f32.vlgmr.msra.gmra.mxu0 %vm1137_vm11, %v8542_v3  ;;  %7018 = vmatmul.mubr.msk.f32.vlgmr.msra.gmra.mxu1 %vm1137_vm11, %v8542_v3  ;;  %s8836_s18 = scalar_select %p1891_p4, 8, 7 }
 0x4ed   : > { %7021 = vmatpush3.msra.mxu0 %v8303_v17  ;;  %7028 = vmatprep.mubr.msk.f32.mxu0 %vm7646_vm12, %v7645_v38 }
 0x4ee   : > { %7022 = vmatprep.subr.mxu0 %v7645_v38  ;;  %7032 = vmatpush3.msra.mxu1 %v8248_v50  ;;  %s6291_s19 = sshll.u32 %s8836_s18, 2 }
 0x4ef   : > { %7023 = vmatpush3.msra.mxu0 %v8309_v19  ;;  %7033 = vmatprep.subr.mxu1 %v7645_v38  ;;  %s3847_s20 = scalar_lea.vmem [#allocation2], %s6291_s19  ;;  %s3876_s21 = scalar_lea.vmem %s8429_s9, %s6291_s19 }
 0x4f0   : > { %7024 = vmatprep.subr.mxu0 %v7645_v38  ;;  %7034 = vmatpush3.msra.mxu1 %v8259_v58 }
 0x4f1   : > { %7025 = vmatpush3.msra.mxu0 %v8317_v21  ;;  %7035 = vmatprep.subr.mxu1 %v7645_v38 }
 0x4f2   : > { %7026 = vmatprep.subr.mxu0 %v7645_v38  ;;  %7036 = vmatpush3.msra.mxu1 %v8268_v11 }
 0x4f3   : > { %7027 = vmatpush3.msra.mxu0 %v8322_v22  ;;  %7037 = vmatprep.subr.mxu1 %v7645_v38 }
 0x4f4   : > { %7029 = vmatmul.mubr.msk.f32.vlgmr.msra.gmra.mxu0 %vm1137_vm11, %v8542_v3  ;;  %7042 = vmatprep.subr.mxu0 %v7645_v38 }
 0x4f5   : > { %7043 = vmatpush3.msra.mxu0 %v8209_v34  ;;  %7038 = vmatpush3.msra.mxu1 %v8277_v14 }
 0x4f6   : > { %7044 = vmatprep.subr.mxu0 %v7645_v38  ;;  %7039 = vmatprep.mubr.msk.f32.mxu1 %vm7646_vm12, %v7645_v38 }
 0x4f7   : > { %7045 = vmatpush3.msra.mxu0 %v8232_v41  ;;  %7050 = vmatprep.mubr.msk.f32.mxu0 %vm7646_vm12, %v7645_v38 }
 0x4f8   : > { %7046 = vmatprep.subr.mxu0 %v7645_v38  ;;  %7053 = vmatprep.subr.mxu1 %v7645_v38 }
 0x4f9   : > { %7047 = vmatpush3.msra.mxu0 %v8243_v49 }
 0x4fa   : > { %7048 = vmatprep.subr.mxu0 %v7645_v38 }
 0x4fb   : > { %7049 = vmatpush3.msra.mxu0 %v8254_v53 }
 0x4fc   : > { %7064 = vmatprep.subr.mxu0 %v7645_v38 }
 0x5ac   : > { %v2718_v34 = vpop.f32.mrf.mxu0  ;;  %v2788_v41 = vpop.f32.mrf.mxu1 }
 0x5ad   : > { %v2719_v4 = vadd.f32 %v8405_v5, %v2718_v34  ;;  %v2789_v53 = vadd.f32 %v8413_v26, %v2788_v41 }
 0x5ae   : > { %v7008_v49 = vpop.f32.mrf.mxu0  ;;  %v7019_v7 = vpop.f32.mrf.mxu1 }
 0x5af   : > { %v2865_v8 = vadd.f32 %v2864_v6, %v2719_v4  ;;  %v2875_v16 = vadd.f32 %v6254_v12, %v2789_v53  ;;  %v8671_v4 = vld [vmem:[%s8200_s14 + $0x58] sm:$0xff]  ;;  %v8682_v49 = vld [vmem:[%s8200_s14 + $0x50] sm:$0xff]  ;;  %v8702_v53 = vld [vmem:[%s8200_s14 + $0x40] sm:$0xff] }
 0x5b0   : > { %v8678_v6 = vld [vmem:[%s8200_s14 + $0x18] sm:$0xff]  ;;  %v8688_v7 = vld [vmem:[%s8200_s14 + $0x10] sm:$0xff]  ;;  %v8711_v12 = vld [vmem:[%s8200_s14] sm:$0xff] }
 0x5b1   : > { %v6252_v10 = vmul.f32 -1.442695, %v2865_v8  ;;  %v6255_v9 = vmul.f32 -1.442695, %v2875_v16  ;;  %v8692_v8 = vld [vmem:[%s8200_s14 + $0x48] sm:$0xff] }
 0x5b3   : > { %7477 = vpow2.f32 %v6252_v10  ;;  %v8698_v10 = vld [vmem:[%s8200_s14 + $0x8] sm:$0xff] }
 0x5b4   : > { %v2858_v15 = vpop.f32.mrf.mxu0  ;;  %7479 = vpow2.f32 %v6255_v9  ;;  %v3356_v9 = vld [vmem:[%s3355_s11] sm:$0xf] }
 0x5b5   : > { %v2859_v31 = vadd.f32 %v8422_v51, %v2858_v15 }
 0x5b6   : > { %v7030_v23 = vpop.f32.mrf.mxu0 }
 0x5c0   : > { %v7478_v24 = vpop.eup %7477 }
 0x5c1   : > { %v2869_v25 = vadd.f32 1.0, %v7478_v24  ;;  %v7480_v18 = vpop.eup %7479 }
 0x5c2   : > { %v2879_v36 = vadd.f32 1.0, %v7480_v18 }
 0x5c3   : > { %7481 = vrcp.f32 %v2869_v25 }
 0x5c4   : > { %7483 = vrcp.f32 %v2879_v36 }
 0x5d0   : > { %v7482_v43 = vpop.eup %7481 }
 0x5d1   : > { %v2885_v42 = vmul.f32 %v7482_v43, %v2859_v31  ;;  %v7484_v33 = vpop.eup %7483  ;;  %v6274_v43 = vld [vmem:[%s3355_s11 + $0x40] sm:$0xf] }
 0x5d2   : > { %v2888_v39 = vsub.f32 1.0, %v7484_v33  ;;  %v2890_v48 = vmul.f32 %v7484_v33, %v8542_v3 }
 0x5d3   : > { %v2886_v20 = vadd.f32 %v6257_v29, %v2885_v42 }
 0x5d5   : > { %7485 = vtanh.f32 %v2886_v20 }
 0x5e2   : > { %v7486_v45 = vpop.eup %7485 }
 0x5e3   : > { %v2889_v54 = vmul.f32 %v7486_v45, %v2888_v39 }
 0x5e5   : > { %v8596_v57 = vadd.f32 %v2890_v48, %v2889_v54 }
 0x5e7   : > { %2893 = vst.msk [vmem:[%s2892_s22] sm:$0xf] %vm396_vm0, %v8596_v57  ;;  %7040 = vmatmul.mubr.msk.f32.vlgmr.msra.gmra.mxu1 %vm1137_vm11, %v8596_v57  ;;  %7051 = vmatmul.mubr.msk.f32.vlgmr.msra.gmra.mxu0 %vm1137_vm11, %v8596_v57  ;;  %s8890_s22 = scalar_select %p1891_p4, 7, 8 }
 0x5e8   : > { %7054 = vmatpush3.msra.mxu1 %v8303_v17  ;;  %7061 = vmatprep.mubr.msk.f32.mxu1 %vm7646_vm12, %v7645_v38 }
 0x5e9   : > { %7055 = vmatprep.subr.mxu1 %v7645_v38  ;;  %7065 = vmatpush3.msra.mxu0 %v8248_v50  ;;  %v8623_v50 = vld [vmem:[%s8200_s14 + $0x38] sm:$0xff]  ;;  %s6301_s25 = sshll.u32 %s8890_s22, 2 }
 0x5ea   : > { %7056 = vmatpush3.msra.mxu1 %v8309_v19  ;;  %7066 = vmatprep.subr.mxu0 %v7645_v38  ;;  %s4093_s26 = scalar_lea.vmem [#allocation2], %s6301_s25 }
 0x5eb   : > { %7057 = vmatprep.subr.mxu1 %v7645_v38  ;;  %7067 = vmatpush3.msra.mxu0 %v8259_v58  ;;  %v8631_v58 = vld [vmem:[%s8200_s14 + $0x30] sm:$0xff] }
 0x5ec   : > { %7058 = vmatpush3.msra.mxu1 %v8317_v21  ;;  %7068 = vmatprep.subr.mxu0 %v7645_v38 }
 0x5ed   : > { %7059 = vmatprep.subr.mxu1 %v7645_v38  ;;  %7069 = vmatpush3.msra.mxu0 %v8268_v11  ;;  %v8639_v11 = vld [vmem:[%s8200_s14 + $0x28] sm:$0xff] }
 0x5ee   : > { %7060 = vmatpush3.msra.mxu1 %v8322_v22  ;;  %7070 = vmatprep.subr.mxu0 %v7645_v38  ;;  %v3110_v22 = vld [vmem:[%s3109_s29] sm:$0xf]  ;;  %s4122_s29 = scalar_lea.vmem %s8429_s9, %s6301_s25 }
 0x5ef   : > { %7062 = vmatmul.mubr.msk.f32.vlgmr.msra.gmra.mxu1 %vm1137_vm11, %v8596_v57  ;;  %7075 = vmatprep.subr.mxu1 %v7645_v38 }
 0x5f0   : > { %7076 = vmatpush3.msra.mxu1 %v8623_v50  ;;  %7071 = vmatpush3.msra.mxu0 %v8277_v14  ;;  %v8644_v14 = vld [vmem:[%s8200_s14 + $0x20] sm:$0xff] }
 0x5f1   : > { %7077 = vmatprep.subr.mxu1 %v7645_v38  ;;  %7072 = vmatprep.mubr.msk.f32.mxu0 %vm7646_vm12, %v7645_v38 }
 0x5f2   : > { %7078 = vmatpush3.msra.mxu1 %v8631_v58  ;;  %7083 = vmatprep.mubr.msk.f32.mxu1 %vm7646_vm12, %v7645_v38 }
 0x5f3   : > { %7079 = vmatprep.subr.mxu1 %v7645_v38  ;;  %7086 = vmatprep.subr.mxu0 %v7645_v38 }
 0x5f4   : > { %7080 = vmatpush3.msra.mxu1 %v8639_v11 }
 0x5f5   : > { %7081 = vmatprep.subr.mxu1 %v7645_v38 }
 0x5f6   : > { %7082 = vmatpush3.msra.mxu1 %v8644_v14 }
 0x5f7   : > { %7097 = vmatprep.subr.mxu1 %v7645_v38 }
 0x6a7   : > { %v2964_v17 = vpop.f32.mrf.mxu1  ;;  %v3034_v19 = vpop.f32.mrf.mxu0 }
 0x6a8   : > { %v2965_v21 = vadd.f32 %v8405_v5, %v2964_v17  ;;  %v3035_v35 = vadd.f32 %v8413_v26, %v3034_v19 }
 0x6a9   : > { %v7041_v13 = vpop.f32.mrf.mxu1  ;;  %v7052_v59 = vpop.f32.mrf.mxu0 }
 0x6aa   : > { %v3111_v52 = vadd.f32 %v3110_v22, %v2965_v21  ;;  %v3121_v37 = vadd.f32 %v6264_v40, %v3035_v35  ;;  %v6277_v21 = vld [vmem:[%s3355_s11 + $0x80] sm:$0xf]  ;;  %s9007_s11 = scalar_select %p1891_p4, 5, 10 }
 0x6ac   : > { %v6262_v30 = vmul.f32 -1.442695, %v3111_v52  ;;  %v6265_v44 = vmul.f32 -1.442695, %v3121_v37 }
 0x6ae   : > { %7487 = vpow2.f32 %v6262_v30 }
 0x6af   : > { %v3104_v32 = vpop.f32.mrf.mxu1  ;;  %7489 = vpow2.f32 %v6265_v44  ;;  %v3602_v44 = vld [vmem:[%s3601_s16] sm:$0xf] }
 0x6b0   : > { %v3105_v62 = vadd.f32 %v8422_v51, %v3104_v32 }
 0x6b1   : > { %v7063_v47 = vpop.f32.mrf.mxu1 }
 0x6bb   : > { %v7488_v46 = vpop.eup %7487 }
 0x6bc   : > { %v3115_v27 = vadd.f32 1.0, %v7488_v46  ;;  %v7490_v28 = vpop.eup %7489 }
 0x6bd   : > { %v3125_v61 = vadd.f32 1.0, %v7490_v28 }
 0x6be   : > { %7491 = vrcp.f32 %v3115_v27 }
 0x6bf   : > { %7493 = vrcp.f32 %v3125_v61 }
 0x6cb   : > { %v7492_v55 = vpop.eup %7491 }
 0x6cc   : > { %v3131_v56 = vmul.f32 %v7492_v55, %v3105_v62  ;;  %v7494_v2 = vpop.eup %7493  ;;  %v6284_v55 = vld [vmem:[%s3601_s16 + $0x40] sm:$0xf] }
 0x6cd   : > { %v3134_v63 = vsub.f32 1.0, %v7494_v2  ;;  %v3136_v34 = vmul.f32 %v7494_v2, %v8596_v57 }
 0x6ce   : > { %v3132_v1 = vadd.f32 %v6267_v0, %v3131_v56 }
 0x6d0   : > { %7495 = vtanh.f32 %v3132_v1 }
 0x6dd   : > { %v7496_v60 = vpop.eup %7495 }
 0x6de   : > { %v3135_v3 = vmul.f32 %v7496_v60, %v3134_v63 }
 0x6e0   : > { %v8662_v41 = vadd.f32 %v3136_v34, %v3135_v3 }
 0x6e2   : > { %3139 = vst.msk [vmem:[%s3138_s30] sm:$0xf] %vm396_vm0, %v8662_v41  ;;  %7073 = vmatmul.mubr.msk.f32.vlgmr.msra.gmra.mxu0 %vm1137_vm11, %v8662_v41  ;;  %7084 = vmatmul.mubr.msk.f32.vlgmr.msra.gmra.mxu1 %vm1137_vm11, %v8662_v41 }
 0x6e3   : > { %7087 = vmatpush3.msra.mxu0 %v8671_v4  ;;  %7094 = vmatprep.mubr.msk.f32.mxu0 %vm7646_vm12, %v7645_v38 }
 0x6e4   : > { %7088 = vmatprep.subr.mxu0 %v7645_v38  ;;  %7098 = vmatpush3.msra.mxu1 %v8678_v6 }
 0x6e5   : > { %7089 = vmatpush3.msra.mxu0 %v8682_v49  ;;  %7099 = vmatprep.subr.mxu1 %v7645_v38 }
 0x6e6   : > { %7090 = vmatprep.subr.mxu0 %v7645_v38  ;;  %7100 = vmatpush3.msra.mxu1 %v8688_v7 }
 0x6e7   : > { %7091 = vmatpush3.msra.mxu0 %v8692_v8  ;;  %7101 = vmatprep.subr.mxu1 %v7645_v38 }
 0x6e8   : > { %7092 = vmatprep.subr.mxu0 %v7645_v38  ;;  %7102 = vmatpush3.msra.mxu1 %v8698_v10 }
 0x6e9   : > { %7093 = vmatpush3.msra.mxu0 %v8702_v53  ;;  %7103 = vmatprep.subr.mxu1 %v7645_v38 }
 0x6ea   : > { %7095 = vmatmul.mubr.msk.f32.vlgmr.msra.gmra.mxu0 %vm1137_vm11, %v8662_v41  ;;  %7108 = vmatprep.subr.mxu0 %v7645_v38 }
 0x6eb   : > { %7109 = vmatpush3.msra.mxu0 %v8623_v50  ;;  %7104 = vmatpush3.msra.mxu1 %v8711_v12 }
 0x6ec   : > { %7110 = vmatprep.subr.mxu0 %v7645_v38  ;;  %7105 = vmatprep.mubr.msk.f32.mxu1 %vm7646_vm12, %v7645_v38 }
 0x6ed   : > { %7111 = vmatpush3.msra.mxu0 %v8631_v58  ;;  %7116 = vmatprep.mubr.msk.f32.mxu0 %vm7646_vm12, %v7645_v38 }
 0x6ee   : > { %7112 = vmatprep.subr.mxu0 %v7645_v38  ;;  %7119 = vmatprep.subr.mxu1 %v7645_v38 }
 0x6ef   : > { %7113 = vmatpush3.msra.mxu0 %v8639_v11 }
 0x6f0   : > { %7114 = vmatprep.subr.mxu0 %v7645_v38 }
 0x6f1   : > { %7115 = vmatpush3.msra.mxu0 %v8644_v14 }
 0x6f2   : > { %7130 = vmatprep.subr.mxu0 %v7645_v38 }
 0x7a2   : > { %v3210_v15 = vpop.f32.mrf.mxu0  ;;  %v3280_v16 = vpop.f32.mrf.mxu1 }
 0x7a3   : > { %v3211_v23 = vadd.f32 %v8405_v5, %v3210_v15  ;;  %v3281_v31 = vadd.f32 %v8413_v26, %v3280_v16 }
 0x7a4   : > { %v7074_v24 = vpop.f32.mrf.mxu0  ;;  %v7085_v25 = vpop.f32.mrf.mxu1 }
 0x7a5   : > { %v3357_v18 = vadd.f32 %v3356_v9, %v3211_v23  ;;  %v3367_v29 = vadd.f32 %v6274_v43, %v3281_v31  ;;  %v6287_v23 = vld [vmem:[%s3601_s16 + $0x80] sm:$0xf]  ;;  %s9061_s16 = scalar_select %p1891_p4, 4, 11 }
 0x7a7   : > { %v6272_v36 = vmul.f32 -1.442695, %v3357_v18  ;;  %v6275_v33 = vmul.f32 -1.442695, %v3367_v29 }
 0x7a9   : > { %7497 = vpow2.f32 %v6272_v36 }
 0x7aa   : > { %v3350_v42 = vpop.f32.mrf.mxu0  ;;  %7499 = vpow2.f32 %v6275_v33  ;;  %v3848_v33 = vld [vmem:[%s3847_s20] sm:$0xf] }
 0x7ab   : > { %v3351_v57 = vadd.f32 %v8422_v51, %v3350_v42 }
 0x7ac   : > { %v7096_v20 = vpop.f32.mrf.mxu0 }
 0x7b6   : > { %v7498_v39 = vpop.eup %7497 }
 0x7b7   : > { %v3361_v45 = vadd.f32 1.0, %v7498_v39  ;;  %v7500_v54 = vpop.eup %7499 }
 0x7b8   : > { %v3371_v48 = vadd.f32 1.0, %v7500_v54 }
 0x7b9   : > { %7501 = vrcp.f32 %v3361_v45 }
 0x7ba   : > { %7503 = vrcp.f32 %v3371_v48 }
 0x7c6   : > { %v7502_v17 = vpop.eup %7501 }
 0x7c7   : > { %v3377_v19 = vmul.f32 %v7502_v17, %v3351_v57  ;;  %v7504_v13 = vpop.eup %7503  ;;  %v6294_v17 = vld [vmem:[%s3847_s20 + $0x40] sm:$0xf] }
 0x7c8   : > { %v3380_v59 = vsub.f32 1.0, %v7504_v13  ;;  %v3382_v35 = vmul.f32 %v7504_v13, %v8662_v41 }
 0x7c9   : > { %v3378_v22 = vadd.f32 %v6277_v21, %v3377_v19 }
 0x7cb   : > { %7505 = vtanh.f32 %v3378_v22 }
 0x7d8   : > { %v7506_v52 = vpop.eup %7505 }
 0x7d9   : > { %v3381_v30 = vmul.f32 %v7506_v52, %v3380_v59 }
 0x7db   : > { %v8740_v40 = vadd.f32 %v3382_v35, %v3381_v30 }
 0x7dd   : > { %3385 = vst.msk [vmem:[%s3384_s12] sm:$0xf] %vm396_vm0, %v8740_v40  ;;  %7106 = vmatmul.mubr.msk.f32.vlgmr.msra.gmra.mxu1 %vm1137_vm11, %v8740_v40  ;;  %7117 = vmatmul.mubr.msk.f32.vlgmr.msra.gmra.mxu0 %vm1137_vm11, %v8740_v40  ;;  %s6321_s12 = sshll.u32 %s9007_s11, 2 }
 0x7de   : > { %7120 = vmatpush3.msra.mxu1 %v8671_v4  ;;  %7127 = vmatprep.mubr.msk.f32.mxu1 %vm7646_vm12, %v7645_v38  ;;  %s4585_s13 = scalar_lea.vmem [#allocation2], %s6321_s12  ;;  %s4614_s15 = scalar_lea.vmem %s8429_s9, %s6321_s12 }
 0x7df   : > { %7121 = vmatprep.subr.mxu1 %v7645_v38  ;;  %7131 = vmatpush3.msra.mxu0 %v8678_v6  ;;  %s9285_s12 = scalar_select %p1891_p4, 0, 15 }
 0x7e0   : > { %7122 = vmatpush3.msra.mxu1 %v8682_v49  ;;  %7132 = vmatprep.subr.mxu0 %v7645_v38 }
 0x7e1   : > { %7123 = vmatprep.subr.mxu1 %v7645_v38  ;;  %7133 = vmatpush3.msra.mxu0 %v8688_v7 }
 0x7e2   : > { %7124 = vmatpush3.msra.mxu1 %v8692_v8  ;;  %7134 = vmatprep.subr.mxu0 %v7645_v38 }
 0x7e3   : > { %7125 = vmatprep.subr.mxu1 %v7645_v38  ;;  %7135 = vmatpush3.msra.mxu0 %v8698_v10 }
 0x7e4   : > { %7126 = vmatpush3.msra.mxu1 %v8702_v53  ;;  %7136 = vmatprep.subr.mxu0 %v7645_v38 }
 0x7e5   : > { %7128 = vmatmul.mubr.msk.f32.vlgmr.msra.gmra.mxu1 %vm1137_vm11, %v8740_v40  ;;  %7141 = vmatprep.subr.mxu1 %v7645_v38 }
 0x7e6   : > { %7142 = vmatpush3.msra.mxu1 %v8623_v50  ;;  %7137 = vmatpush3.msra.mxu0 %v8711_v12 }
 0x7e7   : > { %7143 = vmatprep.subr.mxu1 %v7645_v38  ;;  %7138 = vmatprep.mubr.msk.f32.mxu0 %vm7646_vm12, %v7645_v38 }
 0x7e8   : > { %7144 = vmatpush3.msra.mxu1 %v8631_v58  ;;  %7149 = vmatprep.mubr.msk.f32.mxu1 %vm7646_vm12, %v7645_v38 }
 0x7e9   : > { %7145 = vmatprep.subr.mxu1 %v7645_v38  ;;  %7152 = vmatprep.subr.mxu0 %v7645_v38 }
 0x7ea   : > { %7146 = vmatpush3.msra.mxu1 %v8639_v11 }
 0x7eb   : > { %7147 = vmatprep.subr.mxu1 %v7645_v38 }
 0x7ec   : > { %7148 = vmatpush3.msra.mxu1 %v8644_v14 }
 0x7ed   : > { %7163 = vmatprep.subr.mxu1 %v7645_v38 }
 0x89d   : > { %v3456_v32 = vpop.f32.mrf.mxu1  ;;  %v3526_v37 = vpop.f32.mrf.mxu0 }
 0x89e   : > { %v3457_v47 = vadd.f32 %v8405_v5, %v3456_v32  ;;  %v3527_v62 = vadd.f32 %v8413_v26, %v3526_v37 }
 0x89f   : > { %v7107_v46 = vpop.f32.mrf.mxu1  ;;  %v7118_v27 = vpop.f32.mrf.mxu0 }
 0x8a0   : > { %v3603_v28 = vadd.f32 %v3602_v44, %v3457_v47  ;;  %v3613_v0 = vadd.f32 %v6284_v55, %v3527_v62  ;;  %v8894_v55 = vld [vmem:[%s8400_s24] ss:$0 sm:$0xff] }
 0x8a2   : > { %v6282_v61 = vmul.f32 -1.442695, %v3603_v28  ;;  %v6285_v2 = vmul.f32 -1.442695, %v3613_v0  ;;  %v4094_v0 = vld [vmem:[%s4093_s26] sm:$0xf] }
 0x8a4   : > { %7507 = vpow2.f32 %v6282_v61 }
 0x8a5   : > { %v3596_v56 = vpop.f32.mrf.mxu1  ;;  %7509 = vpow2.f32 %v6285_v2 }
 0x8a6   : > { %v3597_v41 = vadd.f32 %v8422_v51, %v3596_v56 }
 0x8a7   : > { %v7129_v1 = vpop.f32.mrf.mxu1 }
 0x8b1   : > { %v7508_v63 = vpop.eup %7507 }
 0x8b2   : > { %v3607_v60 = vadd.f32 1.0, %v7508_v63  ;;  %v7510_v3 = vpop.eup %7509 }
 0x8b3   : > { %v3617_v34 = vadd.f32 1.0, %v7510_v3  ;;  %v8900_v3 = vld [vmem:[%s8400_s24 + $0x1] ss:$0 sm:$0xff] }
 0x8b4   : > { %7511 = vrcp.f32 %v3607_v60 }
 0x8b5   : > { %7513 = vrcp.f32 %v3617_v34 }
 0x8c1   : > { %v7512_v15 = vpop.eup %7511 }
 0x8c2   : > { %v3623_v16 = vmul.f32 %v7512_v15, %v3597_v41  ;;  %v7514_v24 = vpop.eup %7513  ;;  %v6304_v41 = vld [vmem:[%s4093_s26 + $0x40] sm:$0xf] }
 0x8c3   : > { %v3626_v25 = vsub.f32 1.0, %v7514_v24  ;;  %v3628_v31 = vmul.f32 %v7514_v24, %v8740_v40 }
 0x8c4   : > { %v3624_v9 = vadd.f32 %v6287_v23, %v3623_v16 }
 0x8c6   : > { %7515 = vtanh.f32 %v3624_v9 }
 0x8d3   : > { %v7516_v18 = vpop.eup %7515 }
 0x8d4   : > { %v3627_v36 = vmul.f32 %v7516_v18, %v3626_v25 }
 0x8d6   : > { %v8794_v43 = vadd.f32 %v3628_v31, %v3627_v36  ;;  %v8904_v31 = vld [vmem:[%s8400_s24 + $0x2] ss:$0 sm:$0xff]  ;;  %s8953_s24 = scalar_select %p1891_p4, 6, 9 }
 0x8d8   : > { %3631 = vst.msk [vmem:[%s3630_s17] sm:$0xf] %vm396_vm0, %v8794_v43  ;;  %7139 = vmatmul.mubr.msk.f32.vlgmr.msra.gmra.mxu0 %vm1137_vm11, %v8794_v43  ;;  %7150 = vmatmul.mubr.msk.f32.vlgmr.msra.gmra.mxu1 %vm1137_vm11, %v8794_v43  ;;  %s6311_s30 = sshll.u32 %s8953_s24, 2  ;;  %s6331_s17 = sshll.u32 %s9061_s16, 2 }
 0x8d9   : > { %7153 = vmatpush3.msra.mxu0 %v8671_v4  ;;  %7160 = vmatprep.mubr.msk.f32.mxu0 %vm7646_vm12, %v7645_v38  ;;  %s4339_s10 = scalar_lea.vmem [#allocation2], %s6311_s30  ;;  %s4368_s23 = scalar_lea.vmem %s8429_s9, %s6311_s30 }
 0x8da   : > { %7154 = vmatprep.subr.mxu0 %v7645_v38  ;;  %7164 = vmatpush3.msra.mxu1 %v8678_v6  ;;  %s4831_s18 = scalar_lea.vmem [#allocation2], %s6331_s17  ;;  %s4860_s19 = scalar_lea.vmem %s8429_s9, %s6331_s17 }
 0x8db   : > { %7155 = vmatpush3.msra.mxu0 %v8682_v49  ;;  %7165 = vmatprep.subr.mxu1 %v7645_v38  ;;  %s9258_s30 = scalar_select %p1891_p4, 1, 14 }
 0x8dc   : > { %7156 = vmatprep.subr.mxu0 %v7645_v38  ;;  %7166 = vmatpush3.msra.mxu1 %v8688_v7 }
 0x8dd   : > { %7157 = vmatpush3.msra.mxu0 %v8692_v8  ;;  %7167 = vmatprep.subr.mxu1 %v7645_v38 }
 0x8de   : > { %7158 = vmatprep.subr.mxu0 %v7645_v38  ;;  %7168 = vmatpush3.msra.mxu1 %v8698_v10 }
 0x8df   : > { %7159 = vmatpush3.msra.mxu0 %v8702_v53  ;;  %7169 = vmatprep.subr.mxu1 %v7645_v38 }
 0x8e0   : > { %7161 = vmatmul.mubr.msk.f32.vlgmr.msra.gmra.mxu0 %vm1137_vm11, %v8794_v43  ;;  %7174 = vmatprep.subr.mxu0 %v7645_v38 }
 0x8e1   : > { %7175 = vmatpush3.msra.mxu0 %v8623_v50  ;;  %7170 = vmatpush3.msra.mxu1 %v8711_v12 }
 0x8e2   : > { %7176 = vmatprep.subr.mxu0 %v7645_v38  ;;  %7171 = vmatprep.mubr.msk.f32.mxu1 %vm7646_vm12, %v7645_v38 }
 0x8e3   : > { %7177 = vmatpush3.msra.mxu0 %v8631_v58  ;;  %7182 = vmatprep.mubr.msk.f32.mxu0 %vm7646_vm12, %v7645_v38 }
 0x8e4   : > { %7178 = vmatprep.subr.mxu0 %v7645_v38  ;;  %7185 = vmatprep.subr.mxu1 %v7645_v38 }
 0x8e5   : > { %7179 = vmatpush3.msra.mxu0 %v8639_v11 }
 0x8e6   : > { %7180 = vmatprep.subr.mxu0 %v7645_v38 }
 0x8e7   : > { %7181 = vmatpush3.msra.mxu0 %v8644_v14 }
 0x8e8   : > { %7196 = vmatprep.subr.mxu0 %v7645_v38 }
 0x998   : > { %v3702_v42 = vpop.f32.mrf.mxu0  ;;  %v3772_v29 = vpop.f32.mrf.mxu1 }
 0x999   : > { %v3703_v20 = vadd.f32 %v8405_v5, %v3702_v42  ;;  %v3773_v57 = vadd.f32 %v8413_v26, %v3772_v29  ;;  %v6297_v26 = vld [vmem:[%s3847_s20 + $0x80] sm:$0xf]  ;;  %s9127_s20 = scalar_select %p1891_p4, 3, 12 }
 0x99a   : > { %v7140_v39 = vpop.f32.mrf.mxu0  ;;  %v7151_v45 = vpop.f32.mrf.mxu1 }
 0x99b   : > { %v3849_v54 = vadd.f32 %v3848_v33, %v3703_v20  ;;  %v3859_v21 = vadd.f32 %v6294_v17, %v3773_v57  ;;  %v6307_v20 = vld [vmem:[%s4093_s26 + $0x80] sm:$0xf] }
 0x99d   : > { %v6292_v48 = vmul.f32 -1.442695, %v3849_v54  ;;  %v6295_v13 = vmul.f32 -1.442695, %v3859_v21 }
 0x99f   : > { %7517 = vpow2.f32 %v6292_v48 }
 0x9a0   : > { %v3842_v19 = vpop.f32.mrf.mxu0  ;;  %7519 = vpow2.f32 %v6295_v13  ;;  %v4340_v13 = vld [vmem:[%s4339_s10] sm:$0xf] }
 0x9a1   : > { %v3843_v35 = vadd.f32 %v8422_v51, %v3842_v19 }
 0x9a2   : > { %v7162_v22 = vpop.f32.mrf.mxu0 }
 0x9ac   : > { %v7518_v59 = vpop.eup %7517 }
 0x9ad   : > { %v3853_v52 = vadd.f32 1.0, %v7518_v59  ;;  %v7520_v5 = vpop.eup %7519 }
 0x9ae   : > { %v3863_v30 = vadd.f32 1.0, %v7520_v5 }
 0x9af   : > { %7521 = vrcp.f32 %v3853_v52 }
 0x9b0   : > { %7523 = vrcp.f32 %v3863_v30 }
 0x9bc   : > { %v7522_v40 = vpop.eup %7521 }
 0x9bd   : > { %v3869_v32 = vmul.f32 %v7522_v40, %v3843_v35  ;;  %v7524_v47 = vpop.eup %7523  ;;  %v6314_v40 = vld [vmem:[%s4339_s10 + $0x40] sm:$0xf] }
 0x9be   : > { %v3872_v44 = vsub.f32 1.0, %v7524_v47  ;;  %v3874_v28 = vmul.f32 %v7524_v47, %v8794_v43 }
 0x9bf   : > { %v3870_v37 = vadd.f32 %v6297_v26, %v3869_v32 }
 0x9c1   : > { %7525 = vtanh.f32 %v3870_v37 }
 0x9ce   : > { %v7526_v46 = vpop.eup %7525 }
 0x9cf   : > { %v3873_v27 = vmul.f32 %v7526_v46, %v3872_v44 }
 0x9d1   : > { %v8848_v61 = vadd.f32 %v3874_v28, %v3873_v27 }
 0x9d3   : > { %3877 = vst.msk [vmem:[%s3876_s21] sm:$0xf] %vm396_vm0, %v8848_v61  ;;  %7172 = vmatmul.mubr.msk.f32.vlgmr.msra.gmra.mxu1 %vm1137_vm11, %v8848_v61  ;;  %7183 = vmatmul.mubr.msk.f32.vlgmr.msra.gmra.mxu0 %vm1137_vm11, %v8848_v61  ;;  %s6341_s21 = sshll.u32 %s9127_s20, 2 }
 0x9d4   : > { %7186 = vmatpush3.msra.mxu1 %v8671_v4  ;;  %7193 = vmatprep.mubr.msk.f32.mxu1 %vm7646_vm12, %v7645_v38  ;;  %s5077_s22 = scalar_lea.vmem [#allocation2], %s6341_s21  ;;  %s5106_s25 = scalar_lea.vmem %s8429_s9, %s6341_s21 }
 0x9d5   : > { %7187 = vmatprep.subr.mxu1 %v7645_v38  ;;  %7197 = vmatpush3.msra.mxu0 %v8678_v6 }
 0x9d6   : > { %7188 = vmatpush3.msra.mxu1 %v8682_v49  ;;  %7198 = vmatprep.subr.mxu0 %v7645_v38 }
 0x9d7   : > { %7189 = vmatprep.subr.mxu1 %v7645_v38  ;;  %7199 = vmatpush3.msra.mxu0 %v8688_v7 }
 0x9d8   : > { %7190 = vmatpush3.msra.mxu1 %v8692_v8  ;;  %7200 = vmatprep.subr.mxu0 %v7645_v38 }
 0x9d9   : > { %7191 = vmatprep.subr.mxu1 %v7645_v38  ;;  %7201 = vmatpush3.msra.mxu0 %v8698_v10 }
 0x9da   : > { %7192 = vmatpush3.msra.mxu1 %v8702_v53  ;;  %7202 = vmatprep.subr.mxu0 %v7645_v38 }
 0x9db   : > { %7194 = vmatmul.mubr.msk.f32.vlgmr.msra.gmra.mxu1 %vm1137_vm11, %v8848_v61  ;;  %7207 = vmatprep.subr.mxu1 %v7645_v38 }
 0x9dc   : > { %7208 = vmatpush3.msra.mxu1 %v8623_v50  ;;  %7203 = vmatpush3.msra.mxu0 %v8711_v12 }
 0x9dd   : > { %7209 = vmatprep.subr.mxu1 %v7645_v38  ;;  %7204 = vmatprep.mubr.msk.f32.mxu0 %vm7646_vm12, %v7645_v38 }
 0x9de   : > { %7210 = vmatpush3.msra.mxu1 %v8631_v58  ;;  %7215 = vmatprep.mubr.msk.f32.mxu1 %vm7646_vm12, %v7645_v38 }
 0x9df   : > { %7211 = vmatprep.subr.mxu1 %v7645_v38  ;;  %7218 = vmatprep.subr.mxu0 %v7645_v38 }
 0x9e0   : > { %7212 = vmatpush3.msra.mxu1 %v8639_v11 }
 0x9e1   : > { %7213 = vmatprep.subr.mxu1 %v7645_v38 }
 0x9e2   : > { %7214 = vmatpush3.msra.mxu1 %v8644_v14 }
 0x9e3   : > { %7229 = vmatprep.subr.mxu1 %v7645_v38 }
 0xa93   : > { %v3948_v51 = vpop.f32.mrf.mxu1  ;;  %v4018_v62 = vpop.f32.mrf.mxu0 }
 0xa94   : > { %v3949_v56 = vadd.f32 %v8894_v55, %v3948_v51  ;;  %v4019_v34 = vadd.f32 %v8900_v3, %v4018_v62 }
 0xa95   : > { %v7173_v1 = vpop.f32.mrf.mxu1  ;;  %v7184_v2 = vpop.f32.mrf.mxu0 }
 0xa96   : > { %v4095_v63 = vadd.f32 %v4094_v0, %v3949_v56  ;;  %v4105_v16 = vadd.f32 %v6304_v41, %v4019_v34  ;;  %v6317_v56 = vld [vmem:[%s4339_s10 + $0x80] sm:$0xf]  ;;  %s6361_s10 = sshll.u32 %s9258_s30, 2 }
 0xa97   : > { %s5598_s11 = scalar_lea.vmem %s8429_s9, %s6361_s10 }
 0xa98   : > { %v6302_v60 = vmul.f32 -1.442695, %v4095_v63  ;;  %v6305_v9 = vmul.f32 -1.442695, %v4105_v16 }
 0xa9a   : > { %7527 = vpow2.f32 %v6302_v60 }
 0xa9b   : > { %v4088_v15 = vpop.f32.mrf.mxu1  ;;  %7529 = vpow2.f32 %v6305_v9  ;;  %v4586_v9 = vld [vmem:[%s4585_s13] sm:$0xf] }
 0xa9c   : > { %v4089_v43 = vadd.f32 %v8904_v31, %v4088_v15 }
 0xa9d   : > { %v7195_v23 = vpop.f32.mrf.mxu1 }
 0xaa7   : > { %v7528_v24 = vpop.eup %7527 }
 0xaa8   : > { %v4099_v25 = vadd.f32 1.0, %v7528_v24  ;;  %v7530_v18 = vpop.eup %7529 }
 0xaa9   : > { %v4109_v36 = vadd.f32 1.0, %v7530_v18 }
 0xaaa   : > { %7531 = vrcp.f32 %v4099_v25 }
 0xaab   : > { %7533 = vrcp.f32 %v4109_v36 }
 0xab7   : > { %v7532_v42 = vpop.eup %7531 }
 0xab8   : > { %v4115_v29 = vmul.f32 %v7532_v42, %v4089_v43  ;;  %v7534_v39 = vpop.eup %7533  ;;  %v6324_v42 = vld [vmem:[%s4585_s13 + $0x40] sm:$0xf] }
 0xab9   : > { %v4118_v45 = vsub.f32 1.0, %v7534_v39  ;;  %v4120_v57 = vmul.f32 %v7534_v39, %v8848_v61 }
 0xaba   : > { %v4116_v33 = vadd.f32 %v6307_v20, %v4115_v29 }
 0xabc   : > { %7535 = vtanh.f32 %v4116_v33 }
 0xac9   : > { %v7536_v54 = vpop.eup %7535 }
 0xaca   : > { %v4119_v48 = vmul.f32 %v7536_v54, %v4118_v45 }
 0xacc   : > { %v8911_v17 = vadd.f32 %v4120_v57, %v4119_v48 }
 0xace   : > { %4123 = vst.msk [vmem:[%s4122_s29] sm:$0xf] %vm396_vm0, %v8911_v17  ;;  %7205 = vmatmul.mubr.msk.f32.vlgmr.msra.gmra.mxu0 %vm1137_vm11, %v8911_v17  ;;  %7216 = vmatmul.mubr.msk.f32.vlgmr.msra.gmra.mxu1 %vm1137_vm11, %v8911_v17 }
 0xacf   : > { %7219 = vmatpush3.msra.mxu0 %v8671_v4  ;;  %7226 = vmatprep.mubr.msk.f32.mxu0 %vm7646_vm12, %v7645_v38 }
 0xad0   : > { %7220 = vmatprep.subr.mxu0 %v7645_v38  ;;  %7230 = vmatpush3.msra.mxu1 %v8678_v6 }
 0xad1   : > { %7221 = vmatpush3.msra.mxu0 %v8682_v49  ;;  %7231 = vmatprep.subr.mxu1 %v7645_v38 }
 0xad2   : > { %7222 = vmatprep.subr.mxu0 %v7645_v38  ;;  %7232 = vmatpush3.msra.mxu1 %v8688_v7 }
 0xad3   : > { %7223 = vmatpush3.msra.mxu0 %v8692_v8  ;;  %7233 = vmatprep.subr.mxu1 %v7645_v38 }
 0xad4   : > { %7224 = vmatprep.subr.mxu0 %v7645_v38  ;;  %7234 = vmatpush3.msra.mxu1 %v8698_v10 }
 0xad5   : > { %7225 = vmatpush3.msra.mxu0 %v8702_v53  ;;  %7235 = vmatprep.subr.mxu1 %v7645_v38 }
 0xad6   : > { %7227 = vmatmul.mubr.msk.f32.vlgmr.msra.gmra.mxu0 %vm1137_vm11, %v8911_v17  ;;  %7240 = vmatprep.subr.mxu0 %v7645_v38 }
 0xad7   : > { %7241 = vmatpush3.msra.mxu0 %v8623_v50  ;;  %7236 = vmatpush3.msra.mxu1 %v8711_v12 }
 0xad8   : > { %7242 = vmatprep.subr.mxu0 %v7645_v38  ;;  %7237 = vmatprep.mubr.msk.f32.mxu1 %vm7646_vm12, %v7645_v38 }
 0xad9   : > { %7243 = vmatpush3.msra.mxu0 %v8631_v58  ;;  %7248 = vmatprep.mubr.msk.f32.mxu0 %vm7646_vm12, %v7645_v38 }
 0xada   : > { %7244 = vmatprep.subr.mxu0 %v7645_v38  ;;  %7251 = vmatprep.subr.mxu1 %v7645_v38 }
 0xadb   : > { %7245 = vmatpush3.msra.mxu0 %v8639_v11 }
 0xadc   : > { %7246 = vmatprep.subr.mxu0 %v7645_v38 }
 0xadd   : > { %7247 = vmatpush3.msra.mxu0 %v8644_v14 }
 0xade   : > { %7262 = vmatprep.subr.mxu0 %v7645_v38 }
 0xb8e   : > { %v4194_v19 = vpop.f32.mrf.mxu0  ;;  %v4264_v21 = vpop.f32.mrf.mxu1 }
 0xb8f   : > { %v4195_v22 = vadd.f32 %v8894_v55, %v4194_v19  ;;  %v4265_v35 = vadd.f32 %v8900_v3, %v4264_v21 }
 0xb90   : > { %v7206_v59 = vpop.f32.mrf.mxu0  ;;  %v7217_v52 = vpop.f32.mrf.mxu1 }
 0xb91   : > { %v4341_v5 = vadd.f32 %v4340_v13, %v4195_v22  ;;  %v4351_v26 = vadd.f32 %v6314_v40, %v4265_v35  ;;  %v6327_v22 = vld [vmem:[%s4585_s13 + $0x80] sm:$0xf]  ;;  %s6371_s13 = sshll.u32 %s9285_s12, 2 }
 0xb92   : > { %s5844_s28 = scalar_lea.vmem %s8429_s9, %s6371_s13 }
 0xb93   : > { %v6312_v30 = vmul.f32 -1.442695, %v4341_v5  ;;  %v6315_v47 = vmul.f32 -1.442695, %v4351_v26  ;;  %v4832_v26 = vld [vmem:[%s4831_s18] sm:$0xf] }
 0xb95   : > { %7537 = vpow2.f32 %v6312_v30 }
 0xb96   : > { %v4334_v32 = vpop.f32.mrf.mxu0  ;;  %7539 = vpow2.f32 %v6315_v47 }
 0xb97   : > { %v4335_v61 = vadd.f32 %v8904_v31, %v4334_v32 }
 0xb98   : > { %v7228_v37 = vpop.f32.mrf.mxu0 }
 0xba2   : > { %v7538_v44 = vpop.eup %7537 }
 0xba3   : > { %v4345_v46 = vadd.f32 1.0, %v7538_v44  ;;  %v7540_v27 = vpop.eup %7539 }
 0xba4   : > { %v4355_v28 = vadd.f32 1.0, %v7540_v27 }
 0xba5   : > { %7541 = vrcp.f32 %v4345_v46  ;;  %v6334_v46 = vld [vmem:[%s4831_s18 + $0x40] sm:$0xf] }
 0xba6   : > { %7543 = vrcp.f32 %v4355_v28 }
 0xbb2   : > { %v7542_v51 = vpop.eup %7541 }
 0xbb3   : > { %v4361_v62 = vmul.f32 %v7542_v51, %v4335_v61  ;;  %v7544_v1 = vpop.eup %7543 }
 0xbb4   : > { %v4364_v2 = vsub.f32 1.0, %v7544_v1  ;;  %v4366_v34 = vmul.f32 %v7544_v1, %v8911_v17 }
 0xbb5   : > { %v4362_v0 = vadd.f32 %v6317_v56, %v4361_v62 }
 0xbb7   : > { %7545 = vtanh.f32 %v4362_v0 }
 0xbc4   : > { %v7546_v63 = vpop.eup %7545 }
 0xbc5   : > { %v4365_v60 = vmul.f32 %v7546_v63, %v4364_v2 }
 0xbc7   : > { %v8965_v41 = vadd.f32 %v4366_v34, %v4365_v60  ;;  %v6337_v34 = vld [vmem:[%s4831_s18 + $0x80] sm:$0xf] }
 0xbc9   : > { %4369 = vst.msk [vmem:[%s4368_s23] sm:$0xf] %vm396_vm0, %v8965_v41  ;;  %7238 = vmatmul.mubr.msk.f32.vlgmr.msra.gmra.mxu1 %vm1137_vm11, %v8965_v41  ;;  %7249 = vmatmul.mubr.msk.f32.vlgmr.msra.gmra.mxu0 %vm1137_vm11, %v8965_v41  ;;  %s5569_s23 = scalar_lea.vmem [#allocation2], %s6361_s10 }
 0xbca   : > { %7252 = vmatpush3.msra.mxu1 %v8671_v4  ;;  %7259 = vmatprep.mubr.msk.f32.mxu1 %vm7646_vm12, %v7645_v38 }
 0xbcb   : > { %7253 = vmatprep.subr.mxu1 %v7645_v38  ;;  %7263 = vmatpush3.msra.mxu0 %v8678_v6 }
 0xbcc   : > { %7254 = vmatpush3.msra.mxu1 %v8682_v49  ;;  %7264 = vmatprep.subr.mxu0 %v7645_v38 }
 0xbcd   : > { %7255 = vmatprep.subr.mxu1 %v7645_v38  ;;  %7265 = vmatpush3.msra.mxu0 %v8688_v7 }
 0xbce   : > { %7256 = vmatpush3.msra.mxu1 %v8692_v8  ;;  %7266 = vmatprep.subr.mxu0 %v7645_v38 }
 0xbcf   : > { %7257 = vmatprep.subr.mxu1 %v7645_v38  ;;  %7267 = vmatpush3.msra.mxu0 %v8698_v10 }
 0xbd0   : > { %7258 = vmatpush3.msra.mxu1 %v8702_v53  ;;  %7268 = vmatprep.subr.mxu0 %v7645_v38 }
 0xbd1   : > { %7260 = vmatmul.mubr.msk.f32.vlgmr.msra.gmra.mxu1 %vm1137_vm11, %v8965_v41  ;;  %7273 = vmatprep.subr.mxu1 %v7645_v38 }
 0xbd2   : > { %7274 = vmatpush3.msra.mxu1 %v8623_v50  ;;  %7269 = vmatpush3.msra.mxu0 %v8711_v12 }
 0xbd3   : > { %7275 = vmatprep.subr.mxu1 %v7645_v38  ;;  %7270 = vmatprep.mubr.msk.f32.mxu0 %vm7646_vm12, %v7645_v38 }
 0xbd4   : > { %7276 = vmatpush3.msra.mxu1 %v8631_v58  ;;  %7281 = vmatprep.mubr.msk.f32.mxu1 %vm7646_vm12, %v7645_v38 }
 0xbd5   : > { %7277 = vmatprep.subr.mxu1 %v7645_v38  ;;  %7284 = vmatprep.subr.mxu0 %v7645_v38 }
 0xbd6   : > { %7278 = vmatpush3.msra.mxu1 %v8639_v11 }
 0xbd7   : > { %7279 = vmatprep.subr.mxu1 %v7645_v38 }
 0xbd8   : > { %7280 = vmatpush3.msra.mxu1 %v8644_v14 }
 0xbd9   : > { %7295 = vmatprep.subr.mxu1 %v7645_v38 }
 0xc89   : > { %v4440_v15 = vpop.f32.mrf.mxu1  ;;  %v4510_v16 = vpop.f32.mrf.mxu0 }
 0xc8a   : > { %v4441_v23 = vadd.f32 %v8894_v55, %v4440_v15  ;;  %v4511_v43 = vadd.f32 %v8900_v3, %v4510_v16 }
 0xc8b   : > { %v7239_v24 = vpop.f32.mrf.mxu1  ;;  %v7250_v25 = vpop.f32.mrf.mxu0 }
 0xc8c   : > { %v4587_v18 = vadd.f32 %v4586_v9, %v4441_v23  ;;  %v4597_v20 = vadd.f32 %v6324_v42, %v4511_v43 }
 0xc8e   : > { %v6322_v36 = vmul.f32 -1.442695, %v4587_v18  ;;  %v6325_v39 = vmul.f32 -1.442695, %v4597_v20  ;;  %v6344_v20 = vld [vmem:[%s5077_s22 + $0x40] sm:$0xf] }
 0xc90   : > { %7547 = vpow2.f32 %v6322_v36 }
 0xc91   : > { %v4580_v29 = vpop.f32.mrf.mxu1  ;;  %7549 = vpow2.f32 %v6325_v39 }
 0xc92   : > { %v4581_v17 = vadd.f32 %v8904_v31, %v4580_v29 }
 0xc93   : > { %v7261_v33 = vpop.f32.mrf.mxu1 }
 0xc9d   : > { %v7548_v45 = vpop.eup %7547 }
 0xc9e   : > { %v4591_v54 = vadd.f32 1.0, %v7548_v45  ;;  %v7550_v48 = vpop.eup %7549 }
 0xc9f   : > { %v4601_v57 = vadd.f32 1.0, %v7550_v48 }
 0xca0   : > { %7551 = vrcp.f32 %v4591_v54 }
 0xca1   : > { %7553 = vrcp.f32 %v4601_v57 }
 0xcad   : > { %v7552_v19 = vpop.eup %7551 }
 0xcae   : > { %v4607_v21 = vmul.f32 %v7552_v19, %v4581_v17  ;;  %v7554_v59 = vpop.eup %7553 }
 0xcaf   : > { %v4610_v52 = vsub.f32 1.0, %v7554_v59  ;;  %v4612_v35 = vmul.f32 %v7554_v59, %v8965_v41  ;;  %v6347_v59 = vld [vmem:[%s5077_s22 + $0x80] sm:$0xf] }
 0xcb0   : > { %v4608_v13 = vadd.f32 %v6327_v22, %v4607_v21 }
 0xcb2   : > { %7555 = vtanh.f32 %v4608_v13 }
 0xcbf   : > { %v7556_v5 = vpop.eup %7555 }
 0xcc0   : > { %v4611_v30 = vmul.f32 %v7556_v5, %v4610_v52 }
 0xcc2   : > { %v9019_v40 = vadd.f32 %v4612_v35, %v4611_v30 }
 0xcc4   : > { %4615 = vst.msk [vmem:[%s4614_s15] sm:$0xf] %vm396_vm0, %v9019_v40  ;;  %7271 = vmatmul.mubr.msk.f32.vlgmr.msra.gmra.mxu0 %vm1137_vm11, %v9019_v40  ;;  %7282 = vmatmul.mubr.msk.f32.vlgmr.msra.gmra.mxu1 %vm1137_vm11, %v9019_v40  ;;  %s5815_s15 = scalar_lea.vmem [#allocation2], %s6371_s13 }
 0xcc5   : > { %7285 = vmatpush3.msra.mxu0 %v8671_v4  ;;  %7292 = vmatprep.mubr.msk.f32.mxu0 %vm7646_vm12, %v7645_v38 }
 0xcc6   : > { %7286 = vmatprep.subr.mxu0 %v7645_v38  ;;  %7296 = vmatpush3.msra.mxu1 %v8678_v6 }
 0xcc7   : > { %7287 = vmatpush3.msra.mxu0 %v8682_v49  ;;  %7297 = vmatprep.subr.mxu1 %v7645_v38 }
 0xcc8   : > { %7288 = vmatprep.subr.mxu0 %v7645_v38  ;;  %7298 = vmatpush3.msra.mxu1 %v8688_v7 }
 0xcc9   : > { %7289 = vmatpush3.msra.mxu0 %v8692_v8  ;;  %7299 = vmatprep.subr.mxu1 %v7645_v38 }
 0xcca   : > { %7290 = vmatprep.subr.mxu0 %v7645_v38  ;;  %7300 = vmatpush3.msra.mxu1 %v8698_v10 }
 0xccb   : > { %7291 = vmatpush3.msra.mxu0 %v8702_v53  ;;  %7301 = vmatprep.subr.mxu1 %v7645_v38 }
 0xccc   : > { %7293 = vmatmul.mubr.msk.f32.vlgmr.msra.gmra.mxu0 %vm1137_vm11, %v9019_v40  ;;  %7306 = vmatprep.subr.mxu0 %v7645_v38 }
 0xccd   : > { %7307 = vmatpush3.msra.mxu0 %v8623_v50  ;;  %7302 = vmatpush3.msra.mxu1 %v8711_v12 }
 0xcce   : > { %7308 = vmatprep.subr.mxu0 %v7645_v38  ;;  %7303 = vmatprep.mubr.msk.f32.mxu1 %vm7646_vm12, %v7645_v38 }
 0xccf   : > { %7309 = vmatpush3.msra.mxu0 %v8631_v58  ;;  %7314 = vmatprep.mubr.msk.f32.mxu0 %vm7646_vm12, %v7645_v38 }
 0xcd0   : > { %7310 = vmatprep.subr.mxu0 %v7645_v38  ;;  %7317 = vmatprep.subr.mxu1 %v7645_v38 }
 0xcd1   : > { %7311 = vmatpush3.msra.mxu0 %v8639_v11 }
 0xcd2   : > { %7312 = vmatprep.subr.mxu0 %v7645_v38 }
 0xcd3   : > { %7313 = vmatpush3.msra.mxu0 %v8644_v14 }
 0xcd4   : > { %7328 = vmatprep.subr.mxu0 %v7645_v38 }
 0xd84   : > { %v4686_v50 = vpop.f32.mrf.mxu0  ;;  %v4756_v58 = vpop.f32.mrf.mxu1 }
 0xd85   : > { %v4687_v32 = vadd.f32 %v8894_v55, %v4686_v50  ;;  %v4757_v14 = vadd.f32 %v8900_v3, %v4756_v58 }
 0xd86   : > { %v7272_v11 = vpop.f32.mrf.mxu0  ;;  %v7283_v37 = vpop.f32.mrf.mxu1 }
 0xd87   : > { %v4833_v47 = vadd.f32 %v4832_v26, %v4687_v32  ;;  %v4843_v28 = vadd.f32 %v6334_v46, %v4757_v14  ;;  %v9148_v32 = vld [vmem:[%s8200_s14 + $0x58] sm:$0xff]  ;;  %v9159_v11 = vld [vmem:[%s8200_s14 + $0x50] sm:$0xff]  ;;  %v9179_v14 = vld [vmem:[%s8200_s14 + $0x40] sm:$0xff] }
 0xd88   : > { %v9155_v26 = vld [vmem:[%s8200_s14 + $0x18] sm:$0xff]  ;;  %v9165_v37 = vld [vmem:[%s8200_s14 + $0x10] sm:$0xff]  ;;  %v9188_v46 = vld [vmem:[%s8200_s14] sm:$0xff] }
 0xd89   : > { %v6332_v44 = vmul.f32 -1.442695, %v4833_v47  ;;  %v6335_v51 = vmul.f32 -1.442695, %v4843_v28  ;;  %v9169_v47 = vld [vmem:[%s8200_s14 + $0x48] sm:$0xff] }
 0xd8b   : > { %7557 = vpow2.f32 %v6332_v44  ;;  %v9175_v44 = vld [vmem:[%s8200_s14 + $0x8] sm:$0xff] }
 0xd8c   : > { %v4826_v27 = vpop.f32.mrf.mxu0  ;;  %7559 = vpow2.f32 %v6335_v51 }
 0xd8d   : > { %v4827_v2 = vadd.f32 %v8904_v31, %v4826_v27 }
 0xd8e   : > { %v7294_v61 = vpop.f32.mrf.mxu0 }
 0xd98   : > { %v7558_v62 = vpop.eup %7557 }
 0xd99   : > { %v4837_v56 = vadd.f32 1.0, %v7558_v62  ;;  %v7560_v0 = vpop.eup %7559 }
 0xd9a   : > { %v4847_v1 = vadd.f32 1.0, %v7560_v0 }
 0xd9b   : > { %7561 = vrcp.f32 %v4837_v56 }
 0xd9c   : > { %7563 = vrcp.f32 %v4847_v1 }
 0xda8   : > { %v7562_v63 = vpop.eup %7561 }
 0xda9   : > { %v4853_v60 = vmul.f32 %v7562_v63, %v4827_v2  ;;  %v7564_v15 = vpop.eup %7563 }
 0xdaa   : > { %v4856_v16 = vsub.f32 1.0, %v7564_v15  ;;  %v4858_v24 = vmul.f32 %v7564_v15, %v9019_v40 }
 0xdab   : > { %v4854_v41 = vadd.f32 %v6337_v34, %v4853_v60 }
 0xdad   : > { %7565 = vtanh.f32 %v4854_v41 }
 0xdba   : > { %v7566_v23 = vpop.eup %7565 }
 0xdbb   : > { %v4857_v9 = vmul.f32 %v7566_v23, %v4856_v16 }
 0xdbd   : > { %v9073_v25 = vadd.f32 %v4858_v24, %v4857_v9 }
 0xdbf   : > { %4861 = vst.msk [vmem:[%s4860_s19] sm:$0xf] %vm396_vm0, %v9073_v25  ;;  %7304 = vmatmul.mubr.msk.f32.vlgmr.msra.gmra.mxu1 %vm1137_vm11, %v9073_v25  ;;  %7315 = vmatmul.mubr.msk.f32.vlgmr.msra.gmra.mxu0 %vm1137_vm11, %v9073_v25 }
 0xdc0   : > { %7318 = vmatpush3.msra.mxu1 %v8671_v4  ;;  %7325 = vmatprep.mubr.msk.f32.mxu1 %vm7646_vm12, %v7645_v38  ;;  %v9100_v4 = vld [vmem:[%s8200_s14 + $0x38] sm:$0xff] }
 0xdc1   : > { %7319 = vmatprep.subr.mxu1 %v7645_v38  ;;  %7329 = vmatpush3.msra.mxu0 %v8678_v6  ;;  %v9108_v6 = vld [vmem:[%s8200_s14 + $0x30] sm:$0xff] }
 0xdc2   : > { %7320 = vmatpush3.msra.mxu1 %v8682_v49  ;;  %7330 = vmatprep.subr.mxu0 %v7645_v38  ;;  %v9116_v49 = vld [vmem:[%s8200_s14 + $0x28] sm:$0xff] }
 0xdc3   : > { %7321 = vmatprep.subr.mxu1 %v7645_v38  ;;  %7331 = vmatpush3.msra.mxu0 %v8688_v7  ;;  %v9121_v7 = vld [vmem:[%s8200_s14 + $0x20] sm:$0xff]  ;;  %s9205_s14 = scalar_select %p1891_p4, 2, 13 }
 0xdc4   : > { %7322 = vmatpush3.msra.mxu1 %v8692_v8  ;;  %7332 = vmatprep.subr.mxu0 %v7645_v38 }
 0xdc5   : > { %7323 = vmatprep.subr.mxu1 %v7645_v38  ;;  %7333 = vmatpush3.msra.mxu0 %v8698_v10  ;;  %s6351_s26 = sshll.u32 %s9205_s14, 2 }
 0xdc6   : > { %7324 = vmatpush3.msra.mxu1 %v8702_v53  ;;  %7334 = vmatprep.subr.mxu0 %v7645_v38  ;;  %s5323_s29 = scalar_lea.vmem [#allocation2], %s6351_s26  ;;  %s5352_s24 = scalar_lea.vmem %s8429_s9, %s6351_s26 }
 0xdc7   : > { %7326 = vmatmul.mubr.msk.f32.vlgmr.msra.gmra.mxu1 %vm1137_vm11, %v9073_v25  ;;  %7339 = vmatprep.subr.mxu1 %v7645_v38  ;;  %v5324_v51 = vld [vmem:[%s5323_s29] sm:$0xf] }
 0xdc8   : > { %7340 = vmatpush3.msra.mxu1 %v9100_v4  ;;  %7335 = vmatpush3.msra.mxu0 %v8711_v12  ;;  %v5078_v12 = vld [vmem:[%s5077_s22] sm:$0xf] }
 0xdc9   : > { %7341 = vmatprep.subr.mxu1 %v7645_v38  ;;  %7336 = vmatprep.mubr.msk.f32.mxu0 %vm7646_vm12, %v7645_v38  ;;  %v6354_v63 = vld [vmem:[%s5323_s29 + $0x40] sm:$0xf] }
 0xdca   : > { %7342 = vmatpush3.msra.mxu1 %v9108_v6  ;;  %7347 = vmatprep.mubr.msk.f32.mxu1 %vm7646_vm12, %v7645_v38 }
 0xdcb   : > { %7343 = vmatprep.subr.mxu1 %v7645_v38  ;;  %7350 = vmatprep.subr.mxu0 %v7645_v38 }
 0xdcc   : > { %7344 = vmatpush3.msra.mxu1 %v9116_v49 }
 0xdcd   : > { %7345 = vmatprep.subr.mxu1 %v7645_v38 }
 0xdce   : > { %7346 = vmatpush3.msra.mxu1 %v9121_v7 }
 0xdcf   : > { %7361 = vmatprep.subr.mxu1 %v7645_v38 }
 0xe7f   : > { %v4932_v8 = vpop.f32.mrf.mxu1  ;;  %v5002_v10 = vpop.f32.mrf.mxu0 }
 0xe80   : > { %v4933_v53 = vadd.f32 %v8894_v55, %v4932_v8  ;;  %v5003_v29 = vadd.f32 %v8900_v3, %v5002_v10 }
 0xe81   : > { %v7305_v18 = vpop.f32.mrf.mxu1  ;;  %v7316_v36 = vpop.f32.mrf.mxu0 }
 0xe82   : > { %v5079_v43 = vadd.f32 %v5078_v12, %v4933_v53  ;;  %v5089_v39 = vadd.f32 %v6344_v20, %v5003_v29  ;;  %v6357_v53 = vld [vmem:[%s5323_s29 + $0x80] sm:$0xf] }
 0xe84   : > { %v6342_v42 = vmul.f32 -1.442695, %v5079_v43  ;;  %v6345_v54 = vmul.f32 -1.442695, %v5089_v39  ;;  %v5570_v39 = vld [vmem:[%s5569_s23] sm:$0xf] }
 0xe86   : > { %7567 = vpow2.f32 %v6342_v42 }
 0xe87   : > { %v5072_v33 = vpop.f32.mrf.mxu1  ;;  %7569 = vpow2.f32 %v6345_v54 }
 0xe88   : > { %v5073_v21 = vadd.f32 %v8904_v31, %v5072_v33 }
 0xe89   : > { %v7327_v45 = vpop.f32.mrf.mxu1 }
 0xe93   : > { %v7568_v48 = vpop.eup %7567 }
 0xe94   : > { %v5083_v57 = vadd.f32 1.0, %v7568_v48  ;;  %v7570_v17 = vpop.eup %7569 }
 0xe95   : > { %v5093_v19 = vadd.f32 1.0, %v7570_v17 }
 0xe96   : > { %7571 = vrcp.f32 %v5083_v57 }
 0xe97   : > { %7573 = vrcp.f32 %v5093_v19 }
 0xea3   : > { %v7572_v22 = vpop.eup %7571 }
 0xea4   : > { %v5099_v13 = vmul.f32 %v7572_v22, %v5073_v21  ;;  %v7574_v5 = vpop.eup %7573 }
 0xea5   : > { %v5102_v30 = vsub.f32 1.0, %v7574_v5  ;;  %v5104_v50 = vmul.f32 %v7574_v5, %v9073_v25 }
 0xea6   : > { %v5100_v52 = vadd.f32 %v6347_v59, %v5099_v13 }
 0xea8   : > { %7575 = vtanh.f32 %v5100_v52 }
 0xeb5   : > { %v7576_v35 = vpop.eup %7575 }
 0xeb6   : > { %v5103_v40 = vmul.f32 %v7576_v35, %v5102_v30 }
 0xeb8   : > { %v9139_v58 = vadd.f32 %v5104_v50, %v5103_v40  ;;  %v6367_v50 = vld [vmem:[%s5569_s23 + $0x80] sm:$0xf] }
 0xeba   : > { %5107 = vst.msk [vmem:[%s5106_s25] sm:$0xf] %vm396_vm0, %v9139_v58  ;;  %7337 = vmatmul.mubr.msk.f32.vlgmr.msra.gmra.mxu0 %vm1137_vm11, %v9139_v58  ;;  %7348 = vmatmul.mubr.msk.f32.vlgmr.msra.gmra.mxu1 %vm1137_vm11, %v9139_v58 }
 0xebb   : > { %7351 = vmatpush3.msra.mxu0 %v9148_v32  ;;  %7358 = vmatprep.mubr.msk.f32.mxu0 %vm7646_vm12, %v7645_v38 }
 0xebc   : > { %7352 = vmatprep.subr.mxu0 %v7645_v38  ;;  %7362 = vmatpush3.msra.mxu1 %v9155_v26 }
 0xebd   : > { %7353 = vmatpush3.msra.mxu0 %v9159_v11  ;;  %7363 = vmatprep.subr.mxu1 %v7645_v38 }
 0xebe   : > { %7354 = vmatprep.subr.mxu0 %v7645_v38  ;;  %7364 = vmatpush3.msra.mxu1 %v9165_v37 }
 0xebf   : > { %7355 = vmatpush3.msra.mxu0 %v9169_v47  ;;  %7365 = vmatprep.subr.mxu1 %v7645_v38 }
 0xec0   : > { %7356 = vmatprep.subr.mxu0 %v7645_v38  ;;  %7366 = vmatpush3.msra.mxu1 %v9175_v44 }
 0xec1   : > { %7357 = vmatpush3.msra.mxu0 %v9179_v14  ;;  %7367 = vmatprep.subr.mxu1 %v7645_v38 }
 0xec2   : > { %7359 = vmatmul.mubr.msk.f32.vlgmr.msra.gmra.mxu0 %vm1137_vm11, %v9139_v58  ;;  %7372 = vmatprep.subr.mxu0 %v7645_v38 }
 0xec3   : > { %7373 = vmatpush3.msra.mxu0 %v9100_v4  ;;  %7368 = vmatpush3.msra.mxu1 %v9188_v46 }
 0xec4   : > { %7374 = vmatprep.subr.mxu0 %v7645_v38  ;;  %7369 = vmatprep.mubr.msk.f32.mxu1 %vm7646_vm12, %v7645_v38 }
 0xec5   : > { %7375 = vmatpush3.msra.mxu0 %v9108_v6  ;;  %7380 = vmatprep.mubr.msk.f32.mxu0 %vm7646_vm12, %v7645_v38 }
 0xec6   : > { %7376 = vmatprep.subr.mxu0 %v7645_v38  ;;  %7383 = vmatprep.subr.mxu1 %v7645_v38 }
 0xec7   : > { %7377 = vmatpush3.msra.mxu0 %v9116_v49 }
 0xec8   : > { %7378 = vmatprep.subr.mxu0 %v7645_v38 }
 0xec9   : > { %7379 = vmatpush3.msra.mxu0 %v9121_v7 }
 0xeca   : > { %7394 = vmatprep.subr.mxu0 %v7645_v38 }
 0xf7a   : > { %v5178_v27 = vpop.f32.mrf.mxu0  ;;  %v5248_v28 = vpop.f32.mrf.mxu1 }
 0xf7b   : > { %v5179_v61 = vadd.f32 %v8894_v55, %v5178_v27  ;;  %v5249_v2 = vadd.f32 %v8900_v3, %v5248_v28 }
 0xf7c   : > { %v7338_v62 = vpop.f32.mrf.mxu0  ;;  %v7349_v56 = vpop.f32.mrf.mxu1 }
 0xf7d   : > { %v5325_v0 = vadd.f32 %v5324_v51, %v5179_v61  ;;  %v5335_v34 = vadd.f32 %v6354_v63, %v5249_v2  ;;  %v5816_v51 = vld [vmem:[%s5815_s15] sm:$0xf] }
 0xf7f   : > { %v6352_v1 = vmul.f32 -1.442695, %v5325_v0  ;;  %v6355_v15 = vmul.f32 -1.442695, %v5335_v34  ;;  %v6374_v0 = vld [vmem:[%s5815_s15 + $0x40] sm:$0xf] }
 0xf81   : > { %7577 = vpow2.f32 %v6352_v1 }
 0xf82   : > { %v5318_v60 = vpop.f32.mrf.mxu0  ;;  %7579 = vpow2.f32 %v6355_v15 }
 0xf83   : > { %v5319_v25 = vadd.f32 %v8904_v31, %v5318_v60 }
 0xf84   : > { %v7360_v41 = vpop.f32.mrf.mxu0 }
 0xf8e   : > { %v7578_v16 = vpop.eup %7577 }
 0xf8f   : > { %v5329_v23 = vadd.f32 1.0, %v7578_v16  ;;  %v7580_v9 = vpop.eup %7579 }
 0xf90   : > { %v5339_v24 = vadd.f32 1.0, %v7580_v9 }
 0xf91   : > { %7581 = vrcp.f32 %v5329_v23 }
 0xf92   : > { %7583 = vrcp.f32 %v5339_v24 }
 0xf9e   : > { %v7582_v8 = vpop.eup %7581 }
 0xf9f   : > { %v5345_v10 = vmul.f32 %v7582_v8, %v5319_v25  ;;  %v7584_v18 = vpop.eup %7583 }
 0xfa0   : > { %v5348_v36 = vsub.f32 1.0, %v7584_v18  ;;  %v5350_v29 = vmul.f32 %v7584_v18, %v9139_v58 }
 0xfa1   : > { %v5346_v12 = vadd.f32 %v6357_v53, %v5345_v10 }
 0xfa3   : > { %7585 = vtanh.f32 %v5346_v12 }
 0xfb0   : > { %v7586_v43 = vpop.eup %7585 }
 0xfb1   : > { %v5349_v42 = vmul.f32 %v7586_v43, %v5348_v36 }
 0xfb3   : > { %v9217_v20 = vadd.f32 %v5350_v29, %v5349_v42 }
 0xfb5   : > { %5353 = vst.msk [vmem:[%s5352_s24] sm:$0xf] %vm396_vm0, %v9217_v20  ;;  %7370 = vmatmul.mubr.msk.f32.vlgmr.msra.gmra.mxu1 %vm1137_vm11, %v9217_v20  ;;  %7381 = vmatmul.mubr.msk.f32.vlgmr.msra.gmra.mxu0 %vm1137_vm11, %v9217_v20 }
 0xfb6   : > { %7384 = vmatpush3.msra.mxu1 %v9148_v32  ;;  %7391 = vmatprep.mubr.msk.f32.mxu1 %vm7646_vm12, %v7645_v38 }
 0xfb7   : > { %7385 = vmatprep.subr.mxu1 %v7645_v38  ;;  %7395 = vmatpush3.msra.mxu0 %v9155_v26 }
 0xfb8   : > { %7386 = vmatpush3.msra.mxu1 %v9159_v11  ;;  %7396 = vmatprep.subr.mxu0 %v7645_v38 }
 0xfb9   : > { %7387 = vmatprep.subr.mxu1 %v7645_v38  ;;  %7397 = vmatpush3.msra.mxu0 %v9165_v37 }
 0xfba   : > { %7388 = vmatpush3.msra.mxu1 %v9169_v47  ;;  %7398 = vmatprep.subr.mxu0 %v7645_v38 }
 0xfbb   : > { %7389 = vmatprep.subr.mxu1 %v7645_v38  ;;  %7399 = vmatpush3.msra.mxu0 %v9175_v44 }
 0xfbc   : > { %7390 = vmatpush3.msra.mxu1 %v9179_v14  ;;  %7400 = vmatprep.subr.mxu0 %v7645_v38 }
 0xfbd   : > { %7392 = vmatmul.mubr.msk.f32.vlgmr.msra.gmra.mxu1 %vm1137_vm11, %v9217_v20  ;;  %7405 = vmatprep.subr.mxu1 %v7645_v38 }
 0xfbe   : > { %7406 = vmatpush3.msra.mxu1 %v9100_v4  ;;  %7401 = vmatpush3.msra.mxu0 %v9188_v46 }
 0xfbf   : > { %7407 = vmatprep.subr.mxu1 %v7645_v38  ;;  %7402 = vmatprep.mubr.msk.f32.mxu0 %vm7646_vm12, %v7645_v38 }
 0xfc0   : > { %7408 = vmatpush3.msra.mxu1 %v9108_v6  ;;  %7413 = vmatprep.mubr.msk.f32.mxu1 %vm7646_vm12, %v7645_v38 }
 0xfc1   : > { %7409 = vmatprep.subr.mxu1 %v7645_v38  ;;  %7416 = vmatprep.subr.mxu0 %v7645_v38 }
 0xfc2   : > { %7410 = vmatpush3.msra.mxu1 %v9116_v49 }
 0xfc3   : > { %7411 = vmatprep.subr.mxu1 %v7645_v38 }
 0xfc4   : > { %7412 = vmatpush3.msra.mxu1 %v9121_v7  ;;  %v6364_v7 = vld [vmem:[%s5569_s23 + $0x40] sm:$0xf] }
0x1075   : > { %v5424_v4 = vpop.f32.mrf.mxu1  ;;  %v5494_v6 = vpop.f32.mrf.mxu0 }
0x1076   : > { %v5425_v33 = vadd.f32 %v8894_v55, %v5424_v4  ;;  %v5495_v57 = vadd.f32 %v8900_v3, %v5494_v6 }
0x1077   : > { %v7371_v45 = vpop.f32.mrf.mxu1  ;;  %v7382_v54 = vpop.f32.mrf.mxu0 }
0x1078   : > { %v5571_v49 = vadd.f32 %v5570_v39, %v5425_v33  ;;  %v5581_v19 = vadd.f32 %v6364_v7, %v5495_v57 }
0x107a   : > { %v6362_v48 = vmul.f32 -1.442695, %v5571_v49  ;;  %v6365_v22 = vmul.f32 -1.442695, %v5581_v19 }
0x107c   : > { %7587 = vpow2.f32 %v6362_v48 }
0x107d   : > { %v5564_v17 = vpop.f32.mrf.mxu1  ;;  %7589 = vpow2.f32 %v6365_v22 }
0x107e   : > { %v5565_v30 = vadd.f32 %v8904_v31, %v5564_v17 }
0x107f   : > { %v7393_v21 = vpop.f32.mrf.mxu1 }
0x1089   : > { %v7588_v13 = vpop.eup %7587 }
0x108a   : > { %v5575_v59 = vadd.f32 1.0, %v7588_v13  ;;  %v7590_v52 = vpop.eup %7589 }
0x108b   : > { %v5585_v5 = vadd.f32 1.0, %v7590_v52 }
0x108c   : > { %7591 = vrcp.f32 %v5575_v59 }
0x108d   : > { %7593 = vrcp.f32 %v5585_v5 }
0x1099   : > { %v7592_v35 = vpop.eup %7591 }
0x109a   : > { %v5591_v40 = vmul.f32 %v7592_v35, %v5565_v30  ;;  %v7594_v26 = vpop.eup %7593 }
0x109b   : > { %v5594_v37 = vsub.f32 1.0, %v7594_v26  ;;  %v5596_v27 = vmul.f32 %v7594_v26, %v9217_v20 }
0x109c   : > { %v5592_v58 = vadd.f32 %v6367_v50, %v5591_v40 }
0x109e   : > { %7595 = vtanh.f32 %v5592_v58 }
0x10ab   : > { %v7596_v44 = vpop.eup %7595 }
0x10ac   : > { %v5595_v46 = vmul.f32 %v7596_v44, %v5594_v37 }
0x10ae   : > { %v5597_v28 = vadd.f32 %v5596_v27, %v5595_v46 }
0x10b0   : > { %5599 = vst.msk [vmem:[%s5598_s11] sm:$0xf] %vm396_vm0, %v5597_v28  ;;  %7403 = vmatmul.mubr.msk.f32.vlgmr.msra.gmra.mxu0 %vm1137_vm11, %v5597_v28  ;;  %7414 = vmatmul.mubr.msk.f32.vlgmr.msra.gmra.mxu1 %vm1137_vm11, %v5597_v28 }
0x10b1   : > { %7417 = vmatpush3.msra.mxu0 %v9148_v32  ;;  %7424 = vmatprep.mubr.msk.f32.mxu0 %vm7646_vm12, %v7645_v38 }
0x10b2   : > { %7418 = vmatprep.subr.mxu0 %v7645_v38 }
0x10b3   : > { %7419 = vmatpush3.msra.mxu0 %v9159_v11 }
0x10b4   : > { %7420 = vmatprep.subr.mxu0 %v7645_v38 }
0x10b5   : > { %7421 = vmatpush3.msra.mxu0 %v9169_v47 }
0x10b6   : > { %7422 = vmatprep.subr.mxu0 %v7645_v38 }
0x10b7   : > { %7423 = vmatpush3.msra.mxu0 %v9179_v14 }
0x10b8   : > { %7425 = vmatmul.mubr.msk.f32.vlgmr.msra.gmra.mxu0 %vm1137_vm11, %v5597_v28 }
0x1170   : > { %v5670_v32 = vpop.f32.mrf.mxu0  ;;  %v5740_v61 = vpop.f32.mrf.mxu1 }
0x1171   : > { %v5671_v11 = vadd.f32 %v8894_v55, %v5670_v32  ;;  %v5741_v14 = vadd.f32 %v8900_v3, %v5740_v61  ;;  %v6377_v3 = vld [vmem:[%s5815_s15 + $0x80] sm:$0xf] }
0x1172   : > { %v7404_v47 = vpop.f32.mrf.mxu0  ;;  %v7415_v62 = vpop.f32.mrf.mxu1 }
0x1173   : > { %v5817_v38 = vadd.f32 %v5816_v51, %v5671_v11  ;;  %v5827_v2 = vadd.f32 %v6374_v0, %v5741_v14 }
0x1175   : > { %v6372_v56 = vmul.f32 -1.442695, %v5817_v38  ;;  %v6375_v60 = vmul.f32 -1.442695, %v5827_v2 }
0x1177   : > { %7597 = vpow2.f32 %v6372_v56 }
0x1178   : > { %v5810_v1 = vpop.f32.mrf.mxu0  ;;  %7599 = vpow2.f32 %v6375_v60 }
0x1179   : > { %v5811_v16 = vadd.f32 %v8904_v31, %v5810_v1 }
0x117a   : > { %v7426_v63 = vpop.f32.mrf.mxu0 }
0x1184   : > { %v7598_v34 = vpop.eup %7597 }
0x1185   : > { %v5821_v41 = vadd.f32 1.0, %v7598_v34  ;;  %v7600_v55 = vpop.eup %7599 }
0x1186   : > { %v5831_v15 = vadd.f32 1.0, %v7600_v55 }
0x1187   : > { %7601 = vrcp.f32 %v5821_v41 }
0x1188   : > { %7603 = vrcp.f32 %v5831_v15 }
0x1194   : > { %v7602_v23 = vpop.eup %7601 }
0x1195   : > { %v5837_v9 = vmul.f32 %v7602_v23, %v5811_v16  ;;  %v7604_v25 = vpop.eup %7603 }
0x1196   : > { %v5840_v8 = vsub.f32 1.0, %v7604_v25  ;;  %v5842_v53 = vmul.f32 %v7604_v25, %v5597_v28 }
0x1197   : > { %v5838_v24 = vadd.f32 %v6377_v3, %v5837_v9 }
0x1199   : > { %7605 = vtanh.f32 %v5838_v24 }
0x11a6   : > { %v7606_v10 = vpop.eup %7605 }
0x11a7   : > { %v5841_v12 = vmul.f32 %v7606_v10, %v5840_v8 }
0x11a9   : > { %v5843_v18 = vadd.f32 %v5842_v53, %v5841_v12 }
0x11ab   : > { %5845 = vst.msk [vmem:[%s5844_s28] sm:$0xf] %vm396_vm0, %v5843_v18 }
0x11ac PF: > { %s18_s27 = sadd.s32 1, %s7640_s27  }
0x11ad   : > { %p15_p5 = scmp.ge.s32.totalorder %s18_s27, 4  }
0x11af   :  { %17 = sbr.rel (!%p15_p5) target bundleno = 1 (0x1), region = 170 }

</bundles_post_ra>
